<compile_context>
chip_gen: v5e
topology: v5e:2x2
jax: 0.10.0
libtpu: 0.0.40
codegen_flags: <defaults>
</compile_context>

<pallas_src>
import functools

import numpy as np
import jax
import jax.numpy as jnp
from jax.experimental import pallas as pl
from jax.experimental.pallas import tpu as pltpu


# ---------------------------------------------------------------------------
# Fused kernel: whole CustomBlock for B images per grid step.
# ---------------------------------------------------------------------------
def _fused_block_kernel(*refs, B, H, W, cin, cout, cr, has_skip, Gd, XLseg, LC):
    if has_skip:
        (xpad_ref, mask_ref, w1s_ref, w2_ref, cvec_ref, sew_ref, seb1_ref,
         out_ref, out1g_ref, p1_ref, p2_ref) = refs
        xid_ref = None
    else:
        (xpad_ref, xid_ref, mask_ref, w1s_ref, w2_ref, cvec_ref, sew_ref,
         seb1_ref, out_ref, out1g_ref, p1_ref, p2_ref) = refs

    Wp = W + 2
    HW = H * W
    tap_base = Gd - Wp - 1        # lane offset of tap (dy,dx)=(0,0) in a guarded slab

    cvec = cvec_ref[...]          # (Cout, 8) packed per-channel constants (f32)
    bn1_s, bn1_b = cvec[:, 0:1], cvec[:, 1:2]
    bn2_s, bn2_b = cvec[:, 2:3], cvec[:, 3:4]
    bns_s, bns_b = cvec[:, 4:5], cvec[:, 5:6]
    se_b2 = cvec[:, 6:7]
    mask = mask_ref[...]          # (1, LC): 1.0 on the HxW interior, 0.0 on halo/pad
    sew = sew_ref[...]            # (Cout, 2*Cr)
    se_w1, se_w2t = sew[:, 0:cr], sew[:, cr:2 * cr]
    se_b1 = seb1_ref[...]         # (1, Cr)

    # Zero only the guard bands of the conv2 staging slab (aligned, lane-dense);
    # the interior [Gd:Gd+LC] is fully overwritten per image below.
    out1g_ref[:, 0:Gd] = jnp.zeros((cout, Gd), out1g_ref.dtype)
    out1g_ref[:, Gd + LC:XLseg] = jnp.zeros((cout, XLseg - Gd - LC), out1g_ref.dtype)

    for b in range(B):            # static unroll over the images of this block
        # --- conv1 (+ fused 1x1 skip) as ONE im2col GEMM, K = 9*Cin ------------
        for t in range(9):
            dy, dx = divmod(t, 3)
            src = tap_base + dy * Wp + dx
            p1_ref[t * cin:(t + 1) * cin, :] = xpad_ref[b, :, src:src + LC]
        acc = jnp.dot(w1s_ref[...], p1_ref[...],
                      preferred_element_type=jnp.float32)   # (2*Cout | Cout, LC)
        acc1 = acc[:cout, :]
        # BN1 + ReLU; mask zeroes the halo so conv2 sees proper zero padding.
        out1 = jnp.maximum(acc1 * bn1_s + bn1_b, 0.0) * mask
        out1g_ref[:, Gd:Gd + LC] = out1.astype(out1g_ref.dtype)   # aligned bf16 store

        # --- conv2 as ONE im2col GEMM, K = 9*Cout ------------------------------
        for t in range(9):
            dy, dx = divmod(t, 3)
            src = tap_base + dy * Wp + dx
            p2_ref[t * cout:(t + 1) * cout, :] = out1g_ref[:, src:src + LC]
        acc2 = jnp.dot(w2_ref[...], p2_ref[...],
                       preferred_element_type=jnp.float32)  # (Cout, LC)
        out2 = (acc2 * bn2_s + bn2_b) * mask                # BN2, halo zeroed

        # --- skip branch (1x1 conv+BN came out of the fused GEMM) --------------
        if has_skip:
            ident = acc[cout:, :] * bns_s + bns_b
        else:
            ident = xid_ref[b]                              # f32 residual (Cin==Cout)

        # --- SE: masked global pool + two tiny FCs on the VPU/XLU (no MXU push) -
        pooled = jnp.sum(out2, axis=1, keepdims=True) * (1.0 / HW)        # (Cout,1)
        hvec = jnp.maximum(jnp.sum(pooled * se_w1, axis=0, keepdims=True)
                           + se_b1, 0.0)                                  # (1, Cr)
        gate = jax.nn.sigmoid(jnp.sum(se_w2t * hvec, axis=1, keepdims=True)
                              + se_b2)                                    # (Cout,1)

        # --- gate + residual + final ReLU (Dropout2d(0.1) identity in eval) ----
        # Lane-dense (Cout, LC) store; halo lanes hold garbage and are stripped
        # in the wrapper.
        out_ref[b, :, :] = jnp.maximum(out2 * gate + ident, 0.0)


# ---------------------------------------------------------------------------
# Wrapper
# ---------------------------------------------------------------------------
def custom_block_forward(x_nchw, P):
    N, Cin, H, W = x_nchw.shape
    Cout = P['w2mat'].shape[0]
    Cr = P['seb1'].shape[1]
    has_skip = (Cin != Cout)

    Hp, Wp = H + 2, W + 2
    L = Hp * Wp                             # padded-flat image length
    LC = ((L + 127) // 128) * 128           # lane-padded compute width
    Gd = 128                                # lane-aligned interior start (>= Wp+1)
    assert Wp + 1 <= Gd, "spatial size too large for single-slab layout"
    XLseg = Gd + LC + 128                   # head guard + interior + tail guard

    # Images per grid step: amortize per-step overhead, but keep >= 2 grid steps
    # so both v7x TensorCores get work under dimension_semantics=("parallel",).
    B = 1
    for cand in range(min(8, N), 0, -1):
        if N % cand == 0 and N // cand >= 2:
            B = cand
            break
    grid = (N // B,)

    # ---- wrapper-side padding / layout plumbing (cheap XLA, keeps the kernel
    # free of misaligned masked stores) ----------------------------------------
    xp = jnp.pad(x_nchw, ((0, 0), (0, 0), (1, 1), (1, 1))).reshape(N, Cin, L)
    x_pad = jnp.pad(xp, ((0, 0), (0, 0), (Gd, XLseg - Gd - L))).astype(jnp.bfloat16)

    # interior mask in padded-flat coordinates (baked compile-time constant)
    cols = np.arange(LC)
    ii, jj = cols // Wp, cols % Wp
    mask_np = ((ii >= 1) & (ii <= H) & (jj >= 1) & (jj <= W) & (cols < L))
    mask = jnp.asarray(mask_np.astype(np.float32))[None, :]

    kern = functools.partial(_fused_block_kernel, B=B, H=H, W=W, cin=Cin,
                             cout=Cout, cr=Cr, has_skip=has_skip,
                             Gd=Gd, XLseg=XLseg, LC=LC)

    inputs = [x_pad]
    in_specs = [pl.BlockSpec((B, Cin, XLseg), lambda g: (g, 0, 0))]
    if not has_skip:
        # f32 residual source (keep identity path full precision)
        x_id = jnp.pad(xp, ((0, 0), (0, 0), (0, LC - L)))
        inputs.append(x_id)
        in_specs.append(pl.BlockSpec((B, Cin, LC), lambda g: (g, 0, 0)))
    inputs += [mask, P['w1s'], P['w2mat'], P['cvec'], P['sew'], P['seb1']]
    in_specs += [
        pl.BlockSpec((1, LC), lambda g: (0, 0)),             # interior mask
        pl.BlockSpec(P['w1s'].shape, lambda g: (0, 0)),      # conv1 (+skip) weights
        pl.BlockSpec(P['w2mat'].shape, lambda g: (0, 0)),    # conv2 weights
        pl.BlockSpec((Cout, 8), lambda g: (0, 0)),           # packed BN/SE consts
        pl.BlockSpec((Cout, 2 * Cr), lambda g: (0, 0)),      # SE fc weights
        pl.BlockSpec((1, Cr), lambda g: (0, 0)),             # SE fc1 bias
    ]

    out_pad = pl.pallas_call(
        kern,
        out_shape=jax.ShapeDtypeStruct((N, Cout, LC), jnp.float32),
        grid=grid,
        in_specs=in_specs,
        out_specs=pl.BlockSpec((B, Cout, LC), lambda g: (g, 0, 0)),
        scratch_shapes=[
            pltpu.VMEM((Cout, XLseg), jnp.bfloat16),      # guarded conv2 input slab
            pltpu.VMEM((9 * Cin, LC), jnp.bfloat16),      # im2col for conv1
            pltpu.VMEM((9 * Cout, LC), jnp.bfloat16),     # im2col for conv2
        ],
        compiler_params=pltpu.CompilerParams(
            dimension_semantics=("parallel",),
            vmem_limit_bytes=32 * 1024 * 1024),
    )(*inputs)

    # Strip lane padding + conv halo wrapper-side (kernel output is lane-dense).
    out = out_pad[:, :, :L].reshape(N, Cout, Hp, Wp)[:, :, 1:H + 1, 1:W + 1]
    return out


# ---------------------------------------------------------------------------
# Parameters (deterministic; BN folded into per-channel scale/bias)
# ---------------------------------------------------------------------------
def fold_bn(conv_bias, gamma, beta, mean, var, eps=1e-5):
    scale = gamma / jnp.sqrt(var + eps)
    bias = (conv_bias - mean) * scale + beta
    return scale, bias


def make_params(key, cin, cout):
    cr = max(cout // 16, 1)
    ks = jax.random.split(key, 22)
    r = lambda k, shp, s=0.1: jax.random.normal(k, shp, jnp.float32) * s

    w1_hwio = r(ks[0], (3, 3, cin, cout))
    s1, b1 = fold_bn(r(ks[1], (cout,)), 1.0 + r(ks[2], (cout,)), r(ks[3], (cout,)),
                     r(ks[4], (cout,)), 1.0 + jnp.abs(r(ks[5], (cout,))))
    w2_hwio = r(ks[6], (3, 3, cout, cout))
    s2, b2 = fold_bn(r(ks[7], (cout,)), 1.0 + r(ks[8], (cout,)), r(ks[9], (cout,)),
                     r(ks[10], (cout,)), 1.0 + jnp.abs(r(ks[11], (cout,))))
    ws_hwio = r(ks[12], (1, 1, cin, cout))
    ss, bs = fold_bn(r(ks[13], (cout,)), 1.0 + r(ks[14], (cout,)), r(ks[15], (cout,)),
                     r(ks[16], (cout,)), 1.0 + jnp.abs(r(ks[17], (cout,))))

    se_w1 = r(ks[18], (cout, cr))        # squeeze FC weights   (Cout, Cr)
    se_b1 = r(ks[19], (1, cr))
    se_w2t = r(ks[20], (cout, cr))       # excite FC weights, stored transposed
    se_b2 = r(ks[21], (cout,))

    # conv1 LHS with the 1x1 skip fused in (skip weights live in the center-tap
    # columns, so one GEMM over the same im2col RHS yields both accumulators).
    w1mat = w1_hwio.reshape(9 * cin, cout).T                     # (Cout, 9*Cin)
    if cin != cout:
        ws_embed = jnp.zeros((cout, 9 * cin), jnp.float32)
        ws_embed = ws_embed.at[:, 4 * cin:5 * cin].set(ws_hwio[0, 0].T)
        w1s = jnp.concatenate([w1mat, ws_embed], axis=0)         # (2*Cout, 9*Cin)
    else:
        w1s = w1mat                                              # no skip branch

    cvec = jnp.stack([s1, b1, s2, b2, ss, bs, se_b2, jnp.zeros_like(s1)], axis=1)

    return dict(
        # MXU-facing weights (bf16 operands; f32 accumulation inside the kernel)
        w1s=w1s.astype(jnp.bfloat16),
        w2mat=w2_hwio.reshape(9 * cout, cout).T.astype(jnp.bfloat16),
        cvec=cvec,
        sew=jnp.concatenate([se_w1, se_w2t], axis=1),
        seb1=se_b1,
        # f32 originals for the pure-JAX reference
        w1_hwio=w1_hwio, w2_hwio=w2_hwio, ws_hwio=ws_hwio,
        bn1_s=s1, bn1_b=b1, bn2_s=s2, bn2_b=b2, bns_s=ss, bns_b=bs,
        se_w1=se_w1, se_w2t=se_w2t, se_b2=se_b2,
    )


# ---------------------------------------------------------------------------
# Pure-JAX reference (lax.conv, f32) for correctness checking
# ---------------------------------------------------------------------------
def reference_forward(x, P):
    dn = ('NCHW', 'HWIO', 'NCHW')
    conv = lambda a, w: jax.lax.conv_general_dilated(a, w, (1, 1), 'SAME',
                                                     dimension_numbers=dn)
    bn = lambda y, s, b: y * s[None, :, None, None] + b[None, :, None, None]
    y1 = jnp.maximum(bn(conv(x, P['w1_hwio']), P['bn1_s'], P['bn1_b']), 0.0)
    y2 = bn(conv(y1, P['w2_hwio']), P['bn2_s'], P['bn2_b'])
    if x.shape[1] != y2.shape[1]:
        ident = bn(conv(x, P['ws_hwio']), P['bns_s'], P['bns_b'])
    else:
        ident = x
    pooled = jnp.mean(y2, axis=(2, 3))                                   # (N, C)
    h = jnp.maximum(pooled @ P['se_w1'] + P['seb1'], 0.0)                # (N, Cr)
    s = jax.nn.sigmoid(h @ P['se_w2t'].T + P['se_b2'][None, :])          # (N, C)
    return jnp.maximum(y2 * s[:, :, None, None] + ident, 0.0)


if __name__ == "__main__":
    key = jax.random.PRNGKey(0)
    # Cout >= 16 because the SE block uses Cout // 16 reduced channels.
    # N=4 exercises the B=2-images-per-grid-step path with a 2-step parallel grid.
    N, Cin, Cout, H, W = 4, 16, 32, 16, 16
    kx, kp = jax.random.split(key)

    x = jax.random.normal(kx, (N, Cin, H, W), jnp.float32)   # NCHW, like PyTorch
    params = make_params(kp, Cin, Cout)

    fwd = jax.jit(custom_block_forward)
    out = jax.block_until_ready(fwd(x, params))

    ref = jax.block_until_ready(reference_forward(x, params))
    assert out.shape == (N, Cout, H, W)
    # bf16 MXU operands (f32 accumulation / f32 reference) -> slightly looser bound.
    err = float(jnp.max(jnp.abs(out - ref)))
    assert err < 5e-2, f"max abs diff {err}"

    print("KERNEL_OK")
</pallas_src>

<mosaic_0001>
module attributes {stable_mosaic.version = 11 : i64} {
  func.func @_fused_block_kernel(%arg0: i32, %arg1: memref<2x16x640xbf16, #tpu.memory_space<vmem>>, %arg2: memref<1x384xf32, #tpu.memory_space<vmem>>, %arg3: memref<64x144xbf16, #tpu.memory_space<vmem>>, %arg4: memref<32x288xbf16, #tpu.memory_space<vmem>>, %arg5: memref<32x8xf32, #tpu.memory_space<vmem>>, %arg6: memref<32x4xf32, #tpu.memory_space<vmem>>, %arg7: memref<1x2xf32, #tpu.memory_space<vmem>>, %arg8: memref<2x32x384xf32, #tpu.memory_space<vmem>>, %arg9: memref<32x640xbf16, #tpu.memory_space<vmem>>, %arg10: memref<144x384xbf16, #tpu.memory_space<vmem>>, %arg11: memref<288x384xbf16, #tpu.memory_space<vmem>>) attributes {dimension_semantics = [#tpu.dimension_semantics<parallel>], iteration_bounds = array<i64: 2>, scalar_prefetch = 0 : i64, scratch_operands = 3 : i64, tpu.core_type = #tpu.core_type<tc>, window_params = [{transform_indices = @transform_0, window_bounds = array<i64: 2, 16, 640>}, {pipeline_mode = #tpu.pipeline_mode<synchronous>, transform_indices = @transform_1, window_bounds = array<i64: 1, 384>}, {pipeline_mode = #tpu.pipeline_mode<synchronous>, transform_indices = @transform_2, window_bounds = array<i64: 64, 144>}, {pipeline_mode = #tpu.pipeline_mode<synchronous>, transform_indices = @transform_3, window_bounds = array<i64: 32, 288>}, {pipeline_mode = #tpu.pipeline_mode<synchronous>, transform_indices = @transform_4, window_bounds = array<i64: 32, 8>}, {pipeline_mode = #tpu.pipeline_mode<synchronous>, transform_indices = @transform_5, window_bounds = array<i64: 32, 4>}, {pipeline_mode = #tpu.pipeline_mode<synchronous>, transform_indices = @transform_6, window_bounds = array<i64: 1, 2>}, {transform_indices = @transform_7, window_bounds = array<i64: 2, 32, 384>}]} {
    %c0 = arith.constant 0 : index
    %c0_0 = arith.constant 0 : index
    %0 = vector.load %arg5[%c0, %c0_0] : memref<32x8xf32, #tpu.memory_space<vmem>>, vector<32x8xf32>
    %1 = vector.extract_strided_slice %0 {offsets = [0, 0], sizes = [32, 1], strides = [1, 1]} : vector<32x8xf32> to vector<32x1xf32>
    %2 = vector.extract_strided_slice %0 {offsets = [0, 1], sizes = [32, 1], strides = [1, 1]} : vector<32x8xf32> to vector<32x1xf32>
    %3 = vector.extract_strided_slice %0 {offsets = [0, 2], sizes = [32, 1], strides = [1, 1]} : vector<32x8xf32> to vector<32x1xf32>
    %4 = vector.extract_strided_slice %0 {offsets = [0, 3], sizes = [32, 1], strides = [1, 1]} : vector<32x8xf32> to vector<32x1xf32>
    %5 = vector.extract_strided_slice %0 {offsets = [0, 4], sizes = [32, 1], strides = [1, 1]} : vector<32x8xf32> to vector<32x1xf32>
    %6 = vector.extract_strided_slice %0 {offsets = [0, 5], sizes = [32, 1], strides = [1, 1]} : vector<32x8xf32> to vector<32x1xf32>
    %7 = vector.extract_strided_slice %0 {offsets = [0, 6], sizes = [32, 1], strides = [1, 1]} : vector<32x8xf32> to vector<32x1xf32>
    %c0_1 = arith.constant 0 : index
    %c0_2 = arith.constant 0 : index
    %8 = vector.load %arg2[%c0_1, %c0_2] : memref<1x384xf32, #tpu.memory_space<vmem>>, vector<1x384xf32>
    %c0_3 = arith.constant 0 : index
    %c0_4 = arith.constant 0 : index
    %9 = vector.load %arg6[%c0_3, %c0_4] : memref<32x4xf32, #tpu.memory_space<vmem>>, vector<32x4xf32>
    %10 = vector.extract_strided_slice %9 {offsets = [0, 0], sizes = [32, 2], strides = [1, 1]} : vector<32x4xf32> to vector<32x2xf32>
    %11 = vector.extract_strided_slice %9 {offsets = [0, 2], sizes = [32, 2], strides = [1, 1]} : vector<32x4xf32> to vector<32x2xf32>
    %c0_5 = arith.constant 0 : index
    %c0_6 = arith.constant 0 : index
    %12 = vector.load %arg7[%c0_5, %c0_6] : memref<1x2xf32, #tpu.memory_space<vmem>>, vector<1x2xf32>
    %cst = arith.constant 0.000000e+00 : bf16
    %13 = vector.broadcast %cst : bf16 to vector<32x128xbf16>
    %c0_7 = arith.constant 0 : index
    %c0_8 = arith.constant 0 : index
    %14 = vector.load %arg9[%c0_7, %c0_8] : memref<32x640xbf16, #tpu.memory_space<vmem>>, vector<32x128xbf16>
    tpu.vector_store %arg9[%c0_7, %c0_8], %13 {strides = array<i32>} : memref<32x640xbf16, #tpu.memory_space<vmem>>, vector<32x128xbf16>,
    %cst_9 = arith.constant 0.000000e+00 : bf16
    %15 = vector.broadcast %cst_9 : bf16 to vector<32x128xbf16>
    %c0_10 = arith.constant 0 : index
    %c512 = arith.constant 512 : index
    %16 = vector.load %arg9[%c0_10, %c512] : memref<32x640xbf16, #tpu.memory_space<vmem>>, vector<32x128xbf16>
    tpu.vector_store %arg9[%c0_10, %c512], %15 {strides = array<i32>} : memref<32x640xbf16, #tpu.memory_space<vmem>>, vector<32x128xbf16>,
    %c0_11 = arith.constant 0 : index
    %c0_12 = arith.constant 0 : index
    %c109 = arith.constant 109 : index
    %17 = vector.load %arg1[%c0_11, %c0_12, %c109] : memref<2x16x640xbf16, #tpu.memory_space<vmem>>, vector<1x16x384xbf16>
    %18 = vector.shape_cast %17 : vector<1x16x384xbf16> to vector<16x384xbf16>
    %c0_13 = arith.constant 0 : index
    %c0_14 = arith.constant 0 : index
    %19 = vector.load %arg10[%c0_13, %c0_14] : memref<144x384xbf16, #tpu.memory_space<vmem>>, vector<16x384xbf16>
    tpu.vector_store %arg10[%c0_13, %c0_14], %18 {strides = array<i32>} : memref<144x384xbf16, #tpu.memory_space<vmem>>, vector<16x384xbf16>,
    %c0_15 = arith.constant 0 : index
    %c0_16 = arith.constant 0 : index
    %c110 = arith.constant 110 : index
    %20 = vector.load %arg1[%c0_15, %c0_16, %c110] : memref<2x16x640xbf16, #tpu.memory_space<vmem>>, vector<1x16x384xbf16>
    %21 = vector.shape_cast %20 : vector<1x16x384xbf16> to vector<16x384xbf16>
    %c16 = arith.constant 16 : index
    %c0_17 = arith.constant 0 : index
    %22 = vector.load %arg10[%c16, %c0_17] : memref<144x384xbf16, #tpu.memory_space<vmem>>, vector<16x384xbf16>
    tpu.vector_store %arg10[%c16, %c0_17], %21 {strides = array<i32>} : memref<144x384xbf16, #tpu.memory_space<vmem>>, vector<16x384xbf16>,
    %c0_18 = arith.constant 0 : index
    %c0_19 = arith.constant 0 : index
    %c111 = arith.constant 111 : index
    %23 = vector.load %arg1[%c0_18, %c0_19, %c111] : memref<2x16x640xbf16, #tpu.memory_space<vmem>>, vector<1x16x384xbf16>
    %24 = vector.shape_cast %23 : vector<1x16x384xbf16> to vector<16x384xbf16>
    %c32 = arith.constant 32 : index
    %c0_20 = arith.constant 0 : index
    %25 = vector.load %arg10[%c32, %c0_20] : memref<144x384xbf16, #tpu.memory_space<vmem>>, vector<16x384xbf16>
    tpu.vector_store %arg10[%c32, %c0_20], %24 {strides = array<i32>} : memref<144x384xbf16, #tpu.memory_space<vmem>>, vector<16x384xbf16>,
    %c0_21 = arith.constant 0 : index
    %c0_22 = arith.constant 0 : index
    %c127 = arith.constant 127 : index
    %26 = vector.load %arg1[%c0_21, %c0_22, %c127] : memref<2x16x640xbf16, #tpu.memory_space<vmem>>, vector<1x16x384xbf16>
    %27 = vector.shape_cast %26 : vector<1x16x384xbf16> to vector<16x384xbf16>
    %c48 = arith.constant 48 : index
    %c0_23 = arith.constant 0 : index
    %28 = vector.load %arg10[%c48, %c0_23] : memref<144x384xbf16, #tpu.memory_space<vmem>>, vector<16x384xbf16>
    tpu.vector_store %arg10[%c48, %c0_23], %27 {strides = array<i32>} : memref<144x384xbf16, #tpu.memory_space<vmem>>, vector<16x384xbf16>,
    %c0_24 = arith.constant 0 : index
    %c0_25 = arith.constant 0 : index
    %c128 = arith.constant 128 : index
    %29 = vector.load %arg1[%c0_24, %c0_25, %c128] : memref<2x16x640xbf16, #tpu.memory_space<vmem>>, vector<1x16x384xbf16>
    %30 = vector.shape_cast %29 : vector<1x16x384xbf16> to vector<16x384xbf16>
    %c64 = arith.constant 64 : index
    %c0_26 = arith.constant 0 : index
    %31 = vector.load %arg10[%c64, %c0_26] : memref<144x384xbf16, #tpu.memory_space<vmem>>, vector<16x384xbf16>
    tpu.vector_store %arg10[%c64, %c0_26], %30 {strides = array<i32>} : memref<144x384xbf16, #tpu.memory_space<vmem>>, vector<16x384xbf16>,
    %c0_27 = arith.constant 0 : index
    %c0_28 = arith.constant 0 : index
    %c129 = arith.constant 129 : index
    %32 = vector.load %arg1[%c0_27, %c0_28, %c129] : memref<2x16x640xbf16, #tpu.memory_space<vmem>>, vector<1x16x384xbf16>
    %33 = vector.shape_cast %32 : vector<1x16x384xbf16> to vector<16x384xbf16>
    %c80 = arith.constant 80 : index
    %c0_29 = arith.constant 0 : index
    %34 = vector.load %arg10[%c80, %c0_29] : memref<144x384xbf16, #tpu.memory_space<vmem>>, vector<16x384xbf16>
    tpu.vector_store %arg10[%c80, %c0_29], %33 {strides = array<i32>} : memref<144x384xbf16, #tpu.memory_space<vmem>>, vector<16x384xbf16>,
    %c0_30 = arith.constant 0 : index
    %c0_31 = arith.constant 0 : index
    %c145 = arith.constant 145 : index
    %35 = vector.load %arg1[%c0_30, %c0_31, %c145] : memref<2x16x640xbf16, #tpu.memory_space<vmem>>, vector<1x16x384xbf16>
    %36 = vector.shape_cast %35 : vector<1x16x384xbf16> to vector<16x384xbf16>
    %c96 = arith.constant 96 : index
    %c0_32 = arith.constant 0 : index
    %37 = vector.load %arg10[%c96, %c0_32] : memref<144x384xbf16, #tpu.memory_space<vmem>>, vector<16x384xbf16>
    tpu.vector_store %arg10[%c96, %c0_32], %36 {strides = array<i32>} : memref<144x384xbf16, #tpu.memory_space<vmem>>, vector<16x384xbf16>,
    %c0_33 = arith.constant 0 : index
    %c0_34 = arith.constant 0 : index
    %c146 = arith.constant 146 : index
    %38 = vector.load %arg1[%c0_33, %c0_34, %c146] : memref<2x16x640xbf16, #tpu.memory_space<vmem>>, vector<1x16x384xbf16>
    %39 = vector.shape_cast %38 : vector<1x16x384xbf16> to vector<16x384xbf16>
    %c112 = arith.constant 112 : index
    %c0_35 = arith.constant 0 : index
    %40 = vector.load %arg10[%c112, %c0_35] : memref<144x384xbf16, #tpu.memory_space<vmem>>, vector<16x384xbf16>
    tpu.vector_store %arg10[%c112, %c0_35], %39 {strides = array<i32>} : memref<144x384xbf16, #tpu.memory_space<vmem>>, vector<16x384xbf16>,
    %c0_36 = arith.constant 0 : index
    %c0_37 = arith.constant 0 : index
    %c147 = arith.constant 147 : index
    %41 = vector.load %arg1[%c0_36, %c0_37, %c147] : memref<2x16x640xbf16, #tpu.memory_space<vmem>>, vector<1x16x384xbf16>
    %42 = vector.shape_cast %41 : vector<1x16x384xbf16> to vector<16x384xbf16>
    %c128_38 = arith.constant 128 : index
    %c0_39 = arith.constant 0 : index
    %43 = vector.load %arg10[%c128_38, %c0_39] : memref<144x384xbf16, #tpu.memory_space<vmem>>, vector<16x384xbf16>
    tpu.vector_store %arg10[%c128_38, %c0_39], %42 {strides = array<i32>} : memref<144x384xbf16, #tpu.memory_space<vmem>>, vector<16x384xbf16>,
    %c0_40 = arith.constant 0 : index
    %c0_41 = arith.constant 0 : index
    %44 = vector.load %arg3[%c0_40, %c0_41] : memref<64x144xbf16, #tpu.memory_space<vmem>>, vector<64x144xbf16>
    %c0_42 = arith.constant 0 : index
    %c0_43 = arith.constant 0 : index
    %45 = vector.load %arg10[%c0_42, %c0_43] : memref<144x384xbf16, #tpu.memory_space<vmem>>, vector<144x384xbf16>
    %cst_44 = arith.constant dense<0.000000e+00> : vector<64x384xf32>
    %46 = tpu.matmul %44, %45, %cst_44 {dimension_numbers = #tpu.dot_dimension_numbers<[1], [0], [0], [1], [0, 0, 1, 1], [], []>} : vector<64x144xbf16>, vector<144x384xbf16>, vector<64x384xf32> -> vector<64x384xf32>
    %47 = vector.extract_strided_slice %46 {offsets = [0, 0], sizes = [32, 384], strides = [1, 1]} : vector<64x384xf32> to vector<32x384xf32>
    %48 = vector.broadcast %1 : vector<32x1xf32> to vector<32x384xf32>
    %49 = arith.mulf %47, %48 : vector<32x384xf32>
    %50 = vector.broadcast %2 : vector<32x1xf32> to vector<32x384xf32>
    %51 = arith.addf %49, %50 : vector<32x384xf32>
    %cst_45 = arith.constant 0.000000e+00 : f32
    %52 = vector.broadcast %cst_45 : f32 to vector<32x384xf32>
    %53 = arith.maximumf %51, %52 : vector<32x384xf32>
    %54 = vector.broadcast %8 : vector<1x384xf32> to vector<32x384xf32>
    %55 = arith.mulf %53, %54 : vector<32x384xf32>
    %56 = arith.truncf %55 : vector<32x384xf32> to vector<32x384xbf16>
    %c0_46 = arith.constant 0 : index
    %c128_47 = arith.constant 128 : index
    %57 = vector.load %arg9[%c0_46, %c128_47] : memref<32x640xbf16, #tpu.memory_space<vmem>>, vector<32x384xbf16>
    tpu.vector_store %arg9[%c0_46, %c128_47], %56 {strides = array<i32>} : memref<32x640xbf16, #tpu.memory_space<vmem>>, vector<32x384xbf16>,
    %c0_48 = arith.constant 0 : index
    %c109_49 = arith.constant 109 : index
    %58 = vector.load %arg9[%c0_48, %c109_49] : memref<32x640xbf16, #tpu.memory_space<vmem>>, vector<32x384xbf16>
    %c0_50 = arith.constant 0 : index
    %c0_51 = arith.constant 0 : index
    %59 = vector.load %arg11[%c0_50, %c0_51] : memref<288x384xbf16, #tpu.memory_space<vmem>>, vector<32x384xbf16>
    tpu.vector_store %arg11[%c0_50, %c0_51], %58 {strides = array<i32>} : memref<288x384xbf16, #tpu.memory_space<vmem>>, vector<32x384xbf16>,
    %c0_52 = arith.constant 0 : index
    %c110_53 = arith.constant 110 : index
    %60 = vector.load %arg9[%c0_52, %c110_53] : memref<32x640xbf16, #tpu.memory_space<vmem>>, vector<32x384xbf16>
    %c32_54 = arith.constant 32 : index
    %c0_55 = arith.constant 0 : index
    %61 = vector.load %arg11[%c32_54, %c0_55] : memref<288x384xbf16, #tpu.memory_space<vmem>>, vector<32x384xbf16>
    tpu.vector_store %arg11[%c32_54, %c0_55], %60 {strides = array<i32>} : memref<288x384xbf16, #tpu.memory_space<vmem>>, vector<32x384xbf16>,
    %c0_56 = arith.constant 0 : index
    %c111_57 = arith.constant 111 : index
    %62 = vector.load %arg9[%c0_56, %c111_57] : memref<32x640xbf16, #tpu.memory_space<vmem>>, vector<32x384xbf16>
    %c64_58 = arith.constant 64 : index
    %c0_59 = arith.constant 0 : index
    %63 = vector.load %arg11[%c64_58, %c0_59] : memref<288x384xbf16, #tpu.memory_space<vmem>>, vector<32x384xbf16>
    tpu.vector_store %arg11[%c64_58, %c0_59], %62 {strides = array<i32>} : memref<288x384xbf16, #tpu.memory_space<vmem>>, vector<32x384xbf16>,
    %c0_60 = arith.constant 0 : index
    %c127_61 = arith.constant 127 : index
    %64 = vector.load %arg9[%c0_60, %c127_61] : memref<32x640xbf16, #tpu.memory_space<vmem>>, vector<32x384xbf16>
    %c96_62 = arith.constant 96 : index
    %c0_63 = arith.constant 0 : index
    %65 = vector.load %arg11[%c96_62, %c0_63] : memref<288x384xbf16, #tpu.memory_space<vmem>>, vector<32x384xbf16>
    tpu.vector_store %arg11[%c96_62, %c0_63], %64 {strides = array<i32>} : memref<288x384xbf16, #tpu.memory_space<vmem>>, vector<32x384xbf16>,
    %c0_64 = arith.constant 0 : index
    %c128_65 = arith.constant 128 : index
    %66 = vector.load %arg9[%c0_64, %c128_65] : memref<32x640xbf16, #tpu.memory_space<vmem>>, vector<32x384xbf16>
    %c128_66 = arith.constant 128 : index
    %c0_67 = arith.constant 0 : index
    %67 = vector.load %arg11[%c128_66, %c0_67] : memref<288x384xbf16, #tpu.memory_space<vmem>>, vector<32x384xbf16>
    tpu.vector_store %arg11[%c128_66, %c0_67], %66 {strides = array<i32>} : memref<288x384xbf16, #tpu.memory_space<vmem>>, vector<32x384xbf16>,
    %c0_68 = arith.constant 0 : index
    %c129_69 = arith.constant 129 : index
    %68 = vector.load %arg9[%c0_68, %c129_69] : memref<32x640xbf16, #tpu.memory_space<vmem>>, vector<32x384xbf16>
    %c160 = arith.constant 160 : index
    %c0_70 = arith.constant 0 : index
    %69 = vector.load %arg11[%c160, %c0_70] : memref<288x384xbf16, #tpu.memory_space<vmem>>, vector<32x384xbf16>
    tpu.vector_store %arg11[%c160, %c0_70], %68 {strides = array<i32>} : memref<288x384xbf16, #tpu.memory_space<vmem>>, vector<32x384xbf16>,
    %c0_71 = arith.constant 0 : index
    %c145_72 = arith.constant 145 : index
    %70 = vector.load %arg9[%c0_71, %c145_72] : memref<32x640xbf16, #tpu.memory_space<vmem>>, vector<32x384xbf16>
    %c192 = arith.constant 192 : index
    %c0_73 = arith.constant 0 : index
    %71 = vector.load %arg11[%c192, %c0_73] : memref<288x384xbf16, #tpu.memory_space<vmem>>, vector<32x384xbf16>
    tpu.vector_store %arg11[%c192, %c0_73], %70 {strides = array<i32>} : memref<288x384xbf16, #tpu.memory_space<vmem>>, vector<32x384xbf16>,
    %c0_74 = arith.constant 0 : index
    %c146_75 = arith.constant 146 : index
    %72 = vector.load %arg9[%c0_74, %c146_75] : memref<32x640xbf16, #tpu.memory_space<vmem>>, vector<32x384xbf16>
    %c224 = arith.constant 224 : index
    %c0_76 = arith.constant 0 : index
    %73 = vector.load %arg11[%c224, %c0_76] : memref<288x384xbf16, #tpu.memory_space<vmem>>, vector<32x384xbf16>
    tpu.vector_store %arg11[%c224, %c0_76], %72 {strides = array<i32>} : memref<288x384xbf16, #tpu.memory_space<vmem>>, vector<32x384xbf16>,
    %c0_77 = arith.constant 0 : index
    %c147_78 = arith.constant 147 : index
    %74 = vector.load %arg9[%c0_77, %c147_78] : memref<32x640xbf16, #tpu.memory_space<vmem>>, vector<32x384xbf16>
    %c256 = arith.constant 256 : index
    %c0_79 = arith.constant 0 : index
    %75 = vector.load %arg11[%c256, %c0_79] : memref<288x384xbf16, #tpu.memory_space<vmem>>, vector<32x384xbf16>
    tpu.vector_store %arg11[%c256, %c0_79], %74 {strides = array<i32>} : memref<288x384xbf16, #tpu.memory_space<vmem>>, vector<32x384xbf16>,
    %c0_80 = arith.constant 0 : index
    %c0_81 = arith.constant 0 : index
    %76 = vector.load %arg4[%c0_80, %c0_81] : memref<32x288xbf16, #tpu.memory_space<vmem>>, vector<32x288xbf16>
    %c0_82 = arith.constant 0 : index
    %c0_83 = arith.constant 0 : index
    %77 = vector.load %arg11[%c0_82, %c0_83] : memref<288x384xbf16, #tpu.memory_space<vmem>>, vector<288x384xbf16>
    %cst_84 = arith.constant dense<0.000000e+00> : vector<32x384xf32>
    %78 = tpu.matmul %76, %77, %cst_84 {dimension_numbers = #tpu.dot_dimension_numbers<[1], [0], [0], [1], [0, 0, 1, 1], [], []>} : vector<32x288xbf16>, vector<288x384xbf16>, vector<32x384xf32> -> vector<32x384xf32>
    %79 = vector.broadcast %3 : vector<32x1xf32> to vector<32x384xf32>
    %80 = arith.mulf %78, %79 : vector<32x384xf32>
    %81 = vector.broadcast %4 : vector<32x1xf32> to vector<32x384xf32>
    %82 = arith.addf %80, %81 : vector<32x384xf32>
    %83 = vector.broadcast %8 : vector<1x384xf32> to vector<32x384xf32>
    %84 = arith.mulf %82, %83 : vector<32x384xf32>
    %85 = vector.extract_strided_slice %46 {offsets = [32, 0], sizes = [32, 384], strides = [1, 1]} : vector<64x384xf32> to vector<32x384xf32>
    %86 = vector.broadcast %5 : vector<32x1xf32> to vector<32x384xf32>
    %87 = arith.mulf %85, %86 : vector<32x384xf32>
    %88 = vector.broadcast %6 : vector<32x1xf32> to vector<32x384xf32>
    %89 = arith.addf %87, %88 : vector<32x384xf32>
    %cst_85 = arith.constant dense<0.000000e+00> : vector<32xf32>
    %90 = vector.multi_reduction <add>, %84, %cst_85 [1] : vector<32x384xf32> to vector<32xf32>
    %91 = vector.shape_cast %90 : vector<32xf32> to vector<32x1xf32>
    %cst_86 = arith.constant 3.906250e-03 : f32
    %92 = vector.broadcast %cst_86 : f32 to vector<32x1xf32>
    %93 = arith.mulf %91, %92 : vector<32x1xf32>
    %94 = vector.broadcast %93 : vector<32x1xf32> to vector<32x2xf32>
    %95 = arith.mulf %94, %10 : vector<32x2xf32>
    %cst_87 = arith.constant dense<0.000000e+00> : vector<2xf32>
    %96 = vector.multi_reduction <add>, %95, %cst_87 [0] : vector<32x2xf32> to vector<2xf32>
    %97 = vector.shape_cast %96 : vector<2xf32> to vector<1x2xf32>
    %98 = arith.addf %97, %12 : vector<1x2xf32>
    %cst_88 = arith.constant 0.000000e+00 : f32
    %99 = vector.broadcast %cst_88 : f32 to vector<1x2xf32>
    %100 = arith.maximumf %98, %99 : vector<1x2xf32>
    %101 = vector.broadcast %100 : vector<1x2xf32> to vector<32x2xf32>
    %102 = arith.mulf %11, %101 : vector<32x2xf32>
    %cst_89 = arith.constant dense<0.000000e+00> : vector<32xf32>
    %103 = vector.multi_reduction <add>, %102, %cst_89 [1] : vector<32x2xf32> to vector<32xf32>
    %104 = vector.shape_cast %103 : vector<32xf32> to vector<32x1xf32>
    %105 = arith.addf %104, %7 : vector<32x1xf32>
    %106 = arith.negf %105 : vector<32x1xf32>
    %107 = math.exp %106 : vector<32x1xf32>
    %cst_90 = arith.constant 1.000000e+00 : f32
    %108 = vector.broadcast %cst_90 : f32 to vector<32x1xf32>
    %109 = arith.addf %108, %107 : vector<32x1xf32>
    %110 = arith.divf %108, %109 : vector<32x1xf32>
    %111 = vector.broadcast %110 : vector<32x1xf32> to vector<32x384xf32>
    %112 = arith.mulf %84, %111 : vector<32x384xf32>
    %113 = arith.addf %112, %89 : vector<32x384xf32>
    %cst_91 = arith.constant 0.000000e+00 : f32
    %114 = vector.broadcast %cst_91 : f32 to vector<32x384xf32>
    %115 = arith.maximumf %113, %114 : vector<32x384xf32>
    %c0_92 = arith.constant 0 : index
    %c0_93 = arith.constant 0 : index
    %c0_94 = arith.constant 0 : index
    %116 = vector.load %arg8[%c0_92, %c0_93, %c0_94] : memref<2x32x384xf32, #tpu.memory_space<vmem>>, vector<1x32x384xf32>
    %117 = vector.shape_cast %116 : vector<1x32x384xf32> to vector<32x384xf32>
    %118 = vector.shape_cast %115 : vector<32x384xf32> to vector<1x32x384xf32>
    tpu.vector_store %arg8[%c0_92, %c0_93, %c0_94], %118 {strides = array<i32>} : memref<2x32x384xf32, #tpu.memory_space<vmem>>, vector<1x32x384xf32>,
    %c1 = arith.constant 1 : index
    %c0_95 = arith.constant 0 : index
    %c109_96 = arith.constant 109 : index
    %119 = vector.load %arg1[%c1, %c0_95, %c109_96] : memref<2x16x640xbf16, #tpu.memory_space<vmem>>, vector<1x16x384xbf16>
    %120 = vector.shape_cast %119 : vector<1x16x384xbf16> to vector<16x384xbf16>
    %c0_97 = arith.constant 0 : index
    %c0_98 = arith.constant 0 : index
    %121 = vector.load %arg10[%c0_97, %c0_98] : memref<144x384xbf16, #tpu.memory_space<vmem>>, vector<16x384xbf16>
    tpu.vector_store %arg10[%c0_97, %c0_98], %120 {strides = array<i32>} : memref<144x384xbf16, #tpu.memory_space<vmem>>, vector<16x384xbf16>,
    %c1_99 = arith.constant 1 : index
    %c0_100 = arith.constant 0 : index
    %c110_101 = arith.constant 110 : index
    %122 = vector.load %arg1[%c1_99, %c0_100, %c110_101] : memref<2x16x640xbf16, #tpu.memory_space<vmem>>, vector<1x16x384xbf16>
    %123 = vector.shape_cast %122 : vector<1x16x384xbf16> to vector<16x384xbf16>
    %c16_102 = arith.constant 16 : index
    %c0_103 = arith.constant 0 : index
    %124 = vector.load %arg10[%c16_102, %c0_103] : memref<144x384xbf16, #tpu.memory_space<vmem>>, vector<16x384xbf16>
    tpu.vector_store %arg10[%c16_102, %c0_103], %123 {strides = array<i32>} : memref<144x384xbf16, #tpu.memory_space<vmem>>, vector<16x384xbf16>,
    %c1_104 = arith.constant 1 : index
    %c0_105 = arith.constant 0 : index
    %c111_106 = arith.constant 111 : index
    %125 = vector.load %arg1[%c1_104, %c0_105, %c111_106] : memref<2x16x640xbf16, #tpu.memory_space<vmem>>, vector<1x16x384xbf16>
    %126 = vector.shape_cast %125 : vector<1x16x384xbf16> to vector<16x384xbf16>
    %c32_107 = arith.constant 32 : index
    %c0_108 = arith.constant 0 : index
    %127 = vector.load %arg10[%c32_107, %c0_108] : memref<144x384xbf16, #tpu.memory_space<vmem>>, vector<16x384xbf16>
    tpu.vector_store %arg10[%c32_107, %c0_108], %126 {strides = array<i32>} : memref<144x384xbf16, #tpu.memory_space<vmem>>, vector<16x384xbf16>,
    %c1_109 = arith.constant 1 : index
    %c0_110 = arith.constant 0 : index
    %c127_111 = arith.constant 127 : index
    %128 = vector.load %arg1[%c1_109, %c0_110, %c127_111] : memref<2x16x640xbf16, #tpu.memory_space<vmem>>, vector<1x16x384xbf16>
    %129 = vector.shape_cast %128 : vector<1x16x384xbf16> to vector<16x384xbf16>
    %c48_112 = arith.constant 48 : index
    %c0_113 = arith.constant 0 : index
    %130 = vector.load %arg10[%c48_112, %c0_113] : memref<144x384xbf16, #tpu.memory_space<vmem>>, vector<16x384xbf16>
    tpu.vector_store %arg10[%c48_112, %c0_113], %129 {strides = array<i32>} : memref<144x384xbf16, #tpu.memory_space<vmem>>, vector<16x384xbf16>,
    %c1_114 = arith.constant 1 : index
    %c0_115 = arith.constant 0 : index
    %c128_116 = arith.constant 128 : index
    %131 = vector.load %arg1[%c1_114, %c0_115, %c128_116] : memref<2x16x640xbf16, #tpu.memory_space<vmem>>, vector<1x16x384xbf16>
    %132 = vector.shape_cast %131 : vector<1x16x384xbf16> to vector<16x384xbf16>
    %c64_117 = arith.constant 64 : index
    %c0_118 = arith.constant 0 : index
    %133 = vector.load %arg10[%c64_117, %c0_118] : memref<144x384xbf16, #tpu.memory_space<vmem>>, vector<16x384xbf16>
    tpu.vector_store %arg10[%c64_117, %c0_118], %132 {strides = array<i32>} : memref<144x384xbf16, #tpu.memory_space<vmem>>, vector<16x384xbf16>,
    %c1_119 = arith.constant 1 : index
    %c0_120 = arith.constant 0 : index
    %c129_121 = arith.constant 129 : index
    %134 = vector.load %arg1[%c1_119, %c0_120, %c129_121] : memref<2x16x640xbf16, #tpu.memory_space<vmem>>, vector<1x16x384xbf16>
    %135 = vector.shape_cast %134 : vector<1x16x384xbf16> to vector<16x384xbf16>
    %c80_122 = arith.constant 80 : index
    %c0_123 = arith.constant 0 : index
    %136 = vector.load %arg10[%c80_122, %c0_123] : memref<144x384xbf16, #tpu.memory_space<vmem>>, vector<16x384xbf16>
    tpu.vector_store %arg10[%c80_122, %c0_123], %135 {strides = array<i32>} : memref<144x384xbf16, #tpu.memory_space<vmem>>, vector<16x384xbf16>,
    %c1_124 = arith.constant 1 : index
    %c0_125 = arith.constant 0 : index
    %c145_126 = arith.constant 145 : index
    %137 = vector.load %arg1[%c1_124, %c0_125, %c145_126] : memref<2x16x640xbf16, #tpu.memory_space<vmem>>, vector<1x16x384xbf16>
    %138 = vector.shape_cast %137 : vector<1x16x384xbf16> to vector<16x384xbf16>
    %c96_127 = arith.constant 96 : index
    %c0_128 = arith.constant 0 : index
    %139 = vector.load %arg10[%c96_127, %c0_128] : memref<144x384xbf16, #tpu.memory_space<vmem>>, vector<16x384xbf16>
    tpu.vector_store %arg10[%c96_127, %c0_128], %138 {strides = array<i32>} : memref<144x384xbf16, #tpu.memory_space<vmem>>, vector<16x384xbf16>,
    %c1_129 = arith.constant 1 : index
    %c0_130 = arith.constant 0 : index
    %c146_131 = arith.constant 146 : index
    %140 = vector.load %arg1[%c1_129, %c0_130, %c146_131] : memref<2x16x640xbf16, #tpu.memory_space<vmem>>, vector<1x16x384xbf16>
    %141 = vector.shape_cast %140 : vector<1x16x384xbf16> to vector<16x384xbf16>
    %c112_132 = arith.constant 112 : index
    %c0_133 = arith.constant 0 : index
    %142 = vector.load %arg10[%c112_132, %c0_133] : memref<144x384xbf16, #tpu.memory_space<vmem>>, vector<16x384xbf16>
    tpu.vector_store %arg10[%c112_132, %c0_133], %141 {strides = array<i32>} : memref<144x384xbf16, #tpu.memory_space<vmem>>, vector<16x384xbf16>,
    %c1_134 = arith.constant 1 : index
    %c0_135 = arith.constant 0 : index
    %c147_136 = arith.constant 147 : index
    %143 = vector.load %arg1[%c1_134, %c0_135, %c147_136] : memref<2x16x640xbf16, #tpu.memory_space<vmem>>, vector<1x16x384xbf16>
    %144 = vector.shape_cast %143 : vector<1x16x384xbf16> to vector<16x384xbf16>
    %c128_137 = arith.constant 128 : index
    %c0_138 = arith.constant 0 : index
    %145 = vector.load %arg10[%c128_137, %c0_138] : memref<144x384xbf16, #tpu.memory_space<vmem>>, vector<16x384xbf16>
    tpu.vector_store %arg10[%c128_137, %c0_138], %144 {strides = array<i32>} : memref<144x384xbf16, #tpu.memory_space<vmem>>, vector<16x384xbf16>,
    %c0_139 = arith.constant 0 : index
    %c0_140 = arith.constant 0 : index
    %146 = vector.load %arg3[%c0_139, %c0_140] : memref<64x144xbf16, #tpu.memory_space<vmem>>, vector<64x144xbf16>
    %c0_141 = arith.constant 0 : index
    %c0_142 = arith.constant 0 : index
    %147 = vector.load %arg10[%c0_141, %c0_142] : memref<144x384xbf16, #tpu.memory_space<vmem>>, vector<144x384xbf16>
    %cst_143 = arith.constant dense<0.000000e+00> : vector<64x384xf32>
    %148 = tpu.matmul %146, %147, %cst_143 {dimension_numbers = #tpu.dot_dimension_numbers<[1], [0], [0], [1], [0, 0, 1, 1], [], []>} : vector<64x144xbf16>, vector<144x384xbf16>, vector<64x384xf32> -> vector<64x384xf32>
    %149 = vector.extract_strided_slice %148 {offsets = [0, 0], sizes = [32, 384], strides = [1, 1]} : vector<64x384xf32> to vector<32x384xf32>
    %150 = vector.broadcast %1 : vector<32x1xf32> to vector<32x384xf32>
    %151 = arith.mulf %149, %150 : vector<32x384xf32>
    %152 = vector.broadcast %2 : vector<32x1xf32> to vector<32x384xf32>
    %153 = arith.addf %151, %152 : vector<32x384xf32>
    %cst_144 = arith.constant 0.000000e+00 : f32
    %154 = vector.broadcast %cst_144 : f32 to vector<32x384xf32>
    %155 = arith.maximumf %153, %154 : vector<32x384xf32>
    %156 = vector.broadcast %8 : vector<1x384xf32> to vector<32x384xf32>
    %157 = arith.mulf %155, %156 : vector<32x384xf32>
    %158 = arith.truncf %157 : vector<32x384xf32> to vector<32x384xbf16>
    %c0_145 = arith.constant 0 : index
    %c128_146 = arith.constant 128 : index
    %159 = vector.load %arg9[%c0_145, %c128_146] : memref<32x640xbf16, #tpu.memory_space<vmem>>, vector<32x384xbf16>
    tpu.vector_store %arg9[%c0_145, %c128_146], %158 {strides = array<i32>} : memref<32x640xbf16, #tpu.memory_space<vmem>>, vector<32x384xbf16>,
    %c0_147 = arith.constant 0 : index
    %c109_148 = arith.constant 109 : index
    %160 = vector.load %arg9[%c0_147, %c109_148] : memref<32x640xbf16, #tpu.memory_space<vmem>>, vector<32x384xbf16>
    %c0_149 = arith.constant 0 : index
    %c0_150 = arith.constant 0 : index
    %161 = vector.load %arg11[%c0_149, %c0_150] : memref<288x384xbf16, #tpu.memory_space<vmem>>, vector<32x384xbf16>
    tpu.vector_store %arg11[%c0_149, %c0_150], %160 {strides = array<i32>} : memref<288x384xbf16, #tpu.memory_space<vmem>>, vector<32x384xbf16>,
    %c0_151 = arith.constant 0 : index
    %c110_152 = arith.constant 110 : index
    %162 = vector.load %arg9[%c0_151, %c110_152] : memref<32x640xbf16, #tpu.memory_space<vmem>>, vector<32x384xbf16>
    %c32_153 = arith.constant 32 : index
    %c0_154 = arith.constant 0 : index
    %163 = vector.load %arg11[%c32_153, %c0_154] : memref<288x384xbf16, #tpu.memory_space<vmem>>, vector<32x384xbf16>
    tpu.vector_store %arg11[%c32_153, %c0_154], %162 {strides = array<i32>} : memref<288x384xbf16, #tpu.memory_space<vmem>>, vector<32x384xbf16>,
    %c0_155 = arith.constant 0 : index
    %c111_156 = arith.constant 111 : index
    %164 = vector.load %arg9[%c0_155, %c111_156] : memref<32x640xbf16, #tpu.memory_space<vmem>>, vector<32x384xbf16>
    %c64_157 = arith.constant 64 : index
    %c0_158 = arith.constant 0 : index
    %165 = vector.load %arg11[%c64_157, %c0_158] : memref<288x384xbf16, #tpu.memory_space<vmem>>, vector<32x384xbf16>
    tpu.vector_store %arg11[%c64_157, %c0_158], %164 {strides = array<i32>} : memref<288x384xbf16, #tpu.memory_space<vmem>>, vector<32x384xbf16>,
    %c0_159 = arith.constant 0 : index
    %c127_160 = arith.constant 127 : index
    %166 = vector.load %arg9[%c0_159, %c127_160] : memref<32x640xbf16, #tpu.memory_space<vmem>>, vector<32x384xbf16>
    %c96_161 = arith.constant 96 : index
    %c0_162 = arith.constant 0 : index
    %167 = vector.load %arg11[%c96_161, %c0_162] : memref<288x384xbf16, #tpu.memory_space<vmem>>, vector<32x384xbf16>
    tpu.vector_store %arg11[%c96_161, %c0_162], %166 {strides = array<i32>} : memref<288x384xbf16, #tpu.memory_space<vmem>>, vector<32x384xbf16>,
    %c0_163 = arith.constant 0 : index
    %c128_164 = arith.constant 128 : index
    %168 = vector.load %arg9[%c0_163, %c128_164] : memref<32x640xbf16, #tpu.memory_space<vmem>>, vector<32x384xbf16>
    %c128_165 = arith.constant 128 : index
    %c0_166 = arith.constant 0 : index
    %169 = vector.load %arg11[%c128_165, %c0_166] : memref<288x384xbf16, #tpu.memory_space<vmem>>, vector<32x384xbf16>
    tpu.vector_store %arg11[%c128_165, %c0_166], %168 {strides = array<i32>} : memref<288x384xbf16, #tpu.memory_space<vmem>>, vector<32x384xbf16>,
    %c0_167 = arith.constant 0 : index
    %c129_168 = arith.constant 129 : index
    %170 = vector.load %arg9[%c0_167, %c129_168] : memref<32x640xbf16, #tpu.memory_space<vmem>>, vector<32x384xbf16>
    %c160_169 = arith.constant 160 : index
    %c0_170 = arith.constant 0 : index
    %171 = vector.load %arg11[%c160_169, %c0_170] : memref<288x384xbf16, #tpu.memory_space<vmem>>, vector<32x384xbf16>
    tpu.vector_store %arg11[%c160_169, %c0_170], %170 {strides = array<i32>} : memref<288x384xbf16, #tpu.memory_space<vmem>>, vector<32x384xbf16>,
    %c0_171 = arith.constant 0 : index
    %c145_172 = arith.constant 145 : index
    %172 = vector.load %arg9[%c0_171, %c145_172] : memref<32x640xbf16, #tpu.memory_space<vmem>>, vector<32x384xbf16>
    %c192_173 = arith.constant 192 : index
    %c0_174 = arith.constant 0 : index
    %173 = vector.load %arg11[%c192_173, %c0_174] : memref<288x384xbf16, #tpu.memory_space<vmem>>, vector<32x384xbf16>
    tpu.vector_store %arg11[%c192_173, %c0_174], %172 {strides = array<i32>} : memref<288x384xbf16, #tpu.memory_space<vmem>>, vector<32x384xbf16>,
    %c0_175 = arith.constant 0 : index
    %c146_176 = arith.constant 146 : index
    %174 = vector.load %arg9[%c0_175, %c146_176] : memref<32x640xbf16, #tpu.memory_space<vmem>>, vector<32x384xbf16>
    %c224_177 = arith.constant 224 : index
    %c0_178 = arith.constant 0 : index
    %175 = vector.load %arg11[%c224_177, %c0_178] : memref<288x384xbf16, #tpu.memory_space<vmem>>, vector<32x384xbf16>
    tpu.vector_store %arg11[%c224_177, %c0_178], %174 {strides = array<i32>} : memref<288x384xbf16, #tpu.memory_space<vmem>>, vector<32x384xbf16>,
    %c0_179 = arith.constant 0 : index
    %c147_180 = arith.constant 147 : index
    %176 = vector.load %arg9[%c0_179, %c147_180] : memref<32x640xbf16, #tpu.memory_space<vmem>>, vector<32x384xbf16>
    %c256_181 = arith.constant 256 : index
    %c0_182 = arith.constant 0 : index
    %177 = vector.load %arg11[%c256_181, %c0_182] : memref<288x384xbf16, #tpu.memory_space<vmem>>, vector<32x384xbf16>
    tpu.vector_store %arg11[%c256_181, %c0_182], %176 {strides = array<i32>} : memref<288x384xbf16, #tpu.memory_space<vmem>>, vector<32x384xbf16>,
    %c0_183 = arith.constant 0 : index
    %c0_184 = arith.constant 0 : index
    %178 = vector.load %arg4[%c0_183, %c0_184] : memref<32x288xbf16, #tpu.memory_space<vmem>>, vector<32x288xbf16>
    %c0_185 = arith.constant 0 : index
    %c0_186 = arith.constant 0 : index
    %179 = vector.load %arg11[%c0_185, %c0_186] : memref<288x384xbf16, #tpu.memory_space<vmem>>, vector<288x384xbf16>
    %cst_187 = arith.constant dense<0.000000e+00> : vector<32x384xf32>
    %180 = tpu.matmul %178, %179, %cst_187 {dimension_numbers = #tpu.dot_dimension_numbers<[1], [0], [0], [1], [0, 0, 1, 1], [], []>} : vector<32x288xbf16>, vector<288x384xbf16>, vector<32x384xf32> -> vector<32x384xf32>
    %181 = vector.broadcast %3 : vector<32x1xf32> to vector<32x384xf32>
    %182 = arith.mulf %180, %181 : vector<32x384xf32>
    %183 = vector.broadcast %4 : vector<32x1xf32> to vector<32x384xf32>
    %184 = arith.addf %182, %183 : vector<32x384xf32>
    %185 = vector.broadcast %8 : vector<1x384xf32> to vector<32x384xf32>
    %186 = arith.mulf %184, %185 : vector<32x384xf32>
    %187 = vector.extract_strided_slice %148 {offsets = [32, 0], sizes = [32, 384], strides = [1, 1]} : vector<64x384xf32> to vector<32x384xf32>
    %188 = vector.broadcast %5 : vector<32x1xf32> to vector<32x384xf32>
    %189 = arith.mulf %187, %188 : vector<32x384xf32>
    %190 = vector.broadcast %6 : vector<32x1xf32> to vector<32x384xf32>
    %191 = arith.addf %189, %190 : vector<32x384xf32>
    %cst_188 = arith.constant dense<0.000000e+00> : vector<32xf32>
    %192 = vector.multi_reduction <add>, %186, %cst_188 [1] : vector<32x384xf32> to vector<32xf32>
    %193 = vector.shape_cast %192 : vector<32xf32> to vector<32x1xf32>
    %cst_189 = arith.constant 3.906250e-03 : f32
    %194 = vector.broadcast %cst_189 : f32 to vector<32x1xf32>
    %195 = arith.mulf %193, %194 : vector<32x1xf32>
    %196 = vector.broadcast %195 : vector<32x1xf32> to vector<32x2xf32>
    %197 = arith.mulf %196, %10 : vector<32x2xf32>
    %cst_190 = arith.constant dense<0.000000e+00> : vector<2xf32>
    %198 = vector.multi_reduction <add>, %197, %cst_190 [0] : vector<32x2xf32> to vector<2xf32>
    %199 = vector.shape_cast %198 : vector<2xf32> to vector<1x2xf32>
    %200 = arith.addf %199, %12 : vector<1x2xf32>
    %cst_191 = arith.constant 0.000000e+00 : f32
    %201 = vector.broadcast %cst_191 : f32 to vector<1x2xf32>
    %202 = arith.maximumf %200, %201 : vector<1x2xf32>
    %203 = vector.broadcast %202 : vector<1x2xf32> to vector<32x2xf32>
    %204 = arith.mulf %11, %203 : vector<32x2xf32>
    %cst_192 = arith.constant dense<0.000000e+00> : vector<32xf32>
    %205 = vector.multi_reduction <add>, %204, %cst_192 [1] : vector<32x2xf32> to vector<32xf32>
    %206 = vector.shape_cast %205 : vector<32xf32> to vector<32x1xf32>
    %207 = arith.addf %206, %7 : vector<32x1xf32>
    %208 = arith.negf %207 : vector<32x1xf32>
    %209 = math.exp %208 : vector<32x1xf32>
    %cst_193 = arith.constant 1.000000e+00 : f32
    %210 = vector.broadcast %cst_193 : f32 to vector<32x1xf32>
    %211 = arith.addf %210, %209 : vector<32x1xf32>
    %212 = arith.divf %210, %211 : vector<32x1xf32>
    %213 = vector.broadcast %212 : vector<32x1xf32> to vector<32x384xf32>
    %214 = arith.mulf %186, %213 : vector<32x384xf32>
    %215 = arith.addf %214, %191 : vector<32x384xf32>
    %cst_194 = arith.constant 0.000000e+00 : f32
    %216 = vector.broadcast %cst_194 : f32 to vector<32x384xf32>
    %217 = arith.maximumf %215, %216 : vector<32x384xf32>
    %c1_195 = arith.constant 1 : index
    %c0_196 = arith.constant 0 : index
    %c0_197 = arith.constant 0 : index
    %218 = vector.load %arg8[%c1_195, %c0_196, %c0_197] : memref<2x32x384xf32, #tpu.memory_space<vmem>>, vector<1x32x384xf32>
    %219 = vector.shape_cast %218 : vector<1x32x384xf32> to vector<32x384xf32>
    %220 = vector.shape_cast %217 : vector<32x384xf32> to vector<1x32x384xf32>
    tpu.vector_store %arg8[%c1_195, %c0_196, %c0_197], %220 {strides = array<i32>} : memref<2x32x384xf32, #tpu.memory_space<vmem>>, vector<1x32x384xf32>,
    return
  }
  func.func @transform_0(%arg0: i32) -> (i32, i32, i32) {
    %c0_i32 = arith.constant 0 : i32
    %c0_i32_0 = arith.constant 0 : i32
    %c0_i32_1 = arith.constant 0 : i32
    return %arg0, %c0_i32, %c0_i32_0 : i32, i32, i32
  }
  func.func @transform_1(%arg0: i32) -> (i32, i32) {
    %c0_i32 = arith.constant 0 : i32
    %c0_i32_0 = arith.constant 0 : i32
    %c0_i32_1 = arith.constant 0 : i32
    return %c0_i32, %c0_i32_0 : i32, i32
  }
  func.func @transform_2(%arg0: i32) -> (i32, i32) {
    %c0_i32 = arith.constant 0 : i32
    %c0_i32_0 = arith.constant 0 : i32
    %c0_i32_1 = arith.constant 0 : i32
    return %c0_i32, %c0_i32_0 : i32, i32
  }
  func.func @transform_3(%arg0: i32) -> (i32, i32) {
    %c0_i32 = arith.constant 0 : i32
    %c0_i32_0 = arith.constant 0 : i32
    %c0_i32_1 = arith.constant 0 : i32
    return %c0_i32, %c0_i32_0 : i32, i32
  }
  func.func @transform_4(%arg0: i32) -> (i32, i32) {
    %c0_i32 = arith.constant 0 : i32
    %c0_i32_0 = arith.constant 0 : i32
    %c0_i32_1 = arith.constant 0 : i32
    return %c0_i32, %c0_i32_0 : i32, i32
  }
  func.func @transform_5(%arg0: i32) -> (i32, i32) {
    %c0_i32 = arith.constant 0 : i32
    %c0_i32_0 = arith.constant 0 : i32
    %c0_i32_1 = arith.constant 0 : i32
    return %c0_i32, %c0_i32_0 : i32, i32
  }
  func.func @transform_6(%arg0: i32) -> (i32, i32) {
    %c0_i32 = arith.constant 0 : i32
    %c0_i32_0 = arith.constant 0 : i32
    %c0_i32_1 = arith.constant 0 : i32
    return %c0_i32, %c0_i32_0 : i32, i32
  }
  func.func @transform_7(%arg0: i32) -> (i32, i32, i32) {
    %c0_i32 = arith.constant 0 : i32
    %c0_i32_0 = arith.constant 0 : i32
    %c0_i32_1 = arith.constant 0 : i32
    return %arg0, %c0_i32, %c0_i32_0 : i32, i32, i32
  }
}

</mosaic_0001>

<bundles_post_ra>
// kernel: custom_block_forward.1
= control target key start
LH: loop header
LB: loop body
LE: loop exit
PB: predicated region body
PF: predicated region fallthrough
CT: control target
= control target key end

     0   :  { %s6040_s24 = smov 0   ;;  %s8093_s0 = inlined_call_operand.vmem [shape: bf16[4,16,640], index: 0, kind: input, shape index: {}]   ;;  %s8094_s1 = inlined_call_operand.vmem [shape: f32[1,384], index: 1, kind: input, shape index: {}]   ;;  %s8095_s2 = inlined_call_operand.vmem [shape: bf16[64,144], index: 2, kind: input, shape index: {}]   ;;  %s8096_s3 = inlined_call_operand.vmem [shape: bf16[32,288], index: 3, kind: input, shape index: {}]   ;;  %s8097_s4 = inlined_call_operand.vmem [shape: f32[32,8], index: 4, kind: input, shape index: {}]   ;;  %s8098_s5 = inlined_call_operand.vmem [shape: f32[32,4], index: 5, kind: input, shape index: {}]   ;;  %s8099_s6 = inlined_call_operand.vmem [shape: f32[1,2], index: 6, kind: input, shape index: {}]   ;;  %s8100_s7 = inlined_call_operand.vmem [shape: f32[4,32,384], index: 7, kind: output, shape index: {}]  }
   0x1 LB: > { %s4831_s25 = sadd.s32 4294967295, %s5981_s24   ;;  %p4835_p0 = scmp.ge.s32.totalorder %s5981_s24, 1  ;;  %s5981_s24 = sphi %s6040_s24, %s17_s24  }
   0x2   : > { %p239_p1 = scmp.lt.s32.totalorder %s5981_s24, 3 }
   0x4   : > { %p240_p2 = pnand %p4835_p0, %p239_p1 }
   0x6   : > { %243 = sbr.rel (%p240_p2) target bundleno = 2100 (0x834), region = 48 }
   0xb   : > { %s4836_s26 = sshll.u32 %s4831_s25, 1  ;;  %s5983_s8 = smov 109   ;;  %vm326_vm0 = vcmask 1043456   ;;  %vm546_vm1 = vcmask 900096   ;;  %vm511_vm2 = vcmask 908288   ;;  %vm581_vm3 = vcmask 891904  }
   0xc   : > { %p274_p3 = scmp.lt.s32.totalorder %s4836_s26, 3  ;;  %s5984_s9 = smov 110   ;;  %v5694_v39 = vld [vmem:[%s8095_s2 + $0x4] sm:$0xf]  ;;  %v4844_v40 = vld [vmem:[%s8095_s2 + $0x8] sm:$0xf0] }
   0xd   : > { %s5985_s10 = smov 111   ;;  %s5986_s11 = smov 127   ;;  %vm433_vm4 = vcmask 7168   ;;  %v6135_v58 = vor.u32 %v5694_v39, %v4844_v40  ;;  %vm819_vm5 = vcmask 130048   ;;  %vm476_vm6 = vcmask 1039360  }
   0xe   : > { %s8175_s26 = smov (!%p274_p3, %s4836_s26), 3  ;;  %s5987_s12 = smov 1   ;;  %vm398_vm7 = vcmask 138240   ;;  %vm328_vm8 = vcmask 154624   ;;  %vm363_vm9 = vcmask 146432   ;;  %vm2071_vm10 = vcmask 261120  }
   0xf   : > { %s5884_s27 = smul.u32 40, %s8175_s26  ;;  %s5988_s13 = smov 17   ;;  %vm2397_vm11 = vcmask 15360  }
  0x10   : > { %s5989_s14 = smov 18   ;;  %s5990_s15 = smov 19  }
  0x11   : > { %s6054_s30 = scalar_lea.vmem %s8093_s0, %s5884_s27  ;;  %s5998_s28 = smov 126  }
  0x12   : > { %v562_v0 = vld [vmem:[%s6054_s30 + $0x18] sm:$0xff]  ;;  %v560_v1 = vld [vmem:[%s6054_s30 + $0x4] sm:$0xff]  ;;  %v561_v3 = vld [vmem:[%s6054_s30 + $0xc] sm:$0xff]  ;;  %s5885_s29 = smul.u32 96, %s8175_s26 }
  0x13   : > { %572 = vrot.lane.b32.xlu1 %v562_v0, %s5983_s8  ;;  %568 = vrot.lane.b32.xlu0 %v560_v1, %s5983_s8  ;;  %451 = vst [vmem:[#allocation3 + $0x60] sm:$0xff] %v560_v1  ;;  %v563_v2 = vld [vmem:[%s6054_s30 + $0x20] sm:$0xff]  ;;  %v378_v5 = vld [vmem:[%s6054_s30 + $0x8] sm:$0xff] }
  0x14   : > { %533 = vrot.lane.b32.xlu2 %v560_v1, %s5984_s9  ;;  %453 = vst [vmem:[#allocation3 + $0x6c] sm:$0xff] %v562_v0  ;;  %v412_v4 = vld [vmem:[%s6054_s30] sm:$0xff]  ;;  %v414_v6 = vld [vmem:[%s6054_s30 + $0x14] sm:$0xff]  ;;  %v448_v42 = vld [vmem:[%s6054_s30 + $0xc] sm:$0xf]  ;;  %s8010_s18 = scalar_lea.vmem %s8100_s7, %s5885_s29 }
  0x15   : > { %v415_v7 = vld [vmem:[%s6054_s30 + $0x1c] sm:$0xff]  ;;  %452 = vst [vmem:[#allocation3 + $0x68] sm:$0xf] %v448_v42 }
  0x16   : > { %v450_v46 = vld [vmem:[%s6054_s30 + $0x20] sm:$0xf] }
  0x17   : > { %454 = vst [vmem:[#allocation3 + $0x74] sm:$0xf] %v450_v46 }
  0x1b   : > { %574 = vrot.lane.b32.xlu1 %v563_v2, %s5983_s8  ;;  %570 = vrot.lane.b32.xlu0 %v561_v3, %s5983_s8 }
  0x1c   : > { %535 = vrot.lane.b32.xlu2 %v561_v3, %s5984_s9 }
  0x23   : > { %539 = vrot.lane.b32.xlu1 %v563_v2, %s5984_s9  ;;  %537 = vrot.lane.b32.xlu0 %v562_v0, %s5984_s9 }
  0x24   : > { %498 = vrot.lane.b32.xlu2 %v560_v1, %s5985_s10 }
  0x2b   : > { %502 = vrot.lane.b32.xlu1 %v562_v0, %s5985_s10  ;;  %500 = vrot.lane.b32.xlu0 %v561_v3, %s5985_s10 }
  0x2c   : > { %504 = vrot.lane.b32.xlu2 %v563_v2, %s5985_s10 }
  0x33   : > { %465 = vrot.lane.b32.xlu1 %v561_v3, %s5986_s11  ;;  %463 = vrot.lane.b32.xlu0 %v560_v1, %s5986_s11 }
  0x34   : > { %467 = vrot.lane.b32.xlu2 %v562_v0, %s5986_s11 }
  0x3b   : > { %469 = vrot.lane.b32.xlu0 %v563_v2, %s5986_s11  ;;  %420 = vrot.lane.b32.xlu1 %v412_v4, %s5987_s12 }
  0x3c   : > { %422 = vrot.lane.b32.xlu2 %v378_v5, %s5987_s12 }
  0x43   : > { %424 = vrot.lane.b32.xlu0 %v414_v6, %s5987_s12  ;;  %426 = vrot.lane.b32.xlu1 %v415_v7, %s5987_s12 }
  0x44   : > { %385 = vrot.lane.b32.xlu2 %v412_v4, %s5988_s13 }
  0x4b   : > { %389 = vrot.lane.b32.xlu1 %v414_v6, %s5988_s13  ;;  %387 = vrot.lane.b32.xlu0 %v378_v5, %s5988_s13 }
  0x4c   : > { %391 = vrot.lane.b32.xlu2 %v415_v7, %s5988_s13 }
  0x53   : > { %352 = vrot.lane.b32.xlu1 %v378_v5, %s5989_s14  ;;  %350 = vrot.lane.b32.xlu0 %v412_v4, %s5989_s14 }
  0x54   : > { %354 = vrot.lane.b32.xlu2 %v414_v6, %s5989_s14 }
  0x5b   : > { %356 = vrot.lane.b32.xlu0 %v415_v7, %s5989_s14  ;;  %314 = vrot.lane.b32.xlu1 %v412_v4, %s5990_s15 }
  0x5c   : > { %316 = vrot.lane.b32.xlu2 %v378_v5, %s5990_s15 }
  0x63   : > { %318 = vrot.lane.b32.xlu0 %v414_v6, %s5990_s15  ;;  %320 = vrot.lane.b32.xlu1 %v415_v7, %s5990_s15 }
  0x6e   : > { %v534_v8 = vpop.permute.xlu2 %533 }
  0x6f   : > { %v541_v9 = vrot.slane %v534_v8, 4 }
  0x76   : > { %v536_v10 = vpop.permute.xlu2 %535 }
  0x77   : > { %v542_v11 = vrot.slane %v536_v10, 4 }
  0x79   : > { %v545_v12 = vsel %vm326_vm0, %v541_v9, %v542_v11  ;;  %v548_v13 = vsel %vm546_vm1, %v536_v10, %v542_v11 }
  0x7a   : > { %v547_v14 = vsel %vm546_vm1, %v534_v8, %v545_v12  ;;  %557 = vst [vmem:[#allocation3 + $0xb0] sm:$0xf] %v548_v13 }
  0x7b   : > { %556 = vst [vmem:[#allocation3 + $0xa8] sm:$0xff] %v547_v14  ;;  %v6151_v14 = vld [vmem:[#allocation3 + $0x68] sm:$0xf] }
  0x7e   : > { %v6099_v15 = vpop.permute.xlu2 %498 }
  0x7f   : > { %v506_v56 = vrot.slane %v6099_v15, 4 }
  0x81   : > { %v4966_v0 = vld [vmem:[#allocation3 + $0xb0] sm:$0xf] }
  0x82   : > { %v4958_v5 = vld [vmem:[#allocation3 + $0xa8] sm:$0xf]  ;;  %v5723_v6 = vld [vmem:[#allocation3 + $0xac] sm:$0xf] }
  0x85   : > { %v573_v16 = vpop.permute.xlu1 %572  ;;  %v569_v17 = vpop.permute.xlu0 %568 }
  0x86   : > { %v6101_v18 = vpop.permute.xlu2 %504  ;;  %v578_v23 = vrot.slane %v573_v16, 4  ;;  %v576_v24 = vrot.slane %v569_v17, 4 }
  0x87   : > { %v509_v19 = vrot.slane %v6101_v18, 4 }
  0x89   : > { %v516_v20 = vsel %vm511_vm2, %v6101_v18, %v509_v19  ;;  %v6156_v18 = vld [vmem:[#allocation3 + $0x70] sm:$0xf0] }
  0x8a   : > { %524 = vst [vmem:[#allocation3 + $0xa4] sm:$0xf] %v516_v20  ;;  %v6159_v20 = vld [vmem:[#allocation3 + $0x68] sm:$0xf0] }
  0x8d   : > { %v575_v21 = vpop.permute.xlu1 %574  ;;  %v571_v22 = vpop.permute.xlu0 %570 }
  0x8e   : > { %v579_v25 = vrot.slane %v575_v21, 4  ;;  %v577_v26 = vrot.slane %v571_v22, 4  ;;  %v6108_v27 = vpop.permute.xlu2 %467 }
  0x90   : > { %v584_v28 = vsel %vm326_vm0, %v578_v23, %v579_v25  ;;  %v586_v29 = vsel %vm581_vm3, %v575_v21, %v579_v25  ;;  %v580_v30 = vsel %vm326_vm0, %v576_v24, %v577_v26  ;;  %v583_v33 = vsel %vm581_vm3, %v571_v22, %v577_v26  ;;  %v6161_v23 = vld [vmem:[#allocation3 + $0x64] sm:$0xf]  ;;  %v6164_v24 = vld [vmem:[%s6054_s30 + $0x2c] sm:$0xff] }
  0x91   : > { %v585_v31 = vsel %vm581_vm3, %v573_v16, %v584_v28  ;;  %594 = vst [vmem:[#allocation3 + $0xd4] sm:$0xf] %v586_v29  ;;  %v582_v32 = vsel %vm581_vm3, %v569_v17, %v580_v30  ;;  %v5259_v16 = vld [vmem:[%s6054_s30 + $0x34] sm:$0xf]  ;;  %v6154_v17 = vld [vmem:[#allocation3 + $0x60] sm:$0xf] }
  0x92   : > { %593 = vst [vmem:[#allocation3 + $0xcc] sm:$0xff] %v585_v31  ;;  %v6168_v29 = vld [vmem:[#allocation3 + $0x6c] sm:$0xf0] }
  0x93   : > { %591 = vst [vmem:[#allocation3 + $0xc0] sm:$0xff] %v582_v32  ;;  %v6171_v30 = vld [vmem:[%s6054_s30 + $0x40] sm:$0xff] }
  0x94   : > { %592 = vst [vmem:[#allocation3 + $0xc8] sm:$0xf] %v583_v33 }
  0x95   : > { %v540_v34 = vpop.permute.xlu1 %539  ;;  %v538_v35 = vpop.permute.xlu0 %537  ;;  %2740 = vst [vmem:[#allocation3 + $0x68] sm:$0xf] %v5259_v16  ;;  %v5698_v16 = vld [vmem:[%s8095_s2 + $0x24] sm:$0xf] }
  0x96   : > { %v544_v36 = vrot.slane %v540_v34, 4  ;;  %v543_v37 = vrot.slane %v538_v35, 4  ;;  %v6116_v38 = vpop.permute.xlu2 %422  ;;  %2739 = vst [vmem:[#allocation3 + $0x60] sm:$0xff] %v6164_v24 }
  0x97   : > { %v429_v41 = vrot.slane %v6116_v38, 4  ;;  %2741 = vst [vmem:[#allocation3 + $0x6c] sm:$0xff] %v6171_v30 }
  0x98   : > { %v551_v43 = vsel %vm546_vm1, %v540_v34, %v544_v36  ;;  %v549_v44 = vsel %vm326_vm0, %v543_v37, %v544_v36  ;;  %v5728_v45 = vld [vmem:[#allocation3 + $0xd0] sm:$0xf0]  ;;  %v4852_v36 = vld [vmem:[%s8095_s2 + $0x18] sm:$0xf0] }
  0x99   : > { %559 = vst [vmem:[#allocation3 + $0xbc] sm:$0xf] %v551_v43  ;;  %v550_v47 = vsel %vm546_vm1, %v538_v35, %v549_v44  ;;  %v5727_v48 = vld [vmem:[#allocation3 + $0xc8] sm:$0xf0]  ;;  %v4972_v49 = vld [vmem:[#allocation3 + $0xcc] sm:$0xf0]  ;;  %v435_v50 = vsel %vm433_vm4, %v6116_v38, %v429_v41 }
  0x9a   : > { %558 = vst [vmem:[#allocation3 + $0xb4] sm:$0xff] %v550_v47  ;;  %v4970_v51 = vld [vmem:[#allocation3 + $0xc0] sm:$0xf]  ;;  %v5726_v52 = vld [vmem:[#allocation3 + $0xc4] sm:$0xf] }
  0x9b   : > { %v4971_v53 = vor.u32 %v5727_v48, %v4970_v51  ;;  %v4975_v54 = vor.u32 %v5726_v52, %v4972_v49  ;;  %v4978_v55 = vld [vmem:[#allocation3 + $0xc8] sm:$0xf]  ;;  %444 = vst [vmem:[#allocation3 + $0x50] sm:$0xf] %v435_v50  ;;  %v5696_v35 = vld [vmem:[%s8095_s2 + $0x14] sm:$0xf] }
  0x9c   : > { %v4979_v57 = vor.u32 %v5728_v45, %v4978_v55  ;;  %v473_v48 = vrot.slane %v6108_v27, 4  ;;  %v6190_v49 = vor.u32 %v5696_v35, %v4852_v36 }
  0x9d   : > { %868 = vmatpush.bf16.msra.mxu1 %v4971_v53  ;;  %926 = vmatpush.bf16.msra.mxu3 %v4975_v54  ;;  %v503_v59 = vpop.permute.xlu1 %502  ;;  %v501_v60 = vpop.permute.xlu0 %500 }
  0x9e   : > { %v508_v61 = vrot.slane %v503_v59, 4  ;;  %v507_v62 = vrot.slane %v501_v60, 4  ;;  %v6137_v63 = vpop.permute.xlu2 %385 }
  0xa0   : > { %v510_v1 = vsel %vm326_vm0, %v506_v56, %v507_v62  ;;  %v513_v2 = vsel %vm511_vm2, %v501_v60, %v507_v62  ;;  %v514_v3 = vsel %vm326_vm0, %v508_v61, %v509_v19  ;;  %4984 = vmatmul.msk.bf16.vlgmr.msra.gmra.mxu3 %vm819_vm5, %v6135_v58  ;;  %v5725_v4 = vld [vmem:[#allocation3 + $0xb8] sm:$0xf0]  ;;  %4980 = vmatmul.msk.bf16.vlgmr.msra.gmra.mxu1 %vm819_vm5, %v6135_v58  ;;  %v5261_v19 = vld [vmem:[%s6054_s30 + $0x48] sm:$0xf] }
  0xa1   : > { %984 = vmatpush.bf16.msrb.mxu3 %v4979_v57  ;;  %v512_v7 = vsel %vm511_vm2, %v6099_v15, %v510_v1  ;;  %522 = vst [vmem:[#allocation3 + $0x98] sm:$0xf] %v513_v2  ;;  %v515_v8 = vsel %vm511_vm2, %v503_v59, %v514_v3  ;;  %v4967_v9 = vor.u32 %v5725_v4, %v4966_v0  ;;  %v5724_v10 = vld [vmem:[#allocation3 + $0xb0] sm:$0xf0]  ;;  %v4960_v11 = vld [vmem:[#allocation3 + $0xb4] sm:$0xf0] }
  0xa2   : > { %521 = vst [vmem:[#allocation3 + $0x90] sm:$0xff] %v512_v7  ;;  %v4959_v12 = vor.u32 %v5724_v10, %v4958_v5  ;;  %v4963_v13 = vor.u32 %v5723_v6, %v4960_v11  ;;  %v5722_v15 = vld [vmem:[#allocation3 + $0xa0] sm:$0xf0]  ;;  %v4918_v36 = vld [vmem:[#allocation3 + $0x50] sm:$0xf] }
  0xa3   : > { %523 = vst [vmem:[#allocation3 + $0x9c] sm:$0xff] %v515_v8  ;;  %948 = vmatpush.bf16.msrb.mxu1 %v4967_v9 }
  0xa4   : > { %832 = vmatpush.bf16.msra.mxu0 %v4959_v12  ;;  %890 = vmatpush.bf16.msra.mxu2 %v4963_v13  ;;  %2742 = vst [vmem:[#allocation3 + $0x74] sm:$0xf] %v5261_v19  ;;  %v4931_v19 = vor.u32 %v6156_v18, %v6151_v14 }
  0xa5   : > { %v466_v21 = vpop.permute.xlu1 %465  ;;  %v464_v22 = vpop.permute.xlu0 %463 }
  0xa6   : > { %v472_v25 = vrot.slane %v466_v21, 4  ;;  %v471_v26 = vrot.slane %v464_v22, 4  ;;  %v6166_v28 = vpop.permute.xlu2 %391 }
  0xa7   : > { %v396_v31 = vrot.slane %v6166_v28, 4 }
  0xa8   : > { %v478_v32 = vsel %vm476_vm6, %v466_v21, %v472_v25  ;;  %v475_v33 = vsel %vm326_vm0, %v471_v26, %v472_v25  ;;  %v4954_v34 = vld [vmem:[#allocation3 + $0x98] sm:$0xf]  ;;  %v393_v21 = vrot.slane %v6137_v63, 4  ;;  %v4927_v25 = vor.u32 %v6161_v23, %v6168_v29 }
  0xa9   : > { %487 = vst [vmem:[#allocation3 + $0x80] sm:$0xf] %v478_v32  ;;  %v477_v37 = vsel %vm476_vm6, %v464_v22, %v475_v33  ;;  %v4955_v39 = vor.u32 %v5722_v15, %v4954_v34  ;;  %v4946_v40 = vld [vmem:[#allocation3 + $0x90] sm:$0xf]  ;;  %v5720_v42 = vld [vmem:[#allocation3 + $0x94] sm:$0xf]  ;;  %v403_v43 = vsel %vm398_vm7, %v6166_v28, %v396_v31  ;;  %v4923_v22 = vor.u32 %v6159_v20, %v6154_v17 }
  0xaa   : > { %486 = vst [vmem:[#allocation3 + $0x78] sm:$0xff] %v477_v37  ;;  %v5721_v44 = vld [vmem:[#allocation3 + $0x98] sm:$0xf0]  ;;  %v4948_v45 = vld [vmem:[#allocation3 + $0x9c] sm:$0xf0] }
  0xab   : > { %949 = vmatpush.bf16.msrb.mxu1 %v4955_v39  ;;  %v4947_v46 = vor.u32 %v5721_v44, %v4946_v40  ;;  %v4951_v47 = vor.u32 %v5720_v42, %v4948_v45  ;;  %411 = vst [vmem:[#allocation3 + $0x44] sm:$0xf] %v403_v43  ;;  %v4860_v15 = vld [vmem:[%s8095_s2 + $0x28] sm:$0xf0] }
  0xac   : > { %v6229_v33 = vor.u32 %v5698_v16, %v4860_v15 }
  0xad   : > { %833 = vmatpush.bf16.msra.mxu0 %v4947_v46  ;;  %891 = vmatpush.bf16.msra.mxu2 %v4951_v47  ;;  %v470_v50 = vpop.permute.xlu0 %469  ;;  %v421_v51 = vpop.permute.xlu1 %420 }
  0xae   : > { %v474_v52 = vrot.slane %v470_v50, 4  ;;  %v428_v53 = vrot.slane %v421_v51, 4  ;;  %v6192_v54 = vpop.permute.xlu2 %354 }
  0xb0   : > { %v479_v55 = vsel %vm326_vm0, %v473_v48, %v474_v52  ;;  %v481_v56 = vsel %vm476_vm6, %v470_v50, %v474_v52  ;;  %v432_v57 = vsel %vm326_vm0, %v428_v53, %v429_v41  ;;  %4985 = vmatmul.msk.bf16.gmra.mxu3 %vm819_vm5, %v6190_v49  ;;  %4981 = vmatmul.msk.bf16.gmra.mxu1 %vm819_vm5, %v6190_v49  ;;  %v4942_v41 = vld [vmem:[#allocation3 + $0x80] sm:$0xf]  ;;  %v5700_v53 = vld [vmem:[%s8095_s2 + $0x34] sm:$0xf] }
  0xb1   : > { %v480_v59 = vsel %vm476_vm6, %v6108_v27, %v479_v55  ;;  %489 = vst [vmem:[#allocation3 + $0x8c] sm:$0xf] %v481_v56  ;;  %v434_v60 = vsel %vm433_vm4, %v421_v51, %v432_v57  ;;  %v4934_v2 = vld [vmem:[#allocation3 + $0x78] sm:$0xf]  ;;  %v5717_v6 = vld [vmem:[#allocation3 + $0x7c] sm:$0xf] }
  0xb2   : > { %488 = vst [vmem:[#allocation3 + $0x84] sm:$0xff] %v480_v59  ;;  %v5710_v47 = vld [vmem:[#allocation3 + $0x40] sm:$0xf0]  ;;  %v4868_v55 = vld [vmem:[%s8095_s2 + $0x38] sm:$0xf0]  ;;  %v5991_v56 = vmov 1  }
  0xb3   : > { %443 = vst [vmem:[#allocation3 + $0x48] sm:$0xff] %v434_v60  ;;  %v290_v48 = vld [vmem:[%s8097_s4 + $0x10] sm:$0xff]  ;;  %5913 = vset.pattern.permute.xlu1 %v5991_v56 }
  0xb4   : > { %1047 = vperm.xlu1 %5913, %v290_v48  }
  0xb5   : > { %v425_v61 = vpop.permute.xlu0 %424  ;;  %v427_v62 = vpop.permute.xlu1 %426 }
  0xb6   : > { %v430_v0 = vrot.slane %v425_v61, 4  ;;  %v431_v38 = vrot.slane %v427_v62, 4  ;;  %v6206_v1 = vpop.permute.xlu2 %316 }
  0xb7   : > { %v323_v3 = vrot.slane %v6206_v1, 4 }
  0xb8   : > { %v436_v4 = vsel %vm326_vm0, %v430_v0, %v431_v38  ;;  %v438_v5 = vsel %vm433_vm4, %v427_v62, %v431_v38  ;;  %v5719_v27 = vld [vmem:[#allocation3 + $0x88] sm:$0xf0] }
  0xb9   : > { %v437_v7 = vsel %vm433_vm4, %v425_v61, %v436_v4  ;;  %446 = vst [vmem:[#allocation3 + $0x5c] sm:$0xf] %v438_v5  ;;  %v4943_v8 = vor.u32 %v5719_v27, %v4942_v41  ;;  %v5718_v9 = vld [vmem:[#allocation3 + $0x80] sm:$0xf0]  ;;  %v4936_v10 = vld [vmem:[#allocation3 + $0x84] sm:$0xf0]  ;;  %v330_v11 = vsel %vm328_vm8, %v6206_v1, %v323_v3  ;;  %v6257_v27 = vor.u32 %v5700_v53, %v4868_v55 }
  0xba   : > { %445 = vst [vmem:[#allocation3 + $0x54] sm:$0xff] %v437_v7  ;;  %v4935_v12 = vor.u32 %v5718_v9, %v4934_v2  ;;  %v4939_v13 = vor.u32 %v5717_v6, %v4936_v10  ;;  %v4910_v20 = vld [vmem:[#allocation3 + $0x48] sm:$0xf]  ;;  %v5711_v23 = vld [vmem:[#allocation3 + $0x4c] sm:$0xf]  ;;  %v360_v2 = vrot.slane %v6192_v54, 4 }
  0xbb   : > { %950 = vmatpush.bf16.msrb.mxu1 %v4943_v8  ;;  %339 = vst [vmem:[#allocation3 + $0x8] sm:$0xf] %v330_v11  ;;  %v288_v1 = vld [vmem:[%s8097_s4] sm:$0xff]  ;;  %v5701_v53 = vld [vmem:[%s8095_s2 + $0x34] sm:$0xf0] }
  0xbc   : > { %834 = vmatpush.bf16.msra.mxu0 %v4935_v12  ;;  %892 = vmatpush.bf16.msra.mxu2 %v4939_v13  ;;  %v291_v13 = vld [vmem:[%s8097_s4 + $0x18] sm:$0xff] }
  0xbd   : > { %v390_v26 = vpop.permute.xlu1 %389  ;;  %v388_v32 = vpop.permute.xlu0 %387 }
  0xbe   : > { %v395_v34 = vrot.slane %v390_v26, 4  ;;  %v394_v35 = vrot.slane %v388_v32, 4 }
  0xbf   : > { %951 = vmatpush.bf16.msrb.mxu1 %v4931_v19 }
  0xc0   : > { %v397_v14 = vsel %vm326_vm0, %v393_v21, %v394_v35  ;;  %v400_v18 = vsel %vm398_vm7, %v388_v32, %v394_v35  ;;  %v401_v37 = vsel %vm326_vm0, %v395_v34, %v396_v31  ;;  %835 = vmatpush.bf16.msra.mxu0 %v4923_v22  ;;  %893 = vmatpush.bf16.msra.mxu2 %v4927_v25  ;;  %v5713_v17 = vld [vmem:[#allocation3 + $0x58] sm:$0xf0] }
  0xc1   : > { %v399_v29 = vsel %vm398_vm7, %v6137_v63, %v397_v14  ;;  %409 = vst [vmem:[#allocation3 + $0x38] sm:$0xf] %v400_v18  ;;  %v402_v39 = vsel %vm398_vm7, %v390_v26, %v401_v37  ;;  %4986 = vmatmul.msk.bf16.gmra.mxu3 %vm819_vm5, %v6229_v33  ;;  %v4919_v40 = vor.u32 %v5713_v17, %v4918_v36  ;;  %v5712_v42 = vld [vmem:[#allocation3 + $0x50] sm:$0xf0]  ;;  %v4912_v43 = vld [vmem:[#allocation3 + $0x54] sm:$0xf0] }
  0xc2   : > { %4982 = vmatmul.msk.bf16.gmra.mxu1 %vm819_vm5, %v6229_v33  ;;  %408 = vst [vmem:[#allocation3 + $0x30] sm:$0xff] %v399_v29  ;;  %v4911_v28 = vor.u32 %v5712_v42, %v4910_v20  ;;  %v4915_v31 = vor.u32 %v5711_v23, %v4912_v43  ;;  %v289_v20 = vld [vmem:[%s8097_s4 + $0x8] sm:$0xff]  ;;  %v4842_v23 = vld [vmem:[%s8095_s2] sm:$0xf] }
  0xc3   : > { %410 = vst [vmem:[#allocation3 + $0x3c] sm:$0xff] %v402_v39  ;;  %952 = vmatpush.bf16.msrb.mxu1 %v4919_v40  ;;  %v5695_v29 = vld [vmem:[%s8095_s2 + $0x4] sm:$0xf0]  ;;  %v4882_v39 = vld [vmem:[#allocation3 + $0x8] sm:$0xf] }
  0xc4   : > { %836 = vmatpush.bf16.msra.mxu0 %v4911_v28  ;;  %894 = vmatpush.bf16.msra.mxu2 %v4915_v31 }
  0xc5   : > { %v353_v63 = vpop.permute.xlu1 %352  ;;  %v351_v44 = vpop.permute.xlu0 %350 }
  0xc6   : > { %v359_v45 = vrot.slane %v353_v63, 4  ;;  %v358_v46 = vrot.slane %v351_v44, 4 }
  0xc8   : > { %v365_v50 = vsel %vm363_vm9, %v353_v63, %v359_v45  ;;  %v362_v51 = vsel %vm326_vm0, %v358_v46, %v359_v45  ;;  %v4906_v52 = vld [vmem:[#allocation3 + $0x38] sm:$0xf]  ;;  %v4843_v46 = vor.u32 %v5695_v29, %v4842_v23 }
  0xc9   : > { %374 = vst [vmem:[#allocation3 + $0x20] sm:$0xf] %v365_v50  ;;  %v364_v57 = vsel %vm363_vm9, %v351_v44, %v362_v51  ;;  %v4907_v59 = vor.u32 %v5710_v47, %v4906_v52  ;;  %v4898_v60 = vld [vmem:[#allocation3 + $0x30] sm:$0xf]  ;;  %v5708_v61 = vld [vmem:[#allocation3 + $0x34] sm:$0xf] }
  0xca   : > { %373 = vst [vmem:[#allocation3 + $0x18] sm:$0xff] %v364_v57  ;;  %v5709_v62 = vld [vmem:[#allocation3 + $0x38] sm:$0xf0]  ;;  %v4900_v0 = vld [vmem:[#allocation3 + $0x3c] sm:$0xf0] }
  0xcb   : > { %953 = vmatpush.bf16.msrb.mxu1 %v4907_v59  ;;  %v4899_v38 = vor.u32 %v5709_v62, %v4898_v60  ;;  %v4903_v41 = vor.u32 %v5708_v61, %v4900_v0  ;;  %v4850_v47 = vld [vmem:[%s8095_s2 + $0x10] sm:$0xf]  ;;  %v4858_v50 = vld [vmem:[%s8095_s2 + $0x20] sm:$0xf]  ;;  %v5699_v51 = vld [vmem:[%s8095_s2 + $0x24] sm:$0xf0] }
  0xcc   : > { %v4859_v52 = vor.u32 %v5699_v51, %v4858_v50 }
  0xcd   : > { %837 = vmatpush.bf16.msra.mxu0 %v4899_v38  ;;  %895 = vmatpush.bf16.msra.mxu2 %v4903_v41  ;;  %v357_v4 = vpop.permute.xlu0 %356  ;;  %v315_v5 = vpop.permute.xlu1 %314 }
  0xce   : > { %v361_v6 = vrot.slane %v357_v4, 4  ;;  %v322_v7 = vrot.slane %v315_v5, 4 }
  0xd0   : > { %v366_v8 = vsel %vm326_vm0, %v360_v2, %v361_v6  ;;  %v368_v9 = vsel %vm363_vm9, %v357_v4, %v361_v6  ;;  %v327_v10 = vsel %vm326_vm0, %v322_v7, %v323_v3  ;;  %v4894_v21 = vld [vmem:[#allocation3 + $0x20] sm:$0xf] }
  0xd1   : > { %v367_v11 = vsel %vm363_vm9, %v6192_v54, %v366_v8  ;;  %376 = vst [vmem:[#allocation3 + $0x2c] sm:$0xf] %v368_v9  ;;  %v329_v12 = vsel %vm328_vm8, %v315_v5, %v327_v10  ;;  %4987 = vmatmul.msk.bf16.gmra.mxu3 %vm819_vm5, %v6257_v27  ;;  %v5992_v54 = vmov 0   ;;  %v4886_v22 = vld [vmem:[#allocation3 + $0x18] sm:$0xf] }
  0xd2   : > { %4983 = vmatmul.msk.bf16.gmra.mxu1 %vm819_vm5, %v6257_v27  ;;  %375 = vst [vmem:[#allocation3 + $0x24] sm:$0xff] %v367_v11  ;;  %5912 = vset.pattern.permute.xlu0 %v5992_v54  ;;  %v5705_v34 = vld [vmem:[#allocation3 + $0x1c] sm:$0xf] }
  0xd3   : > { %338 = vst [vmem:[#allocation3] sm:$0xff] %v329_v12  ;;  %5915 = vset.pattern.permute.xlu1 %v5992_v54  ;;  %1023 = vperm.xlu0 %5912, %v291_v13  }
  0xd4   : > { %298 = vst [vmem:[#allocation2] sm:$0xf] %v5992_v54  ;;  %1008 = vperm.xlu1 %5915, %v288_v1   ;;  %5911 = vset.pattern.permute.xlu2 %v5992_v54 }
  0xd5   : > { %v319_v3 = vpop.permute.xlu0 %318  ;;  %v321_v16 = vpop.permute.xlu1 %320  ;;  %299 = vst [vmem:[#allocation2 + $0x14] sm:$0xf] %v5992_v54  ;;  %1018 = vperm.xlu2 %5911, %v290_v48  }
  0xd6   : > { %v324_v15 = vrot.slane %v319_v3, 4  ;;  %v325_v19 = vrot.slane %v321_v16, 4  ;;  %300 = vst [vmem:[#allocation2 + $0x28] sm:$0xf] %v5992_v54 }
  0xd7   : > { %301 = vst [vmem:[#allocation2 + $0x3c] sm:$0xf] %v5992_v54 }
  0xd8   : > { %v331_v25 = vsel %vm326_vm0, %v324_v15, %v325_v19  ;;  %v333_v26 = vsel %vm328_vm8, %v321_v16, %v325_v19  ;;  %v5707_v32 = vld [vmem:[#allocation3 + $0x28] sm:$0xf0]  ;;  %302 = vst [vmem:[#allocation2 + $0x10] sm:$0xf] %v5992_v54 }
  0xd9   : > { %v332_v35 = vsel %vm328_vm8, %v319_v3, %v331_v25  ;;  %341 = vst [vmem:[#allocation3 + $0x14] sm:$0xf] %v333_v26  ;;  %v4895_v36 = vor.u32 %v5707_v32, %v4894_v21  ;;  %v5706_v14 = vld [vmem:[#allocation3 + $0x20] sm:$0xf0]  ;;  %v4888_v18 = vld [vmem:[#allocation3 + $0x24] sm:$0xf0] }
  0xda   : > { %340 = vst [vmem:[#allocation3 + $0xc] sm:$0xff] %v332_v35  ;;  %v4887_v37 = vor.u32 %v5706_v14, %v4886_v22  ;;  %v4891_v17 = vor.u32 %v5705_v34, %v4888_v18  ;;  %v4874_v42 = vld [vmem:[#allocation3] sm:$0xf]  ;;  %v5702_v31 = vld [vmem:[#allocation3 + $0x4] sm:$0xf] }
  0xdb   : > { %954 = vmatpush.bf16.msrb.mxu1 %v4895_v36  ;;  %303 = vst [vmem:[#allocation2 + $0x24] sm:$0xf] %v5992_v54  ;;  %5917 = vset.pattern.permute.xlu0 %v5991_v56  ;;  %v292_v22 = vld [vmem:[%s8094_s1] sm:$0x7] }
  0xdc   : > { %838 = vmatpush.bf16.msra.mxu0 %v4887_v37  ;;  %896 = vmatpush.bf16.msra.mxu2 %v4891_v17  ;;  %304 = vst [vmem:[#allocation2 + $0x38] sm:$0xf] %v5992_v54  ;;  %v6361_v34 = vperm.slane %v292_v22, 2 }
  0xdd   : > { %305 = vst [vmem:[#allocation2 + $0x4c] sm:$0xf] %v5992_v54  ;;  %5918 = vset.pattern.permute.xlu1 %v5991_v56  ;;  %1039 = vperm.xlu0 %5917, %v288_v1  }
  0xde   : > { %1043 = vperm.xlu1 %5918, %v289_v20   ;;  %5914 = vset.pattern.permute.xlu2 %v5991_v56 }
  0xdf   : > { %1051 = vperm.xlu2 %5914, %v291_v13  }
  0xe0   : > { %v5704_v40 = vld [vmem:[#allocation3 + $0x10] sm:$0xf0] }
  0xe1   : > { %4988 = vmatmul.msk.bf16.vlgmr.msrb.gmra.mxu3 %vm819_vm5, %v6135_v58  ;;  %v4883_v43 = vor.u32 %v5704_v40, %v4882_v39  ;;  %v5703_v28 = vld [vmem:[#allocation3 + $0x8] sm:$0xf0]  ;;  %v4876_v63 = vld [vmem:[#allocation3 + $0xc] sm:$0xf0]  ;;  %v5697_v58 = vld [vmem:[%s8095_s2 + $0x14] sm:$0xf0] }
  0xe2   : > { %v4875_v44 = vor.u32 %v5703_v28, %v4874_v42  ;;  %v4879_v45 = vor.u32 %v5702_v31, %v4876_v63  ;;  %v4851_v48 = vor.u32 %v5697_v58, %v4850_v47  ;;  %v6373_v63 = vperm.slane %v292_v22, 1 }
  0xe3   : > { %955 = vmatpush.bf16.msrb.mxu1 %v4883_v43 }
  0xe4   : > { %839 = vmatpush.bf16.msra.mxu0 %v4875_v44  ;;  %897 = vmatpush.bf16.msra.mxu2 %v4879_v45 }
  0xe6   : > { %956 = vmatmul.bf16.vlgmr.msrb.gmra.mxu1 %v4843_v46 }
  0xe7   : > { %840 = vmatmul.bf16.vlgmr.msra.gmra.mxu0 %v4843_v46  ;;  %898 = vmatmul.bf16.vlgmr.msra.gmra.mxu2 %v4843_v46 }
  0xe8   : > { %5916 = vset.pattern.permute.xlu2 %v5992_v54 }
  0xe9   : > { %1013 = vperm.xlu2 %5916, %v289_v20   ;;  %v6365_v20 = vperm.slane %v292_v22, 0 }
  0xf1   : > { %4989 = vmatmul.msk.bf16.gmra.mxu3 %vm819_vm5, %v6190_v49  ;;  %v4866_v49 = vld [vmem:[%s8095_s2 + $0x30] sm:$0xf] }
  0xf2   : > { %v4867_v55 = vor.u32 %v5701_v53, %v4866_v49 }
  0xf6   : > { %961 = vmatmul.bf16.gmra.mxu1 %v4851_v48 }
  0xf7   : > { %845 = vmatmul.bf16.gmra.mxu0 %v4851_v48  ;;  %903 = vmatmul.bf16.gmra.mxu2 %v4851_v48 }
 0x101   : > { %4990 = vmatmul.msk.bf16.gmra.mxu3 %vm819_vm5, %v6229_v33 }
 0x106   : > { %966 = vmatmul.bf16.gmra.mxu1 %v4859_v52 }
 0x107   : > { %908 = vmatmul.bf16.gmra.mxu2 %v4859_v52  ;;  %850 = vmatmul.bf16.gmra.mxu0 %v4859_v52 }
 0x111   : > { %4991 = vmatmul.msk.bf16.gmra.mxu3 %vm819_vm5, %v6257_v27 }
 0x116   : > { %971 = vmatmul.bf16.gmra.mxu1 %v4867_v55 }
 0x117   : > { %913 = vmatmul.bf16.gmra.mxu2 %v4867_v55  ;;  %855 = vmatmul.bf16.gmra.mxu0 %v4867_v55 }
 0x11d   : > { %v870_v33 = vpop.f32.mrf.mxu1 }
 0x123   : > { %v928_v56 = vpop.f32.mrf.mxu3 }
 0x125   : > { %v872_v57 = vpop.f32.mrf.mxu1 }
 0x126   : > { %v6342_v8 = vpop.permute.xlu1 %1047 }
 0x12b   : > { %v930_v59 = vpop.f32.mrf.mxu3 }
 0x12d   : > { %v6318_v60 = vpop.f32.mrf.mxu1 }
 0x12f   : > { %v6338_v6 = vpop.permute.xlu2 %1018 }
 0x133   : > { %v6320_v61 = vpop.f32.mrf.mxu3 }
 0x135   : > { %v6322_v62 = vpop.f32.mrf.mxu1 }
 0x139   : > { %v6348_v11 = vpop.permute.xlu2 %1051 }
 0x13b   : > { %v6324_v0 = vpop.f32.mrf.mxu3 }
 0x13f   : > { %v6326_v38 = vpop.f32.mrf.mxu1 }
 0x143   : > { %v6363_v14 = vpop.permute.xlu2 %1013 }
 0x144   : > { %v6328_v41 = vpop.f32.mrf.mxu3 }
 0x145   : > { %v6346_v10 = vpop.permute.xlu0 %1023 }
 0x146   : > { %v6350_v13 = vpop.permute.xlu1 %1008 }
 0x147   : > { %v6330_v2 = vpop.f32.mrf.mxu1 }
 0x148   : > { %8112 = vst [vmem:[#allocation5_spill] sm:$0xff] %v6330_v2 }
 0x14c   : > { %v6332_v4 = vpop.f32.mrf.mxu3 }
 0x14d   : > { %8113 = vst [vmem:[#allocation6_spill] sm:$0xff] %v6332_v4 }
 0x14f   : > { %v6334_v5 = vpop.f32.mrf.mxu1  ;;  %v6352_v15 = vpop.permute.xlu0 %1039 }
 0x150   : > { %v6369_v43 = vpop.permute.xlu1 %1043 }
 0x154   : > { %v6336_v27 = vpop.f32.mrf.mxu3 }
 0x157   : > { %v6340_v7 = vpop.f32.mrf.mxu1 }
 0x158   : > { %8114 = vst [vmem:[#allocation7_spill] sm:$0xff] %v6340_v7  ;;  %v6612_v7 = vld [vmem:[%s6054_s30 + $0x40] sm:$0xff] }
 0x15c   : > { %v6344_v9 = vpop.f32.mrf.mxu3 }
 0x15d   : > { %8115 = vst [vmem:[#allocation8_spill] sm:$0xff] %v6344_v9 }
 0x163   : > { %v957_v12 = vpop.f32.mrf.mxu1 }
 0x164   : > { %v986_v1 = vpop.f32.mrf.mxu3  ;;  %v841_v54 = vpop.f32.mrf.mxu0 }
 0x165   : > { %v987_v3 = vadd.f32 %v986_v1, %v957_v12  ;;  %v871_v16 = vadd.f32 %v870_v33, %v841_v54 }
 0x167   : > { %v1026_v19 = vmul.f32 %v6350_v13, %v871_v16  ;;  %v1028_v21 = vmul.f32 %v6350_v13, %v987_v3 }
 0x169   : > { %v1054_v25 = vadd.f32 %v6352_v15, %v1026_v19  ;;  %v1056_v26 = vadd.f32 %v6352_v15, %v1028_v21 }
 0x16a   : > { %v899_v32 = vpop.f32.mrf.mxu2 }
 0x16b   : > { %v929_v35 = vadd.f32 %v928_v56, %v899_v32  ;;  %v959_v36 = vpop.f32.mrf.mxu1  ;;  %v1068_v18 = vmax.f32 %v1056_v26, 0.0  ;;  %v1066_v40 = vmax.f32 %v1054_v25, 0.0 }
 0x16c   : > { %v988_v37 = vpop.f32.mrf.mxu3  ;;  %v843_v17 = vpop.f32.mrf.mxu0 }
 0x16d   : > { %v1027_v23 = vmul.f32 %v6350_v13, %v929_v35  ;;  %v989_v29 = vadd.f32 %v988_v37, %v959_v36  ;;  %v873_v39 = vadd.f32 %v872_v57, %v843_v17  ;;  %v1087_v42 = vmul.f32 %v6361_v34, %v1068_v18 }
 0x16e   : > { %v1085_v47 = vmul.f32 %v6365_v20, %v1066_v40 }
 0x16f   : > { %v1029_v28 = vmul.f32 %v6363_v14, %v873_v39  ;;  %v1031_v31 = vmul.f32 %v6363_v14, %v989_v29  ;;  %v1055_v44 = vadd.f32 %v6352_v15, %v1027_v23  ;;  %v1098_v45 = vpack.c.bf16 %v1087_v42, %v1087_v42 }
 0x171   : > { %v1067_v46 = vmax.f32 %v1055_v44, 0.0  ;;  %v1059_v58 = vadd.f32 %v6369_v43, %v1031_v31  ;;  %1106 = vst [vmem:[#allocation2 + $0xc] sm:$0xf] %v1098_v45  ;;  %v1057_v49 = vadd.f32 %v6369_v43, %v1029_v28 }
 0x172   : > { %v901_v48 = vpop.f32.mrf.mxu2 }
 0x173   : > { %v1086_v50 = vmul.f32 %v6373_v63, %v1067_v46  ;;  %v1071_v51 = vmax.f32 %v1059_v58, 0.0  ;;  %v931_v52 = vadd.f32 %v930_v59, %v901_v48  ;;  %v962_v53 = vpop.f32.mrf.mxu1  ;;  %v1069_v59 = vmax.f32 %v1057_v49, 0.0 }
 0x174   : > { %v991_v55 = vpop.f32.mrf.mxu3  ;;  %v846_v33 = vpop.f32.mrf.mxu0 }
 0x175   : > { %v6380_v56 = vpack.c.bf16 %v1086_v50, %v1085_v47  ;;  %v1090_v57 = vmul.f32 %v6361_v34, %v1071_v51  ;;  %v1030_v12 = vmul.f32 %v6363_v14, %v931_v52  ;;  %v992_v1 = vadd.f32 %v991_v55, %v962_v53 }
 0x176   : > { %v876_v54 = vadd.f32 %v6318_v60, %v846_v33  ;;  %v1088_v60 = vmul.f32 %v6365_v20, %v1069_v59 }
 0x177   : > { %1105 = vst [vmem:[#allocation2 + $0x4] sm:$0xff] %v6380_v56  ;;  %v1100_v3 = vpack.c.bf16 %v1090_v57, %v1090_v57  ;;  %v1058_v16 = vadd.f32 %v6369_v43, %v1030_v12  ;;  %v1034_v19 = vmul.f32 %v6338_v6, %v992_v1 }
 0x178   : > { %v1032_v21 = vmul.f32 %v6338_v6, %v876_v54  ;;  %v1386_v25 = vld [vmem:[#allocation2 + $0xc] sm:$0xf] }
 0x179   : > { %1108 = vst [vmem:[#allocation2 + $0x20] sm:$0xf] %v1100_v3  ;;  %v1070_v22 = vmax.f32 %v1058_v16, 0.0  ;;  %v1062_v26 = vadd.f32 %v6342_v8, %v1034_v19 }
 0x17a   : > { %v1060_v32 = vadd.f32 %v6342_v8, %v1032_v21  ;;  %v904_v35 = vpop.f32.mrf.mxu2  ;;  %1394 = vst [vmem:[#allocation4 + $0xc8] sm:$0xf] %v1386_v25 }
 0x17b   : > { %v1089_v36 = vmul.f32 %v6373_v63, %v1070_v22  ;;  %v934_v18 = vadd.f32 %v6320_v61, %v904_v35  ;;  %v964_v37 = vpop.f32.mrf.mxu1  ;;  %v1074_v17 = vmax.f32 %v1062_v26, 0.0 }
 0x17c   : > { %v993_v23 = vpop.f32.mrf.mxu3  ;;  %v848_v29 = vpop.f32.mrf.mxu0  ;;  %v1072_v44 = vmax.f32 %v1060_v32, 0.0 }
 0x17d   : > { %v6394_v39 = vpack.c.bf16 %v1089_v36, %v1088_v60  ;;  %v1033_v40 = vmul.f32 %v6338_v6, %v934_v18  ;;  %v994_v42 = vadd.f32 %v993_v23, %v964_v37  ;;  %v878_v28 = vadd.f32 %v6322_v62, %v848_v29 }
 0x17e   : > { %v1093_v31 = vmul.f32 %v6361_v34, %v1074_v17  ;;  %v1317_v45 = vld [vmem:[#allocation2] sm:$0xff]  ;;  %v1091_v52 = vmul.f32 %v6365_v20, %v1072_v44 }
 0x17f   : > { %v1385_v46 = vld [vmem:[#allocation2 + $0x4] sm:$0xff]  ;;  %1107 = vst [vmem:[#allocation2 + $0x18] sm:$0xff] %v6394_v39  ;;  %v1061_v61 = vadd.f32 %v6342_v8, %v1033_v40  ;;  %v1037_v47 = vmul.f32 %v6346_v10, %v994_v42  ;;  %v1035_v58 = vmul.f32 %v6346_v10, %v878_v28  ;;  %1333 = vrot.lane.b32.xlu1 %v1317_v45, %s5987_s12 }
 0x180   : > { %1265 = vrot.lane.b32.xlu0 %v1317_v45, %s5988_s13  ;;  %v1102_v48 = vpack.c.bf16 %v1093_v31, %v1093_v31  ;;  %1197 = vrot.lane.b32.xlu2 %v1317_v45, %s5989_s14  ;;  %1393 = vst [vmem:[#allocation4 + $0xc0] sm:$0xff] %v1385_v46  ;;  %v1388_v62 = vld [vmem:[#allocation2 + $0x20] sm:$0xf] }
 0x181   : > { %v1073_v50 = vmax.f32 %v1061_v61, 0.0  ;;  %v1065_v51 = vadd.f32 %v6348_v11, %v1037_v47  ;;  %1396 = vst [vmem:[#allocation4 + $0xd4] sm:$0xf] %v1388_v62  ;;  %v1063_v33 = vadd.f32 %v6348_v11, %v1035_v58  ;;  %v1608_v61 = vld [vmem:[#allocation2 + $0x20] sm:$0xff] }
 0x182   : > { %1110 = vst [vmem:[#allocation2 + $0x34] sm:$0xf] %v1102_v48  ;;  %v906_v49 = vpop.f32.mrf.mxu2 }
 0x183   : > { %v1092_v53 = vmul.f32 %v6373_v63, %v1073_v50  ;;  %v1077_v55 = vmax.f32 %v1065_v51, 0.0  ;;  %v936_v57 = vadd.f32 %v6324_v0, %v906_v49  ;;  %v1075_v22 = vmax.f32 %v1063_v33, 0.0 }
 0x184   : > { %v851_v12 = vpop.f32.mrf.mxu0 }
 0x185   : > { %v6411_v1 = vpack.c.bf16 %v1092_v53, %v1091_v52  ;;  %v1096_v54 = vmul.f32 %v6361_v34, %v1077_v55  ;;  %v1036_v3 = vmul.f32 %v6346_v10, %v936_v57  ;;  %v6416_v59 = vadd.f32 %v6326_v38, %v851_v12 }
 0x186   : > { %v1319_v16 = vld [vmem:[#allocation2 + $0x14] sm:$0xff]  ;;  %v1094_v32 = vmul.f32 %v6365_v20, %v1075_v22  ;;  %v1320_v44 = vld [vmem:[#allocation2 + $0x1c] sm:$0xff] }
 0x187   : > { %v1387_v19 = vld [vmem:[#allocation2 + $0x18] sm:$0xff]  ;;  %1109 = vst [vmem:[#allocation2 + $0x2c] sm:$0xff] %v6411_v1  ;;  %v1104_v21 = vpack.c.bf16 %v1096_v54, %v1096_v54  ;;  %v1064_v25 = vadd.f32 %v6348_v11, %v1036_v3  ;;  %1129 = vrot.lane.b32.xlu1 %v1317_v45, %s5990_s15  ;;  %v1538_v45 = vld [vmem:[#allocation2 + $0xc] sm:$0xff] }
 0x188   : > { %1337 = vrot.lane.b32.xlu0 %v1319_v16, %s5987_s12  ;;  %1553 = vrot.lane.b32.xlu2 %v6380_v56, %s5984_s9  ;;  %1395 = vst [vmem:[#allocation4 + $0xcc] sm:$0xff] %v1387_v19 }
 0x189   : > { %1112 = vst [vmem:[#allocation2 + $0x48] sm:$0xf] %v1104_v21  ;;  %v1076_v0 = vmax.f32 %v1064_v25, 0.0  ;;  %v1390_v26 = vld [vmem:[#allocation2 + $0x34] sm:$0xf] }
 0x18a   : > { %v909_v38 = vpop.f32.mrf.mxu2  ;;  %1398 = vst [vmem:[#allocation4 + $0xe0] sm:$0xf] %v1390_v26  ;;  %v1610_v48 = vld [vmem:[#allocation2 + $0x34] sm:$0xff] }
 0x18b   : > { %v1095_v35 = vmul.f32 %v6373_v63, %v1076_v0  ;;  %v6427_v60 = vadd.f32 %v6328_v41, %v909_v38  ;;  %v6551_v26 = vld [vmem:[%s6054_s30 + $0x34] sm:$0xff] }
 0x18c   : > { %v6429_v36 = vpop.f32.mrf.mxu0 }
 0x18d   : > { %8116 = vst [vmem:[#allocation9_spill] sm:$0xff] %v6429_v36  ;;  %v6431_v18 = vpack.c.bf16 %v1095_v35, %v1094_v32 }
 0x18e   : > { %v1389_v37 = vld [vmem:[#allocation2 + $0x2c] sm:$0xff] }
 0x18f   : > { %1111 = vst [vmem:[#allocation2 + $0x40] sm:$0xff] %v6431_v18  ;;  %1621 = vrot.lane.b32.xlu1 %v6380_v56, %s5983_s8  ;;  %v1321_v42 = vld [vmem:[#allocation2 + $0x28] sm:$0xff]  ;;  %v1254_v47 = vld [vmem:[#allocation2 + $0x30] sm:$0xff] }
 0x190   : > { %1133 = vrot.lane.b32.xlu0 %v1319_v16, %s5990_s15  ;;  %1269 = vrot.lane.b32.xlu2 %v1319_v16, %s5988_s13  ;;  %1397 = vst [vmem:[#allocation4 + $0xd8] sm:$0xff] %v1389_v37  ;;  %v1392_v17 = vld [vmem:[#allocation2 + $0x48] sm:$0xf] }
 0x191   : > { %1400 = vst [vmem:[#allocation4 + $0xec] sm:$0xf] %v1392_v17  ;;  %v6564_v35 = vld [vmem:[#allocation2 + $0x48] sm:$0xff] }
 0x192   : > { %v6438_v23 = vpop.f32.mrf.mxu2 }
 0x193   : > { %8117 = vst [vmem:[#allocation10_spill] sm:$0xff] %v6438_v23 }
 0x194   : > { %v856_v41 = vpop.f32.mrf.mxu0 }
 0x195   : > { %v6441_v29 = vadd.f32 %v6334_v5, %v856_v41 }
 0x196   : > { %v1391_v40 = vld [vmem:[#allocation2 + $0x40] sm:$0xff] }
 0x197   : > { %8118 = vst [vmem:[#allocation11_spill] sm:$0xff] %v6441_v29  ;;  %1485 = vrot.lane.b32.xlu1 %v6380_v56, %s5985_s10  ;;  %v1323_v5 = vld [vmem:[#allocation2 + $0x3c] sm:$0xff]  ;;  %v1324_v50 = vld [vmem:[#allocation2 + $0x44] sm:$0xff] }
 0x198   : > { %1625 = vrot.lane.b32.xlu0 %v6394_v39, %s5983_s8  ;;  %1399 = vst [vmem:[#allocation4 + $0xe4] sm:$0xff] %v1391_v40  ;;  %1341 = vrot.lane.b32.xlu2 %v1321_v42, %s5987_s12 }
 0x19a   : > { %v914_v28 = vpop.f32.mrf.mxu2 }
 0x19b   : > { %v6449_v31 = vadd.f32 %v6336_v27, %v914_v28  ;;  %v1250_v27 = vld [vmem:[#allocation2 + $0x8] sm:$0xff] }
 0x19d   : > { %8119 = vst [vmem:[#allocation12_spill] sm:$0xff] %v6449_v31 }
 0x19f   : > { %1201 = vrot.lane.b32.xlu1 %v1319_v16, %s5989_s14 }
 0x1a0   : > { %1489 = vrot.lane.b32.xlu0 %v6394_v39, %s5985_s10  ;;  %1273 = vrot.lane.b32.xlu2 %v1321_v42, %s5988_s13 }
 0x1a7   : > { %1557 = vrot.lane.b32.xlu1 %v6394_v39, %s5984_s9 }
 0x1a8   : > { %1137 = vrot.lane.b32.xlu0 %v1321_v42, %s5990_s15  ;;  %1629 = vrot.lane.b32.xlu2 %v6411_v1, %s5983_s8 }
 0x1af   : > { %1205 = vrot.lane.b32.xlu1 %v1321_v42, %s5989_s14  ;;  %v6577_v42 = vld [vmem:[%s6054_s30 + $0x48] sm:$0xff] }
 0x1b0   : > { %1561 = vrot.lane.b32.xlu0 %v6411_v1, %s5984_s9  ;;  %1345 = vrot.lane.b32.xlu2 %v1323_v5, %s5987_s12 }
 0x1b7   : > { %1277 = vrot.lane.b32.xlu1 %v1323_v5, %s5988_s13 }
 0x1b8   : > { %1493 = vrot.lane.b32.xlu0 %v6411_v1, %s5985_s10  ;;  %1141 = vrot.lane.b32.xlu2 %v1323_v5, %s5990_s15 }
 0x1bf   : > { %1633 = vrot.lane.b32.xlu1 %v6431_v18, %s5983_s8 }
 0x1c0   : > { %1209 = vrot.lane.b32.xlu0 %v1323_v5, %s5989_s14  ;;  %1565 = vrot.lane.b32.xlu2 %v6431_v18, %s5984_s9 }
 0x1c7   : > { %1267 = vrot.lane.b32.xlu1 %v1250_v27, %s5988_s13 }
 0x1c8   : > { %1199 = vrot.lane.b32.xlu0 %v1250_v27, %s5989_s14  ;;  %1497 = vrot.lane.b32.xlu2 %v6431_v18, %s5985_s10 }
 0x1cf   : > { %1339 = vrot.lane.b32.xlu1 %v1320_v44, %s5987_s12 }
 0x1d0   : > { %1555 = vrot.lane.b32.xlu0 %v1538_v45, %s5984_s9  ;;  %1335 = vrot.lane.b32.xlu2 %v1250_v27, %s5987_s12 }
 0x1d7   : > { %1135 = vrot.lane.b32.xlu1 %v1320_v44, %s5990_s15 }
 0x1d8   : > { %1271 = vrot.lane.b32.xlu0 %v1320_v44, %s5988_s13  ;;  %1131 = vrot.lane.b32.xlu2 %v1250_v27, %s5990_s15 }
 0x1da   : > { %v6483_v46 = vpop.permute.xlu2 %1197 }
 0x1df   : > { %1627 = vrot.lane.b32.xlu1 %v1608_v61, %s5983_s8 }
 0x1e0   : > { %1275 = vrot.lane.b32.xlu0 %v1254_v47, %s5988_s13  ;;  %1623 = vrot.lane.b32.xlu2 %v1538_v45, %s5983_s8 }
 0x1e2   : > { %v6488_v58 = vpop.permute.xlu2 %1553 }
 0x1e7   : > { %1343 = vrot.lane.b32.xlu1 %v1254_v47, %s5987_s12 }
 0x1e8   : > { %1631 = vrot.lane.b32.xlu0 %v1610_v48, %s5983_s8  ;;  %1487 = vrot.lane.b32.xlu2 %v1538_v45, %s5985_s10 }
 0x1ea   : > { %v6493_v62 = vpop.permute.xlu2 %1269 }
 0x1ef   : > { %1139 = vrot.lane.b32.xlu1 %v1254_v47, %s5990_s15 }
 0x1f0   : > { %1347 = vrot.lane.b32.xlu0 %v1324_v50, %s5987_s12  ;;  %1203 = vrot.lane.b32.xlu2 %v1320_v44, %s5989_s14 }
 0x1f1   : > { %v1334_v52 = vpop.permute.xlu1 %1333 }
 0x1f2   : > { %v6498_v51 = vpop.permute.xlu0 %1265  ;;  %v6500_v49 = vpop.permute.xlu2 %1341  ;;  %v1349_v41 = vrot.slane %v1334_v52, 4 }
 0x1f7   : > { %1563 = vrot.lane.b32.xlu1 %v1610_v48, %s5984_s9 }
 0x1f8   : > { %1427 = vrot.lane.b32.xlu0 %v1610_v48, %s5986_s11  ;;  %1559 = vrot.lane.b32.xlu2 %v1608_v61, %s5984_s9 }
 0x1f9   : > { %v1130_v55 = vpop.permute.xlu1 %1129 }
 0x1fa   : > { %v6505_v53 = vpop.permute.xlu0 %1337  ;;  %v6507_v33 = vpop.permute.xlu2 %1273 }
 0x1ff   : > { %1495 = vrot.lane.b32.xlu1 %v1610_v48, %s5985_s10 }
 0x200   : > { %1417 = vrot.lane.b32.xlu0 %v6380_v56, %s5986_s11  ;;  %1207 = vrot.lane.b32.xlu2 %v1254_v47, %s5989_s14  ;;  %v1145_v47 = vrot.slane %v1130_v55, 4 }
 0x201   : > { %v6515_v12 = vpop.permute.xlu1 %1621 }
 0x202   : > { %v6513_v57 = vpop.permute.xlu0 %1133  ;;  %v6517_v54 = vpop.permute.xlu2 %1629 }
 0x207   : > { %1211 = vrot.lane.b32.xlu1 %v1324_v50, %s5989_s14 }
 0x208   : > { %1143 = vrot.lane.b32.xlu0 %v1324_v50, %s5990_s15  ;;  %1279 = vrot.lane.b32.xlu2 %v1324_v50, %s5988_s13 }
 0x209   : > { %v6524_v16 = vpop.permute.xlu1 %1485 }
 0x20a   : > { %v6522_v3 = vpop.permute.xlu0 %1625  ;;  %v6526_v56 = vpop.permute.xlu2 %1345 }
 0x20f   : > { %1491 = vrot.lane.b32.xlu1 %v1608_v61, %s5985_s10 }
 0x210   : > { %1423 = vrot.lane.b32.xlu0 %v1608_v61, %s5986_s11  ;;  %1425 = vrot.lane.b32.xlu2 %v6411_v1, %s5986_s11 }
 0x211   : > { %v6534_v21 = vpop.permute.xlu1 %1201 }
 0x212   : > { %v6532_v19 = vpop.permute.xlu0 %1489  ;;  %v6536_v22 = vpop.permute.xlu2 %1141 }
 0x217   : > { %1429 = vrot.lane.b32.xlu1 %v6431_v18, %s5986_s11 }
 0x218   : > { %2823 = vrot.lane.b32.xlu0 %v6171_v30, %s5984_s9  ;;  %1421 = vrot.lane.b32.xlu2 %v6394_v39, %s5986_s11 }
 0x219   : > { %v6546_v0 = vpop.permute.xlu1 %1557 }
 0x21a   : > { %v6544_v25 = vpop.permute.xlu0 %1137  ;;  %v6548_v1 = vpop.permute.xlu2 %1565 }
 0x21f   : > { %1419 = vrot.lane.b32.xlu1 %v1538_v45, %s5986_s11 }
 0x220   : > { %2787 = vrot.lane.b32.xlu0 %v6551_v26, %s5985_s10  ;;  %2821 = vrot.lane.b32.xlu2 %v6551_v26, %s5984_s9 }
 0x221   : > { %v6560_v39 = vpop.permute.xlu1 %1205 }
 0x222   : > { %v6558_v38 = vpop.permute.xlu0 %1561  ;;  %v6562_v32 = vpop.permute.xlu2 %1497 }
 0x227   : > { %2819 = vrot.lane.b32.xlu1 %v6164_v24, %s5984_s9 }
 0x228   : > { %1567 = vrot.lane.b32.xlu0 %v6564_v35, %s5984_s9  ;;  %2785 = vrot.lane.b32.xlu2 %v6164_v24, %s5985_s10 }
 0x229   : > { %v6574_v37 = vpop.permute.xlu1 %1277 }
 0x22a   : > { %v6572_v18 = vpop.permute.xlu0 %1493  ;;  %v1336_v17 = vpop.permute.xlu2 %1335 }
 0x22b   : > { %v1350_v40 = vrot.slane %v1336_v17, 4 }
 0x22d   : > { %v1357_v28 = vsel %vm326_vm0, %v1349_v41, %v1350_v40  ;;  %v1359_v5 = vsel %vm433_vm4, %v1336_v17, %v1350_v40 }
 0x22e   : > { %v1358_v27 = vsel %vm433_vm4, %v1334_v52, %v1357_v28  ;;  %1378 = vst [vmem:[#allocation4 + $0x98] sm:$0xf] %v1359_v5  ;;  %v1213_v28 = vrot.slane %v6483_v46, 4  ;;  %v1281_v5 = vrot.slane %v6498_v51, 4 }
 0x22f   : > { %1377 = vst [vmem:[#allocation4 + $0x90] sm:$0xff] %v1358_v27  ;;  %2825 = vrot.lane.b32.xlu1 %v6577_v42, %s5984_s9 }
 0x230   : > { %1499 = vrot.lane.b32.xlu0 %v6564_v35, %s5985_s10  ;;  %2791 = vrot.lane.b32.xlu2 %v6577_v42, %s5985_s10 }
 0x231   : > { %v6590_v45 = vpop.permute.xlu1 %1633 }
 0x232   : > { %v6588_v44 = vpop.permute.xlu0 %1209  ;;  %v1132_v61 = vpop.permute.xlu2 %1131 }
 0x233   : > { %v1146_v48 = vrot.slane %v1132_v61, 4 }
 0x235   : > { %v1153_v50 = vsel %vm326_vm0, %v1145_v47, %v1146_v48  ;;  %v1155_v52 = vsel %vm328_vm8, %v1132_v61, %v1146_v48  ;;  %v1637_v47 = vrot.slane %v6515_v12, 4 }
 0x236   : > { %v1154_v17 = vsel %vm328_vm8, %v1130_v55, %v1153_v50  ;;  %1174 = vst [vmem:[#allocation4 + $0x8] sm:$0xf] %v1155_v52 }
 0x237   : > { %1173 = vst [vmem:[#allocation4] sm:$0xff] %v1154_v17  ;;  %2789 = vrot.lane.b32.xlu1 %v6171_v30, %s5985_s10 }
 0x238   : > { %2751 = vrot.lane.b32.xlu0 %v6164_v24, %s5986_s11  ;;  %1635 = vrot.lane.b32.xlu2 %v6564_v35, %s5983_s8 }
 0x239   : > { %v1268_v40 = vpop.permute.xlu1 %1267 }
 0x23a   : > { %v1200_v41 = vpop.permute.xlu0 %1199  ;;  %v1624_v27 = vpop.permute.xlu2 %1623  ;;  %v1282_v61 = vrot.slane %v1268_v40, 4 }
 0x23b   : > { %v1214_v55 = vrot.slane %v1200_v41, 4  ;;  %v1638_v48 = vrot.slane %v1624_v27, 4 }
 0x23c   : > { %v1289_v50 = vsel %vm326_vm0, %v1281_v5, %v1282_v61 }
 0x23d   : > { %v1221_v30 = vsel %vm326_vm0, %v1213_v28, %v1214_v55  ;;  %v1223_v24 = vsel %vm363_vm9, %v1200_v41, %v1214_v55  ;;  %v1645_v52 = vsel %vm326_vm0, %v1637_v47, %v1638_v48  ;;  %v1647_v17 = vsel %vm581_vm3, %v1624_v27, %v1638_v48 }
 0x23e   : > { %v1222_v9 = vsel %vm363_vm9, %v6483_v46, %v1221_v30  ;;  %1242 = vst [vmem:[#allocation4 + $0x38] sm:$0xf] %v1223_v24  ;;  %v1646_v31 = vsel %vm581_vm3, %v6515_v12, %v1645_v52  ;;  %v1290_v28 = vsel %vm398_vm7, %v6498_v51, %v1289_v50  ;;  %v1291_v41 = vsel %vm398_vm7, %v1268_v40, %v1282_v61  ;;  %v6632_v30 = vld [vmem:[%s6054_s30 + $0x28] sm:$0xff]  ;;  %v6635_v24 = vld [vmem:[%s6054_s30 + $0x3c] sm:$0xff] }
 0x23f   : > { %1666 = vst [vmem:[#allocation4 + $0x188] sm:$0xf] %v1647_v17  ;;  %2753 = vrot.lane.b32.xlu1 %v6551_v26, %s5986_s11  ;;  %v1569_v51 = vrot.slane %v6488_v58, 4  ;;  %v1501_v55 = vrot.slane %v6524_v16, 4 }
 0x240   : > { %1665 = vst [vmem:[#allocation4 + $0x180] sm:$0xff] %v1646_v31  ;;  %2757 = vrot.lane.b32.xlu0 %v6577_v42, %s5986_s11  ;;  %2755 = vrot.lane.b32.xlu2 %v6612_v7, %s5986_s11  ;;  %v1351_v31 = vrot.slane %v6505_v53, 4 }
 0x241   : > { %1241 = vst [vmem:[#allocation4 + $0x30] sm:$0xff] %v1222_v9  ;;  %v1340_v12 = vpop.permute.xlu1 %1339 }
 0x242   : > { %1309 = vst [vmem:[#allocation4 + $0x60] sm:$0xff] %v1290_v28  ;;  %v1556_v46 = vpop.permute.xlu0 %1555  ;;  %v1488_v40 = vpop.permute.xlu2 %1487  ;;  %v1352_v27 = vrot.slane %v1340_v12, 4 }
 0x243   : > { %1310 = vst [vmem:[#allocation4 + $0x68] sm:$0xf] %v1291_v41  ;;  %v1570_v5 = vrot.slane %v1556_v46, 4  ;;  %v1502_v61 = vrot.slane %v1488_v40, 4 }
 0x244   : > { %v1360_v48 = vsel %vm326_vm0, %v1351_v31, %v1352_v27 }
 0x245   : > { %v1577_v9 = vsel %vm326_vm0, %v1569_v51, %v1570_v5  ;;  %v1579_v47 = vsel %vm546_vm1, %v1556_v46, %v1570_v5  ;;  %v1509_v50 = vsel %vm326_vm0, %v1501_v55, %v1502_v61  ;;  %v1511_v52 = vsel %vm511_vm2, %v1488_v40, %v1502_v61 }
 0x246   : > { %v1578_v17 = vsel %vm546_vm1, %v6488_v58, %v1577_v9  ;;  %1598 = vst [vmem:[#allocation4 + $0x158] sm:$0xf] %v1579_v47  ;;  %v1510_v28 = vsel %vm511_vm2, %v6524_v16, %v1509_v50  ;;  %v1361_v41 = vsel %vm433_vm4, %v6505_v53, %v1360_v48  ;;  %v1362_v46 = vsel %vm433_vm4, %v1340_v12, %v1352_v27  ;;  %v6659_v9 = vld [vmem:[%s6054_s30 + $0x44] sm:$0xff]  ;;  %v6662_v47 = vld [vmem:[%s6054_s30 + $0x30] sm:$0xff] }
 0x247   : > { %1530 = vst [vmem:[#allocation4 + $0x128] sm:$0xf] %v1511_v52  ;;  %2709 = vrot.lane.b32.xlu1 %v6632_v30, %s5987_s12  ;;  %v1283_v53 = vrot.slane %v6493_v62, 4  ;;  %v1147_v51 = vrot.slane %v6513_v57, 4  ;;  %v1215_v5 = vrot.slane %v6534_v21, 4 }
 0x248   : > { %1529 = vst [vmem:[#allocation4 + $0x120] sm:$0xff] %v1510_v28  ;;  %2713 = vrot.lane.b32.xlu0 %v6635_v24, %s5987_s12  ;;  %1431 = vrot.lane.b32.xlu2 %v6564_v35, %s5986_s11 }
 0x249   : > { %1597 = vst [vmem:[#allocation4 + $0x150] sm:$0xff] %v1578_v17  ;;  %v1136_v16 = vpop.permute.xlu1 %1135 }
 0x24a   : > { %1379 = vst [vmem:[#allocation4 + $0x9c] sm:$0xff] %v1361_v41  ;;  %v1272_v58 = vpop.permute.xlu0 %1271  ;;  %v1204_v12 = vpop.permute.xlu2 %1203  ;;  %v1148_v40 = vrot.slane %v1136_v16, 4 }
 0x24b   : > { %1380 = vst [vmem:[#allocation4 + $0xa4] sm:$0xf] %v1362_v46  ;;  %v1284_v31 = vrot.slane %v1272_v58, 4  ;;  %v1216_v27 = vrot.slane %v1204_v12, 4  ;;  %v1285_v46 = vrot.slane %v6507_v33, 4 }
 0x24c   : > { %v1156_v35 = vsel %vm326_vm0, %v1147_v51, %v1148_v40  ;;  %v1158_v41 = vsel %vm328_vm8, %v1136_v16, %v1148_v40  ;;  %v1571_v51 = vrot.slane %v6546_v0, 4 }
 0x24d   : > { %v1292_v55 = vsel %vm326_vm0, %v1283_v53, %v1284_v31  ;;  %v1294_v61 = vsel %vm398_vm7, %v1272_v58, %v1284_v31  ;;  %v1224_v48 = vsel %vm326_vm0, %v1215_v5, %v1216_v27  ;;  %v1226_v50 = vsel %vm363_vm9, %v1204_v12, %v1216_v27  ;;  %1176 = vst [vmem:[#allocation4 + $0x14] sm:$0xf] %v1158_v41 }
 0x24e   : > { %v1293_v52 = vsel %vm398_vm7, %v6493_v62, %v1292_v55  ;;  %1312 = vst [vmem:[#allocation4 + $0x74] sm:$0xf] %v1294_v61  ;;  %v1225_v17 = vsel %vm363_vm9, %v6534_v21, %v1224_v48  ;;  %v1157_v28 = vsel %vm328_vm8, %v6513_v57, %v1156_v35  ;;  %v1639_v57 = vrot.slane %v6522_v3, 4 }
 0x24f   : > { %1244 = vst [vmem:[#allocation4 + $0x44] sm:$0xf] %v1226_v50  ;;  %2715 = vrot.lane.b32.xlu1 %v6659_v9, %s5987_s12 }
 0x250   : > { %1243 = vst [vmem:[#allocation4 + $0x3c] sm:$0xff] %v1225_v17  ;;  %2677 = vrot.lane.b32.xlu0 %v6662_v47, %s5988_s13  ;;  %2711 = vrot.lane.b32.xlu2 %v6662_v47, %s5987_s12 }
 0x251   : > { %1311 = vst [vmem:[#allocation4 + $0x6c] sm:$0xff] %v1293_v52  ;;  %v1628_v21 = vpop.permute.xlu1 %1627  ;;  %v1353_v52 = vrot.slane %v6500_v49, 4 }
 0x252   : > { %1175 = vst [vmem:[#allocation4 + $0xc] sm:$0xff] %v1157_v28  ;;  %v1276_v62 = vpop.permute.xlu0 %1275  ;;  %v1560_v58 = vpop.permute.xlu2 %1559  ;;  %v1640_v53 = vrot.slane %v1628_v21, 4 }
 0x253   : > { %v1286_v16 = vrot.slane %v1276_v62, 4  ;;  %v1572_v12 = vrot.slane %v1560_v58, 4 }
 0x254   : > { %v1648_v5 = vsel %vm326_vm0, %v1639_v57, %v1640_v53  ;;  %v1650_v50 = vsel %vm581_vm3, %v1628_v21, %v1640_v53 }
 0x255   : > { %v1295_v31 = vsel %vm326_vm0, %v1285_v46, %v1286_v16  ;;  %v1297_v40 = vsel %vm398_vm7, %v1276_v62, %v1286_v16  ;;  %v1580_v27 = vsel %vm326_vm0, %v1571_v51, %v1572_v12  ;;  %v1582_v55 = vsel %vm546_vm1, %v1560_v58, %v1572_v12  ;;  %1668 = vst [vmem:[#allocation4 + $0x194] sm:$0xf] %v1650_v50 }
 0x256   : > { %v1296_v61 = vsel %vm398_vm7, %v6507_v33, %v1295_v31  ;;  %1314 = vst [vmem:[#allocation4 + $0x80] sm:$0xf] %v1297_v40  ;;  %v1581_v35 = vsel %vm546_vm1, %v6546_v0, %v1580_v27  ;;  %v1649_v48 = vsel %vm581_vm3, %v6522_v3, %v1648_v5  ;;  %v1641_v3 = vrot.slane %v6517_v54, 4 }
 0x257   : > { %1600 = vst [vmem:[#allocation4 + $0x164] sm:$0xf] %v1582_v55  ;;  %2679 = vrot.lane.b32.xlu1 %v6635_v24, %s5988_s13  ;;  %v1217_v62 = vrot.slane %v6560_v39, 4  ;;  %v1355_v5 = vrot.slane %v6526_v56, 4 }
 0x258   : > { %1599 = vst [vmem:[#allocation4 + $0x15c] sm:$0xff] %v1581_v35  ;;  %2641 = vrot.lane.b32.xlu0 %v6632_v30, %s5989_s14  ;;  %2675 = vrot.lane.b32.xlu2 %v6632_v30, %s5988_s13  ;;  %v1287_v35 = vrot.slane %v6574_v37, 4 }
 0x259   : > { %1313 = vst [vmem:[#allocation4 + $0x78] sm:$0xff] %v1296_v61  ;;  %v1344_v0 = vpop.permute.xlu1 %1343 }
 0x25a   : > { %1667 = vst [vmem:[#allocation4 + $0x18c] sm:$0xff] %v1649_v48  ;;  %v1632_v33 = vpop.permute.xlu0 %1631  ;;  %v1208_v17 = vpop.permute.xlu2 %1207  ;;  %v1354_v41 = vrot.slane %v1344_v0, 4 }
 0x25b   : > { %v1642_v28 = vrot.slane %v1632_v33, 4  ;;  %v1218_v21 = vrot.slane %v1208_v17, 4 }
 0x25c   : > { %v1363_v58 = vsel %vm326_vm0, %v1353_v52, %v1354_v41  ;;  %v1365_v40 = vsel %vm433_vm4, %v1344_v0, %v1354_v41 }
 0x25d   : > { %v1651_v46 = vsel %vm326_vm0, %v1641_v3, %v1642_v28  ;;  %v1653_v57 = vsel %vm581_vm3, %v1632_v33, %v1642_v28  ;;  %v1227_v16 = vsel %vm326_vm0, %v1217_v62, %v1218_v21  ;;  %v1229_v53 = vsel %vm363_vm9, %v1208_v17, %v1218_v21  ;;  %1382 = vst [vmem:[#allocation4 + $0xb0] sm:$0xf] %v1365_v40 }
 0x25e   : > { %v1652_v51 = vsel %vm581_vm3, %v6517_v54, %v1651_v46  ;;  %1670 = vst [vmem:[#allocation4 + $0x1a0] sm:$0xf] %v1653_v57  ;;  %v1228_v12 = vsel %vm363_vm9, %v6560_v39, %v1227_v16  ;;  %v1364_v31 = vsel %vm433_vm4, %v6500_v49, %v1363_v58  ;;  %v1149_v49 = vrot.slane %v6544_v25, 4 }
 0x25f   : > { %1246 = vst [vmem:[#allocation4 + $0x50] sm:$0xf] %v1229_v53  ;;  %2643 = vrot.lane.b32.xlu1 %v6662_v47, %s5989_s14  ;;  %v1573_v21 = vrot.slane %v6558_v38, 4 }
 0x260   : > { %1245 = vst [vmem:[#allocation4 + $0x48] sm:$0xff] %v1228_v12  ;;  %2647 = vrot.lane.b32.xlu0 %v6659_v9, %s5989_s14  ;;  %2681 = vrot.lane.b32.xlu2 %v6659_v9, %s5988_s13 }
 0x261   : > { %1669 = vst [vmem:[#allocation4 + $0x198] sm:$0xff] %v1652_v51  ;;  %v1140_v39 = vpop.permute.xlu1 %1139 }
 0x262   : > { %1381 = vst [vmem:[#allocation4 + $0xa8] sm:$0xff] %v1364_v31  ;;  %v1348_v54 = vpop.permute.xlu0 %1347  ;;  %v1280_v27 = vpop.permute.xlu2 %1279  ;;  %v1150_v61 = vrot.slane %v1140_v39, 4 }
 0x263   : > { %v1356_v55 = vrot.slane %v1348_v54, 4  ;;  %v1288_v48 = vrot.slane %v1280_v27, 4 }
 0x264   : > { %v1159_v0 = vsel %vm326_vm0, %v1149_v49, %v1150_v61  ;;  %v1161_v62 = vsel %vm328_vm8, %v1140_v39, %v1150_v61  ;;  %v1505_v49 = vrot.slane %v6572_v18, 4 }
 0x265   : > { %v1366_v50 = vsel %vm326_vm0, %v1355_v5, %v1356_v55  ;;  %v1368_v33 = vsel %vm433_vm4, %v1348_v54, %v1356_v55  ;;  %v1298_v52 = vsel %vm326_vm0, %v1287_v35, %v1288_v48  ;;  %v1300_v3 = vsel %vm398_vm7, %v1280_v27, %v1288_v48  ;;  %1178 = vst [vmem:[#allocation4 + $0x20] sm:$0xf] %v1161_v62  ;;  %v5754_v5 = vld [vmem:[#allocation4 + $0x98] sm:$0xf0]  ;;  %v5090_v55 = vld [vmem:[#allocation4 + $0x90] sm:$0xf] }
 0x266   : > { %v1367_v17 = vsel %vm433_vm4, %v6526_v56, %v1366_v50  ;;  %1384 = vst [vmem:[#allocation4 + $0xbc] sm:$0xf] %v1368_v33  ;;  %v1299_v28 = vsel %vm398_vm7, %v6574_v37, %v1298_v52  ;;  %v1160_v41 = vsel %vm328_vm8, %v6544_v25, %v1159_v0  ;;  %v5091_v35 = vor.u32 %v5754_v5, %v5090_v55  ;;  %v5274_v50 = vld [vmem:[%s6054_s30 + $0x2c] sm:$0xff]  ;;  %v5078_v33 = vld [vmem:[#allocation4 + $0x78] sm:$0xf] }
 0x267   : > { %1316 = vst [vmem:[#allocation4 + $0x8c] sm:$0xf] %v1300_v3  ;;  %2607 = vrot.lane.b32.xlu1 %v6632_v30, %s5990_s15  ;;  %v5054_v55 = vld [vmem:[#allocation4 + $0x48] sm:$0xf] }
 0x268   : > { %1315 = vst [vmem:[#allocation4 + $0x84] sm:$0xff] %v1299_v28  ;;  %2611 = vrot.lane.b32.xlu0 %v6635_v24, %s5990_s15  ;;  %2645 = vrot.lane.b32.xlu2 %v6635_v24, %s5989_s14  ;;  %v1151_v28 = vrot.slane %v6536_v22, 4 }
 0x269   : > { %1383 = vst [vmem:[#allocation4 + $0xb4] sm:$0xff] %v1367_v17  ;;  %v1564_v37 = vpop.permute.xlu1 %1563  ;;  %v5102_v31 = vld [vmem:[#allocation4 + $0xa8] sm:$0xf]  ;;  %v5748_v17 = vld [vmem:[#allocation4 + $0x68] sm:$0xf0] }
 0x26a   : > { %1177 = vst [vmem:[#allocation4 + $0x18] sm:$0xff] %v1160_v41  ;;  %v1428_v56 = vpop.permute.xlu0 %1427  ;;  %v1426_v25 = vpop.permute.xlu2 %1425  ;;  %v1574_v57 = vrot.slane %v1564_v37, 4  ;;  %v1219_v41 = vrot.slane %v6588_v44, 4 }
 0x26b   : > { %v1438_v46 = vrot.slane %v1428_v56, 4  ;;  %v1437_v58 = vrot.slane %v1426_v25, 4 }
 0x26c   : > { %v1583_v30 = vsel %vm326_vm0, %v1573_v21, %v1574_v57  ;;  %v1585_v51 = vsel %vm546_vm1, %v1564_v37, %v1574_v57  ;;  %v5066_v21 = vld [vmem:[#allocation4 + $0x60] sm:$0xf] }
 0x26d   : > { %v1449_v16 = vsel %vm476_vm6, %v1428_v56, %v1438_v46  ;;  %v1447_v53 = vsel %vm326_vm0, %v1437_v58, %v1438_v46  ;;  %v1584_v24 = vsel %vm546_vm1, %v6558_v38, %v1583_v30  ;;  %1602 = vst [vmem:[#allocation4 + $0x170] sm:$0xf] %v1585_v51  ;;  %v5067_v57 = vor.u32 %v5748_v17, %v5066_v21 }
 0x26e   : > { %1466 = vst [vmem:[#allocation4 + $0x110] sm:$0xf] %v1449_v16  ;;  %v1448_v12 = vsel %vm476_vm6, %v1426_v25, %v1447_v53 }
 0x26f   : > { %1601 = vst [vmem:[#allocation4 + $0x168] sm:$0xff] %v1584_v24  ;;  %2613 = vrot.lane.b32.xlu1 %v6659_v9, %s5990_s15 }
 0x270   : > { %1465 = vst [vmem:[#allocation4 + $0x108] sm:$0xff] %v1448_v12  ;;  %v5757_v40 = vld [vmem:[#allocation4 + $0xb0] sm:$0xf0]  ;;  %2855 = vrot.lane.b32.xlu0 %v6551_v26, %s5983_s8  ;;  %2609 = vrot.lane.b32.xlu2 %v6662_v47, %s5990_s15  ;;  %v5751_v47 = vld [vmem:[#allocation4 + $0x80] sm:$0xf0]  ;;  %v1503_v12 = vrot.slane %v6532_v19, 4 }
 0x271   : > { %v5103_v54 = vor.u32 %v5757_v40, %v5102_v31  ;;  %v1496_v39 = vpop.permute.xlu1 %1495  ;;  %v5079_v0 = vor.u32 %v5751_v47, %v5078_v33  ;;  %v5742_v47 = vld [vmem:[#allocation4 + $0x38] sm:$0xf0]  ;;  %v5042_v33 = vld [vmem:[#allocation4 + $0x30] sm:$0xf] }
 0x272   : > { %v6756_v38 = vpop.permute.xlu0 %1417  ;;  %v1422_v27 = vpop.permute.xlu2 %1421  ;;  %v1506_v9 = vrot.slane %v1496_v39, 4 }
 0x273   : > { %2078 = vmatpush.bf16.msrb.mxu0 %v5103_v54  ;;  %v1435_v31 = vrot.slane %v1422_v27, 4  ;;  %v1433_v21 = vrot.slane %v6756_v38, 4 }
 0x274   : > { %v1515_v61 = vsel %vm326_vm0, %v1505_v49, %v1506_v9  ;;  %v1517_v26 = vsel %vm511_vm2, %v1496_v39, %v1506_v9 }
 0x275   : > { %v1516_v48 = vsel %vm511_vm2, %v6572_v18, %v1515_v61  ;;  %1534 = vst [vmem:[#allocation4 + $0x140] sm:$0xf] %v1517_v26 }
 0x276   : > { %1533 = vst [vmem:[#allocation4 + $0x138] sm:$0xff] %v1516_v48 }
 0x277   : > { %2079 = vmatpush.bf16.msrb.mxu0 %v5091_v35  ;;  %2857 = vrot.lane.b32.xlu1 %v6612_v7, %s5983_s8 }
 0x278   : > { %2853 = vrot.lane.b32.xlu2 %v5274_v50, %s5983_s8 }
 0x279   : > { %v1212_v3 = vpop.permute.xlu1 %1211 }
 0x27a   : > { %v1144_v52 = vpop.permute.xlu0 %1143  ;;  %v6769_v18 = vpop.permute.xlu2 %2821  ;;  %v1220_v56 = vrot.slane %v1212_v3, 4 }
 0x27b   : > { %2080 = vmatpush.bf16.msrb.mxu0 %v5079_v0  ;;  %v1152_v62 = vrot.slane %v1144_v52, 4  ;;  %v2828_v37 = vrot.slane %v6769_v18, 4 }
 0x27c   : > { %v1230_v46 = vsel %vm326_vm0, %v1219_v41, %v1220_v56  ;;  %v1232_v53 = vsel %vm363_vm9, %v1212_v3, %v1220_v56  ;;  %v5030_v3 = vld [vmem:[#allocation4 + $0x18] sm:$0xf] }
 0x27d   : > { %v1162_v7 = vsel %vm326_vm0, %v1151_v28, %v1152_v62  ;;  %v1164_v25 = vsel %vm328_vm8, %v1144_v52, %v1152_v62  ;;  %v2833_v58 = vsel %vm546_vm1, %v6769_v18, %v2828_v37  ;;  %v1231_v30 = vsel %vm363_vm9, %v6588_v44, %v1230_v46  ;;  %1248 = vst [vmem:[#allocation4 + $0x5c] sm:$0xf] %v1232_v53  ;;  %v5736_v62 = vld [vmem:[#allocation4 + $0x8] sm:$0xf0]  ;;  %v4994_v56 = vld [vmem:[%s8096_s3] sm:$0xf] }
 0x27e   : > { %v1163_v16 = vsel %vm328_vm8, %v6536_v22, %v1162_v7  ;;  %1180 = vst [vmem:[#allocation4 + $0x2c] sm:$0xf] %v1164_v25  ;;  %v5018_v53 = vld [vmem:[#allocation4] sm:$0xf] }
 0x27f   : > { %2842 = vst [vmem:[#allocation3 + $0xb0] sm:$0xf] %v2833_v58  ;;  %2081 = vmatpush.bf16.msrb.mxu0 %v5067_v57  ;;  %v5730_v58 = vld [vmem:[%s8096_s3 + $0x8] sm:$0xf0]  ;;  %v5210_v18 = vld [vmem:[#allocation4 + $0x180] sm:$0xf] }
 0x280   : > { %1179 = vst [vmem:[#allocation4 + $0x24] sm:$0xff] %v1163_v16  ;;  %2859 = vrot.lane.b32.xlu2 %v6577_v42, %s5983_s8  ;;  %v1643_v16 = vrot.slane %v6590_v45, 4 }
 0x281   : > { %1247 = vst [vmem:[#allocation4 + $0x54] sm:$0xff] %v1231_v30  ;;  %v1492_v51 = vpop.permute.xlu1 %1491 }
 0x282   : > { %v1424_v24 = vpop.permute.xlu0 %1423  ;;  %v2786_v22 = vpop.permute.xlu2 %2785  ;;  %v1504_v54 = vrot.slane %v1492_v51, 4 }
 0x283   : > { %v1436_v40 = vrot.slane %v1424_v24, 4  ;;  %v2793_v7 = vrot.slane %v2786_v22, 4 }
 0x284   : > { %v1512_v5 = vsel %vm326_vm0, %v1503_v12, %v1504_v54  ;;  %v1514_v9 = vsel %vm511_vm2, %v1492_v51, %v1504_v54 }
 0x285   : > { %v1444_v44 = vsel %vm326_vm0, %v1435_v31, %v1436_v40  ;;  %v1446_v39 = vsel %vm476_vm6, %v1424_v24, %v1436_v40  ;;  %v1513_v42 = vsel %vm511_vm2, %v6532_v19, %v1512_v5  ;;  %1532 = vst [vmem:[#allocation4 + $0x134] sm:$0xf] %v1514_v9  ;;  %v5043_v19 = vor.u32 %v5742_v47, %v5042_v33 }
 0x286   : > { %v1445_v49 = vsel %vm476_vm6, %v1422_v27, %v1444_v44  ;;  %1464 = vst [vmem:[#allocation4 + $0x104] sm:$0xf] %v1446_v39  ;;  %v5019_v31 = vor.u32 %v5736_v62, %v5018_v53  ;;  %v6819_v39 = vor.u32 %v5730_v58, %v4994_v56  ;;  %v5733_v58 = vld [vmem:[%s8096_s3 + $0x20] sm:$0xf0] }
 0x287   : > { %1463 = vst [vmem:[#allocation4 + $0xfc] sm:$0xff] %v1445_v49  ;;  %v5739_v52 = vld [vmem:[#allocation4 + $0x20] sm:$0xf0] }
 0x288   : > { %1531 = vst [vmem:[#allocation4 + $0x12c] sm:$0xff] %v1513_v42  ;;  %v5745_v61 = vld [vmem:[#allocation4 + $0x50] sm:$0xf0]  ;;  %v5031_v17 = vor.u32 %v5739_v52, %v5030_v3  ;;  %v5222_v52 = vld [vmem:[#allocation4 + $0x198] sm:$0xf] }
 0x289   : > { %v5055_v26 = vor.u32 %v5745_v61, %v5054_v55  ;;  %v6796_v48 = vpop.permute.xlu1 %1429  ;;  %v5786_v3 = vld [vmem:[#allocation4 + $0x19c] sm:$0xf] }
 0x28a   : > { %v6794_v35 = vpop.permute.xlu0 %2823  ;;  %v6798_v50 = vpop.permute.xlu2 %2791 }
 0x28b   : > { %2082 = vmatpush.bf16.msrb.mxu0 %v5055_v26  ;;  %v2796_v27 = vrot.slane %v6798_v50, 4 }
 0x28d   : > { %v2802_v0 = vsel %vm511_vm2, %v6798_v50, %v2796_v27 }
 0x28e   : > { %2810 = vst [vmem:[#allocation3 + $0xa4] sm:$0xf] %v2802_v0 }
 0x28f   : > { %2083 = vmatpush.bf16.msrb.mxu0 %v5043_v19 }
 0x291   : > { %v1420_v41 = vpop.permute.xlu1 %1419 }
 0x292   : > { %v2788_v28 = vpop.permute.xlu0 %2787  ;;  %v1636_v25 = vpop.permute.xlu2 %1635  ;;  %v1434_v57 = vrot.slane %v1420_v41, 4 }
 0x293   : > { %2084 = vmatpush.bf16.msrb.mxu0 %v5031_v17  ;;  %v2794_v46 = vrot.slane %v2788_v28, 4  ;;  %v1644_v30 = vrot.slane %v1636_v25, 4 }
 0x294   : > { %v1441_v12 = vsel %vm326_vm0, %v1433_v21, %v1434_v57  ;;  %v1443_v42 = vsel %vm476_vm6, %v1420_v41, %v1434_v57  ;;  %v1507_v41 = vrot.slane %v6562_v32, 4  ;;  %v5784_v21 = vld [vmem:[#allocation4 + $0x188] sm:$0xf0]  ;;  %v5006_v57 = vld [vmem:[%s8096_s3 + $0x18] sm:$0xf] }
 0x295   : > { %v2797_v24 = vsel %vm326_vm0, %v2793_v7, %v2794_v46  ;;  %v2799_v51 = vsel %vm511_vm2, %v2788_v28, %v2794_v46  ;;  %v1654_v40 = vsel %vm326_vm0, %v1643_v16, %v1644_v30  ;;  %v1656_v54 = vsel %vm581_vm3, %v1636_v25, %v1644_v30  ;;  %1462 = vst [vmem:[#allocation4 + $0xf8] sm:$0xf] %v1443_v42  ;;  %v5212_v7 = vld [vmem:[#allocation4 + $0x18c] sm:$0xf0]  ;;  %v5783_v46 = vld [vmem:[#allocation4 + $0x184] sm:$0xf] }
 0x296   : > { %v2798_v44 = vsel %vm511_vm2, %v2786_v22, %v2797_v24  ;;  %2808 = vst [vmem:[#allocation3 + $0x98] sm:$0xf] %v2799_v51  ;;  %v1655_v5 = vsel %vm581_vm3, %v6590_v45, %v1654_v40  ;;  %v1442_v49 = vsel %vm476_vm6, %v6756_v38, %v1441_v12  ;;  %v1575_v22 = vrot.slane %v6548_v1, 4  ;;  %v5110_v12 = vld [vmem:[#allocation4 + $0xb0] sm:$0xf] }
 0x297   : > { %1672 = vst [vmem:[#allocation4 + $0x1ac] sm:$0xf] %v1656_v54  ;;  %2085 = vmatpush.bf16.msrb.mxu0 %v5019_v31  ;;  %v2829_v16 = vrot.slane %v6794_v35, 4  ;;  %v5211_v51 = vor.u32 %v5784_v21, %v5210_v18  ;;  %v1439_v31 = vrot.slane %v6796_v48, 4  ;;  %v5215_v54 = vor.u32 %v5783_v46, %v5212_v7 }
 0x298   : > { %1671 = vst [vmem:[#allocation4 + $0x1a4] sm:$0xff] %v1655_v5  ;;  %v5198_v5 = vld [vmem:[#allocation4 + $0x168] sm:$0xf] }
 0x299   : > { %2807 = vst [vmem:[#allocation3 + $0x90] sm:$0xff] %v2798_v44  ;;  %v2820_v55 = vpop.permute.xlu1 %2819 }
 0x29a   : > { %1461 = vst [vmem:[#allocation4 + $0xf0] sm:$0xff] %v1442_v49  ;;  %v1568_v9 = vpop.permute.xlu0 %1567  ;;  %2086 = vmatmul.bf16.vlgmr.msrb.gmra.mxu0 %v6819_v39  ;;  %v6828_v61 = vpop.permute.xlu2 %2755  ;;  %v2827_v26 = vrot.slane %v2820_v55, 4 }
 0x29b   : > { %v1576_v45 = vrot.slane %v1568_v9, 4 }
 0x29c   : > { %v2831_v33 = vsel %vm326_vm0, %v2827_v26, %v2828_v37  ;;  %v5758_v37 = vld [vmem:[#allocation4 + $0xb8] sm:$0xf0]  ;;  %v5731_v26 = vld [vmem:[%s8096_s3 + $0x10] sm:$0xf0] }
 0x29d   : > { %v1586_v47 = vsel %vm326_vm0, %v1575_v22, %v1576_v45  ;;  %v1588_v38 = vsel %vm546_vm1, %v1568_v9, %v1576_v45  ;;  %v2832_v0 = vsel %vm546_vm1, %v2820_v55, %v2831_v33  ;;  %v5111_v44 = vor.u32 %v5758_v37, %v5110_v12  ;;  %v5780_v55 = vld [vmem:[#allocation4 + $0x16c] sm:$0xf]  ;;  %v5002_v45 = vld [vmem:[%s8096_s3 + $0x8] sm:$0xf]  ;;  %v5186_v37 = vld [vmem:[#allocation4 + $0x150] sm:$0xf] }
 0x29e   : > { %v1587_v19 = vsel %vm546_vm1, %v6548_v1, %v1586_v47  ;;  %1604 = vst [vmem:[#allocation4 + $0x17c] sm:$0xf] %v1588_v38  ;;  %v6850_v22 = vor.u32 %v5733_v58, %v5006_v57  ;;  %v6867_v21 = vor.u32 %v5731_v26, %v5002_v45  ;;  %v5752_v58 = vld [vmem:[#allocation4 + $0x88] sm:$0xf0] }
 0x29f   : > { %1603 = vst [vmem:[#allocation4 + $0x174] sm:$0xff] %v1587_v19  ;;  %v5787_v17 = vld [vmem:[#allocation4 + $0x1a0] sm:$0xf0]  ;;  %v5224_v28 = vld [vmem:[#allocation4 + $0x1a4] sm:$0xf0] }
 0x2a0   : > { %2841 = vst [vmem:[#allocation3 + $0xa8] sm:$0xff] %v2832_v0  ;;  %v5223_v62 = vor.u32 %v5787_v17, %v5222_v52  ;;  %v5227_v56 = vor.u32 %v5786_v3, %v5224_v28 }
 0x2a1   : > { %v2826_v25 = vpop.permute.xlu1 %2825 }
 0x2a2   : > { %2122 = vmatpush.bf16.msra.mxu0 %v5223_v62  ;;  %2179 = vmatpush.bf16.msra.mxu3 %v5227_v56  ;;  %v1500_v1 = vpop.permute.xlu0 %1499  ;;  %v1432_v30 = vpop.permute.xlu2 %1431  ;;  %v2830_v24 = vrot.slane %v2826_v25, 4  ;;  %v5188_v56 = vld [vmem:[#allocation4 + $0x15c] sm:$0xf0] }
 0x2a3   : > { %v1508_v53 = vrot.slane %v1500_v1, 4  ;;  %v1440_v40 = vrot.slane %v1432_v30, 4 }
 0x2a4   : > { %v2834_v9 = vsel %vm326_vm0, %v2829_v16, %v2830_v24  ;;  %v2836_v62 = vsel %vm546_vm1, %v2826_v25, %v2830_v24  ;;  %v5086_v24 = vld [vmem:[#allocation4 + $0x80] sm:$0xf] }
 0x2a5   : > { %v1518_v49 = vsel %vm326_vm0, %v1507_v41, %v1508_v53  ;;  %v1520_v42 = vsel %vm511_vm2, %v1500_v1, %v1508_v53  ;;  %v1450_v47 = vsel %vm326_vm0, %v1439_v31, %v1440_v40  ;;  %v1452_v38 = vsel %vm476_vm6, %v1432_v30, %v1440_v40  ;;  %v5755_v41 = vld [vmem:[#allocation4 + $0xa0] sm:$0xf0]  ;;  %v5777_v1 = vld [vmem:[#allocation4 + $0x154] sm:$0xf]  ;;  %2844 = vst [vmem:[#allocation3 + $0xbc] sm:$0xf] %v2836_v62 }
 0x2a6   : > { %v1519_v33 = vsel %vm511_vm2, %v6562_v32, %v1518_v49  ;;  %1536 = vst [vmem:[#allocation4 + $0x14c] sm:$0xf] %v1520_v42  ;;  %v2835_v19 = vsel %vm546_vm1, %v6794_v35, %v2834_v9  ;;  %v5781_v0 = vld [vmem:[#allocation4 + $0x170] sm:$0xf0]  ;;  %v5200_v52 = vld [vmem:[#allocation4 + $0x174] sm:$0xf0]  ;;  %v1451_v3 = vsel %vm476_vm6, %v6796_v48, %v1450_v47  ;;  %2123 = vmatpush.bf16.msra.mxu0 %v5211_v51 }
 0x2a7   : > { %1468 = vst [vmem:[#allocation4 + $0x11c] sm:$0xf] %v1452_v38  ;;  %2180 = vmatpush.bf16.msra.mxu3 %v5215_v54  ;;  %v5199_v17 = vor.u32 %v5781_v0, %v5198_v5  ;;  %v5203_v28 = vor.u32 %v5780_v55, %v5200_v52  ;;  %v5778_v32 = vld [vmem:[#allocation4 + $0x158] sm:$0xf0]  ;;  %v5098_v35 = vld [vmem:[#allocation4 + $0x98] sm:$0xf]  ;;  %v5191_v57 = vor.u32 %v5777_v1, %v5188_v56 }
 0x2a8   : > { %1467 = vst [vmem:[#allocation4 + $0x114] sm:$0xff] %v1451_v3  ;;  %v5099_v18 = vor.u32 %v5755_v41, %v5098_v35  ;;  %v5187_v46 = vor.u32 %v5778_v32, %v5186_v37  ;;  %v5087_v12 = vor.u32 %v5752_v58, %v5086_v24  ;;  %v5174_v31 = vld [vmem:[#allocation4 + $0x138] sm:$0xf]  ;;  %v5749_v40 = vld [vmem:[#allocation4 + $0x70] sm:$0xf0]  ;;  %v2761_v3 = vrot.slane %v6828_v61, 4 }
 0x2a9   : > { %1535 = vst [vmem:[#allocation4 + $0x144] sm:$0xff] %v1519_v33  ;;  %2097 = vmatpush.bf16.msrb.mxu2 %v5199_v17  ;;  %2154 = vmatpush.bf16.msra.mxu1 %v5203_v28  ;;  %v2790_v7 = vpop.permute.xlu1 %2789  ;;  %v5074_v5 = vld [vmem:[#allocation4 + $0x68] sm:$0xf]  ;;  %v5772_v49 = vld [vmem:[#allocation4 + $0x128] sm:$0xf0] }
 0x2aa   : > { %2192 = vmatpush.bf16.msrb.mxu0 %v5111_v44  ;;  %2843 = vst [vmem:[#allocation3 + $0xb4] sm:$0xff] %v2835_v19  ;;  %v6869_v48 = vpop.permute.xlu0 %2751  ;;  %5234 = vmatmul.msk.bf16.vlgmr.msra.gmra.mxu3 %vm2071_vm10, %v6867_v21  ;;  %v2795_v25 = vrot.slane %v2790_v7, 4  ;;  %v6874_v16 = vpop.permute.xlu2 %2711  ;;  %v5774_v44 = vld [vmem:[#allocation4 + $0x13c] sm:$0xf]  ;;  %v5396_v45 = vld [vmem:[#allocation3 + $0xa8] sm:$0xf]  ;;  %v5075_v33 = vor.u32 %v5749_v40, %v5074_v5 }
 0x2ab   : > { %2091 = vmatmul.bf16.gmra.mxu0 %v6850_v22  ;;  %v2718_v30 = vrot.slane %v6874_v16, 4  ;;  %v2759_v42 = vrot.slane %v6869_v48, 4  ;;  %v5162_v0 = vld [vmem:[#allocation4 + $0x120] sm:$0xf]  ;;  %v5164_v52 = vld [vmem:[#allocation4 + $0x12c] sm:$0xf0] }
 0x2ac   : > { %v2800_v53 = vsel %vm326_vm0, %v2795_v25, %v2796_v27  ;;  %v5746_v41 = vld [vmem:[#allocation4 + $0x58] sm:$0xf0]  ;;  %v5163_v32 = vor.u32 %v5772_v49, %v5162_v0  ;;  %v5771_v56 = vld [vmem:[#allocation4 + $0x124] sm:$0xf]  ;;  %v5062_v35 = vld [vmem:[#allocation4 + $0x50] sm:$0xf] }
 0x2ad   : > { %2098 = vmatpush.bf16.msrb.mxu2 %v5187_v46  ;;  %2155 = vmatpush.bf16.msra.mxu1 %v5191_v57  ;;  %v2801_v51 = vsel %vm511_vm2, %v2790_v7, %v2800_v53  ;;  %v2723_v54 = vsel %vm433_vm4, %v6874_v16, %v2718_v30  ;;  %v5167_v25 = vor.u32 %v5771_v56, %v5164_v52  ;;  %v5014_v57 = vld [vmem:[%s8096_s3 + $0x20] sm:$0xf]  ;;  %v5734_v58 = vld [vmem:[%s8096_s3 + $0x28] sm:$0xf0]  ;;  %v5150_v5 = vld [vmem:[#allocation4 + $0x108] sm:$0xf] }
 0x2ae   : > { %2193 = vmatpush.bf16.msrb.mxu0 %v5099_v18  ;;  %2809 = vst [vmem:[#allocation3 + $0x9c] sm:$0xff] %v2801_v51  ;;  %v5384_v18 = vld [vmem:[#allocation3 + $0x90] sm:$0xf]  ;;  %v5768_v49 = vld [vmem:[#allocation4 + $0x10c] sm:$0xf] }
 0x2af   : > { %2732 = vst [vmem:[#allocation3 + $0x50] sm:$0xf] %v2723_v54  ;;  %v5769_v46 = vld [vmem:[#allocation4 + $0x110] sm:$0xf0]  ;;  %v5140_v0 = vld [vmem:[#allocation4 + $0xfc] sm:$0xf0] }
 0x2b0   : > { %v5775_v50 = vld [vmem:[#allocation4 + $0x140] sm:$0xf0]  ;;  %v5176_v27 = vld [vmem:[#allocation4 + $0x144] sm:$0xf0] }
 0x2b1   : > { %v5175_v9 = vor.u32 %v5775_v50, %v5174_v31  ;;  %v5179_v55 = vor.u32 %v5774_v44, %v5176_v27  ;;  %v5819_v26 = vld [vmem:[#allocation3 + $0xb0] sm:$0xf0]  ;;  %v2754_v19 = vpop.permute.xlu1 %2753  ;;  %v5152_v31 = vld [vmem:[#allocation4 + $0x114] sm:$0xf0]  ;;  %v5743_v44 = vld [vmem:[#allocation4 + $0x40] sm:$0xf0]  ;;  %v6903_v50 = vor.u32 %v5734_v58, %v5014_v57 }
 0x2b2   : > { %2194 = vmatpush.bf16.msrb.mxu0 %v5087_v12  ;;  %v5397_v47 = vor.u32 %v5819_v26, %v5396_v45  ;;  %v2758_v38 = vpop.permute.xlu0 %2757  ;;  %v2760_v28 = vrot.slane %v2754_v19, 4  ;;  %v6887_v62 = vpop.permute.xlu2 %2675  ;;  %v5063_v12 = vor.u32 %v5746_v41, %v5062_v35  ;;  %v5155_v27 = vor.u32 %v5768_v49, %v5152_v31  ;;  %v5765_v45 = vld [vmem:[#allocation4 + $0xf4] sm:$0xf]  ;;  %v5038_v41 = vld [vmem:[#allocation4 + $0x20] sm:$0xf] }
 0x2b3   : > { %2099 = vmatpush.bf16.msrb.mxu2 %v5175_v9  ;;  %2156 = vmatpush.bf16.msra.mxu1 %v5179_v55  ;;  %v2762_v17 = vrot.slane %v2758_v38, 4  ;;  %v5138_v55 = vld [vmem:[#allocation4 + $0xf0] sm:$0xf]  ;;  %v5126_v35 = vld [vmem:[#allocation4 + $0xd8] sm:$0xf] }
 0x2b4   : > { %3115 = vmatpush.bf16.msrb.mxu3 %v5397_v47  ;;  %v2763_v1 = vsel %vm326_vm0, %v2759_v42, %v2760_v28  ;;  %v2765_v51 = vsel %vm476_vm6, %v2754_v19, %v2760_v28  ;;  %v5766_v19 = vld [vmem:[#allocation4 + $0xf8] sm:$0xf0]  ;;  %v5143_v28 = vor.u32 %v5765_v45, %v5140_v0  ;;  %v5760_v57 = vld [vmem:[#allocation4 + $0xc8] sm:$0xf0]  ;;  %v5116_v58 = vld [vmem:[#allocation4 + $0xcc] sm:$0xf0] }
 0x2b5   : > { %v2766_v7 = vsel %vm326_vm0, %v2761_v3, %v2762_v17  ;;  %v2768_v37 = vsel %vm476_vm6, %v2758_v38, %v2762_v17  ;;  %v2764_v24 = vsel %vm476_vm6, %v6869_v48, %v2763_v1  ;;  %v5816_v40 = vld [vmem:[#allocation3 + $0x98] sm:$0xf0]  ;;  %2774 = vst [vmem:[#allocation3 + $0x80] sm:$0xf] %v2765_v51  ;;  %v5050_v48 = vld [vmem:[#allocation4 + $0x38] sm:$0xf]  ;;  %v5139_v17 = vor.u32 %v5766_v19, %v5138_v55 }
 0x2b6   : > { %2195 = vmatpush.bf16.msrb.mxu0 %v5075_v33  ;;  %v2767_v53 = vsel %vm476_vm6, %v6828_v61, %v2766_v7  ;;  %2776 = vst [vmem:[#allocation3 + $0x8c] sm:$0xf] %v2768_v37  ;;  %v5385_v54 = vor.u32 %v5816_v40, %v5384_v18  ;;  %v5151_v61 = vor.u32 %v5769_v46, %v5150_v5  ;;  %v5740_v38 = vld [vmem:[#allocation4 + $0x28] sm:$0xf0]  ;;  %v5763_v18 = vld [vmem:[#allocation4 + $0xe0] sm:$0xf0] }
 0x2b7   : > { %2775 = vst [vmem:[#allocation3 + $0x84] sm:$0xff] %v2767_v53  ;;  %2100 = vmatpush.bf16.msrb.mxu2 %v5163_v32  ;;  %2157 = vmatpush.bf16.msra.mxu1 %v5167_v25  ;;  %v5051_v42 = vor.u32 %v5743_v44, %v5050_v48  ;;  %v5039_v56 = vor.u32 %v5740_v38, %v5038_v41  ;;  %v5762_v7 = vld [vmem:[#allocation4 + $0xdc] sm:$0xf]  ;;  %v5128_v37 = vld [vmem:[#allocation4 + $0xe4] sm:$0xf0]  ;;  %v2683_v40 = vrot.slane %v6887_v62, 4 }
 0x2b8   : > { %2773 = vst [vmem:[#allocation3 + $0x78] sm:$0xff] %v2764_v24  ;;  %3116 = vmatpush.bf16.msrb.mxu3 %v5385_v54  ;;  %v5737_v46 = vld [vmem:[#allocation4 + $0x10] sm:$0xf0]  ;;  %v5360_v24 = vld [vmem:[#allocation3 + $0x60] sm:$0xf]  ;;  %v5131_v31 = vor.u32 %v5762_v7, %v5128_v37 }
 0x2b9   : > { %v2710_v9 = vpop.permute.xlu1 %2709  ;;  %v5810_v51 = vld [vmem:[#allocation3 + $0x68] sm:$0xf0]  ;;  %v5114_v44 = vld [vmem:[#allocation4 + $0xc0] sm:$0xf]  ;;  %v5104_v5 = vld [vmem:[#allocation4 + $0xb4] sm:$0xf0] }
 0x2ba   : > { %2196 = vmatpush.bf16.msrb.mxu0 %v5063_v12  ;;  %v6907_v26 = vpop.permute.xlu0 %2713  ;;  %5235 = vmatmul.msk.bf16.gmra.mxu3 %vm2071_vm10, %v6903_v50  ;;  %v2717_v47 = vrot.slane %v2710_v9, 4  ;;  %v6911_v33 = vpop.permute.xlu2 %2681  ;;  %v5127_v12 = vor.u32 %v5763_v18, %v5126_v35  ;;  %v5788_v49 = vld [vmem:[#allocation4 + $0x1a8] sm:$0xf0]  ;;  %v5759_v48 = vld [vmem:[#allocation4 + $0xc4] sm:$0xf]  ;;  %v5361_v45 = vor.u32 %v5810_v51, %v5360_v24 }
 0x2bb   : > { %5232 = vmatmul.msk.bf16.vlgmr.msra.gmra.mxu0 %vm2071_vm10, %v6867_v21  ;;  %2101 = vmatpush.bf16.msrb.mxu2 %v5151_v61  ;;  %v2686_v52 = vrot.slane %v6911_v33, 4  ;;  %v2719_v54 = vrot.slane %v6907_v26, 4  ;;  %v5756_v38 = vld [vmem:[#allocation4 + $0xac] sm:$0xf]  ;;  %v5230_v19 = vld [vmem:[#allocation4 + $0x1a0] sm:$0xf] }
 0x2bc   : > { %2158 = vmatpush.bf16.msra.mxu1 %v5155_v27  ;;  %v2721_v3 = vsel %vm326_vm0, %v2717_v47, %v2718_v30  ;;  %v5026_v30 = vld [vmem:[#allocation4 + $0x8] sm:$0xf]  ;;  %v5107_v41 = vor.u32 %v5756_v38, %v5104_v5 }
 0x2bd   : > { %v2722_v32 = vsel %vm433_vm4, %v2710_v9, %v2721_v3  ;;  %v2692_v25 = vsel %vm398_vm7, %v6911_v33, %v2686_v52  ;;  %v5027_v61 = vor.u32 %v5737_v46, %v5026_v30  ;;  %v4996_v9 = vld [vmem:[%s8096_s3 + $0xc] sm:$0xf0]  ;;  %v5785_v30 = vld [vmem:[#allocation4 + $0x190] sm:$0xf0] }
 0x2be   : > { %2197 = vmatpush.bf16.msrb.mxu0 %v5051_v42  ;;  %v5813_v1 = vld [vmem:[#allocation3 + $0x80] sm:$0xf0]  ;;  %2731 = vst [vmem:[#allocation3 + $0x48] sm:$0xff] %v2722_v32  ;;  %v5729_v42 = vld [vmem:[%s8096_s3 + $0x4] sm:$0xf]  ;;  %v5231_v32 = vor.u32 %v5788_v49, %v5230_v19 }
 0x2bf   : > { %2102 = vmatpush.bf16.msrb.mxu2 %v5139_v17  ;;  %v5372_v16 = vld [vmem:[#allocation3 + $0x78] sm:$0xf]  ;;  %2700 = vst [vmem:[#allocation3 + $0x44] sm:$0xf] %v2692_v25  ;;  %v5115_v17 = vor.u32 %v5760_v57, %v5114_v44  ;;  %v6934_v18 = vor.u32 %v5729_v42, %v4996_v9  ;;  %v5753_v46 = vld [vmem:[#allocation4 + $0x94] sm:$0xf] }
 0x2c0   : > { %2159 = vmatpush.bf16.msra.mxu1 %v5143_v28  ;;  %v5373_v53 = vor.u32 %v5813_v1, %v5372_v16  ;;  %v5119_v28 = vor.u32 %v5759_v48, %v5116_v58  ;;  %v5092_v16 = vld [vmem:[#allocation4 + $0x9c] sm:$0xf0]  ;;  %v5218_v57 = vld [vmem:[#allocation4 + $0x188] sm:$0xf]  ;;  %v5750_v44 = vld [vmem:[#allocation4 + $0x7c] sm:$0xf] }
 0x2c1   : > { %v2716_v27 = vpop.permute.xlu1 %2715  ;;  %v5219_v58 = vor.u32 %v5785_v30, %v5218_v57  ;;  %v5080_v51 = vld [vmem:[#allocation4 + $0x84] sm:$0xf0]  ;;  %v5068_v48 = vld [vmem:[#allocation4 + $0x6c] sm:$0xf0] }
 0x2c2   : > { %2198 = vmatpush.bf16.msrb.mxu0 %v5039_v56  ;;  %3117 = vmatpush.bf16.msrb.mxu3 %v5373_v53  ;;  %v2678_v55 = vpop.permute.xlu0 %2677  ;;  %v2720_v47 = vrot.slane %v2716_v27, 4  ;;  %v6930_v3 = vpop.permute.xlu2 %2645  ;;  %v5083_v49 = vor.u32 %v5750_v44, %v5080_v51 }
 0x2c3   : > { %2103 = vmatpush.bf16.msrb.mxu2 %v5127_v12  ;;  %v2684_v0 = vrot.slane %v2678_v55, 4  ;;  %v2651_v9 = vrot.slane %v6930_v3, 4 }
 0x2c4   : > { %2160 = vmatpush.bf16.msra.mxu1 %v5131_v31  ;;  %v2724_v56 = vsel %vm326_vm0, %v2719_v54, %v2720_v47  ;;  %v2726_v35 = vsel %vm433_vm4, %v2716_v27, %v2720_v47  ;;  %v5056_v47 = vld [vmem:[#allocation4 + $0x54] sm:$0xf0] }
 0x2c5   : > { %v2687_v7 = vsel %vm326_vm0, %v2683_v40, %v2684_v0  ;;  %v2725_v37 = vsel %vm433_vm4, %v6907_v26, %v2724_v56  ;;  %2734 = vst [vmem:[#allocation3 + $0x5c] sm:$0xf] %v2726_v35  ;;  %v2689_v25 = vsel %vm398_vm7, %v2678_v55, %v2684_v0  ;;  %v5095_v26 = vor.u32 %v5753_v46, %v5092_v16  ;;  %v5348_v40 = vld [vmem:[#allocation3 + $0x48] sm:$0xf]  ;;  %v5732_v0 = vld [vmem:[%s8096_s3 + $0x1c] sm:$0xf] }
 0x2c6   : > { %2199 = vmatpush.bf16.msrb.mxu0 %v5027_v61  ;;  %v2688_v1 = vsel %vm398_vm7, %v6887_v62, %v2687_v7  ;;  %3118 = vmatpush.bf16.msrb.mxu3 %v5361_v45  ;;  %2733 = vst [vmem:[#allocation3 + $0x54] sm:$0xff] %v2725_v37  ;;  %v5747_v45 = vld [vmem:[#allocation4 + $0x64] sm:$0xf] }
 0x2c7   : > { %2104 = vmatpush.bf16.msrb.mxu2 %v5115_v17  ;;  %2697 = vst [vmem:[#allocation3 + $0x30] sm:$0xff] %v2688_v1  ;;  %v5071_v33 = vor.u32 %v5747_v45, %v5068_v48  ;;  %v5008_v17 = vld [vmem:[%s8096_s3 + $0x24] sm:$0xf0] }
 0x2c8   : > { %2161 = vmatpush.bf16.msra.mxu1 %v5119_v28  ;;  %2698 = vst [vmem:[#allocation3 + $0x38] sm:$0xf] %v2689_v25  ;;  %v6968_v16 = vor.u32 %v5732_v0, %v5008_v17 }
 0x2c9   : > { %v2680_v53 = vpop.permute.xlu1 %2679 }
 0x2ca   : > { %2105 = vmatmul.bf16.vlgmr.msrb.gmra.mxu2 %v6934_v18  ;;  %v2642_v62 = vpop.permute.xlu0 %2641  ;;  %v2685_v24 = vrot.slane %v2680_v53, 4  ;;  %v6945_v12 = vpop.permute.xlu2 %2609 }
 0x2cb   : > { %2135 = vmatpush.bf16.msra.mxu2 %v5107_v41  ;;  %5233 = vmatmul.msk.bf16.gmra.mxu0 %vm2071_vm10, %v6903_v50  ;;  %v2616_v31 = vrot.slane %v6945_v12, 4  ;;  %v2649_v55 = vrot.slane %v2642_v62, 4 }
 0x2cc   : > { %2236 = vmatpush.bf16.msrb.mxu1 %v5231_v32  ;;  %v2690_v54 = vsel %vm326_vm0, %v2685_v24, %v2686_v52  ;;  %v5744_v32 = vld [vmem:[#allocation4 + $0x4c] sm:$0xf] }
 0x2cd   : > { %2162 = vmatmul.bf16.vlgmr.msra.gmra.mxu1 %v6934_v18  ;;  %v2691_v5 = vsel %vm398_vm7, %v2680_v53, %v2690_v54  ;;  %v2621_v61 = vsel %vm328_vm8, %v6945_v12, %v2616_v31  ;;  %v5807_v27 = vld [vmem:[#allocation3 + $0x50] sm:$0xf0]  ;;  %v5059_v37 = vor.u32 %v5744_v32, %v5056_v47  ;;  %v5741_v53 = vld [vmem:[#allocation4 + $0x34] sm:$0xf]  ;;  %v5735_v47 = vld [vmem:[#allocation4 + $0x4] sm:$0xf] }
 0x2ce   : > { %2699 = vst [vmem:[#allocation3 + $0x3c] sm:$0xff] %v2691_v5  ;;  %v5349_v42 = vor.u32 %v5807_v27, %v5348_v40  ;;  %v5336_v56 = vld [vmem:[#allocation3 + $0x30] sm:$0xf]  ;;  %v5738_v5 = vld [vmem:[#allocation4 + $0x1c] sm:$0xf] }
 0x2cf   : > { %2136 = vmatpush.bf16.msra.mxu2 %v5095_v26  ;;  %2630 = vst [vmem:[#allocation3 + $0x8] sm:$0xf] %v2621_v61  ;;  %v5044_v26 = vld [vmem:[#allocation4 + $0x3c] sm:$0xf0] }
 0x2d0   : > { %2237 = vmatpush.bf16.msrb.mxu1 %v5219_v58  ;;  %3119 = vmatpush.bf16.msrb.mxu3 %v5349_v42  ;;  %v5020_v42 = vld [vmem:[#allocation4 + $0xc] sm:$0xf0] }
 0x2d1   : > { %v2644_v52 = vpop.permute.xlu1 %2643 }
 0x2d2   : > { %v2648_v38 = vpop.permute.xlu0 %2647  ;;  %v2650_v19 = vrot.slane %v2644_v52, 4  ;;  %v6962_v41 = vpop.permute.xlu2 %2853 }
 0x2d3   : > { %2137 = vmatpush.bf16.msra.mxu2 %v5083_v49  ;;  %v2652_v28 = vrot.slane %v2648_v38, 4 }
 0x2d4   : > { %v2653_v35 = vsel %vm326_vm0, %v2649_v55, %v2650_v19  ;;  %v2655_v7 = vsel %vm363_vm9, %v2644_v52, %v2650_v19  ;;  %v5782_v55 = vld [vmem:[#allocation4 + $0x178] sm:$0xf0]  ;;  %v5206_v19 = vld [vmem:[#allocation4 + $0x170] sm:$0xf] }
 0x2d5   : > { %v2656_v1 = vsel %vm326_vm0, %v2651_v9, %v2652_v28  ;;  %v2654_v25 = vsel %vm363_vm9, %v2642_v62, %v2653_v35  ;;  %2664 = vst [vmem:[#allocation3 + $0x20] sm:$0xf] %v2655_v7  ;;  %v2658_v46 = vsel %vm363_vm9, %v2648_v38, %v2652_v28  ;;  %v5804_v57 = vld [vmem:[#allocation3 + $0x38] sm:$0xf0]  ;;  %v5047_v62 = vor.u32 %v5741_v53, %v5044_v26  ;;  %v5776_v26 = vld [vmem:[#allocation4 + $0x148] sm:$0xf0] }
 0x2d6   : > { %v2657_v30 = vsel %vm363_vm9, %v6930_v3, %v2656_v1  ;;  %2663 = vst [vmem:[#allocation3 + $0x18] sm:$0xff] %v2654_v25  ;;  %v5337_v58 = vor.u32 %v5804_v57, %v5336_v56  ;;  %v5032_v3 = vld [vmem:[#allocation4 + $0x24] sm:$0xf0]  ;;  %v5023_v38 = vor.u32 %v5735_v47, %v5020_v42  ;;  %v5207_v28 = vor.u32 %v5782_v55, %v5206_v19  ;;  %v5779_v56 = vld [vmem:[#allocation4 + $0x160] sm:$0xf0] }
 0x2d7   : > { %2138 = vmatpush.bf16.msra.mxu2 %v5071_v33  ;;  %2665 = vst [vmem:[#allocation3 + $0x24] sm:$0xff] %v2657_v30  ;;  %v5035_v61 = vor.u32 %v5738_v5, %v5032_v3  ;;  %v2861_v33 = vrot.slane %v6962_v41, 4  ;;  %v5194_v25 = vld [vmem:[#allocation4 + $0x158] sm:$0xf]  ;;  %v5182_v53 = vld [vmem:[#allocation4 + $0x140] sm:$0xf] }
 0x2d8   : > { %2666 = vst [vmem:[#allocation3 + $0x2c] sm:$0xf] %v2658_v46  ;;  %3120 = vmatpush.bf16.msrb.mxu3 %v5337_v58  ;;  %v5195_v57 = vor.u32 %v5779_v56, %v5194_v25  ;;  %v5820_v3 = vld [vmem:[#allocation3 + $0xb8] sm:$0xf0]  ;;  %v5170_v5 = vld [vmem:[#allocation4 + $0x128] sm:$0xf] }
 0x2d9   : > { %v2608_v24 = vpop.permute.xlu1 %2607  ;;  %v5158_v55 = vld [vmem:[#allocation4 + $0x110] sm:$0xf]  ;;  %v5146_v47 = vld [vmem:[#allocation4 + $0xf8] sm:$0xf]  ;;  %v5814_v19 = vld [vmem:[#allocation3 + $0x88] sm:$0xf0] }
 0x2da   : > { %2110 = vmatmul.bf16.gmra.mxu2 %v6968_v16  ;;  %v2612_v51 = vpop.permute.xlu0 %2611  ;;  %v2615_v12 = vrot.slane %v2608_v24, 4  ;;  %v2860_v40 = vpop.permute.xlu2 %2859  ;;  %v5764_v25 = vld [vmem:[#allocation4 + $0xe8] sm:$0xf0] }
 0x2db   : > { %2139 = vmatpush.bf16.msra.mxu2 %v5059_v37  ;;  %2200 = vmatmul.bf16.vlgmr.msrb.gmra.mxu0 %v6819_v39  ;;  %v2864_v54 = vrot.slane %v2860_v40, 4  ;;  %v2617_v52 = vrot.slane %v2612_v51, 4 }
 0x2dc   : > { %v2619_v44 = vsel %vm326_vm0, %v2615_v12, %v2616_v31 }
 0x2dd   : > { %2167 = vmatmul.bf16.gmra.mxu1 %v6968_v16  ;;  %v2620_v49 = vsel %vm328_vm8, %v2608_v24, %v2619_v44  ;;  %v2870_v27 = vsel %vm581_vm3, %v2860_v40, %v2864_v54  ;;  %v5324_v48 = vld [vmem:[#allocation3 + $0x18] sm:$0xf]  ;;  %v5183_v24 = vor.u32 %v5776_v26, %v5182_v53  ;;  %v5280_v40 = vld [vmem:[%s8095_s2] sm:$0xf]  ;;  %v5761_v53 = vld [vmem:[#allocation4 + $0xd0] sm:$0xf0] }
 0x2de   : > { %2629 = vst [vmem:[#allocation3] sm:$0xff] %v2620_v49  ;;  %v5801_v9 = vld [vmem:[#allocation3 + $0x20] sm:$0xf0] }
 0x2df   : > { %2140 = vmatpush.bf16.msra.mxu2 %v5047_v62  ;;  %2878 = vst [vmem:[#allocation3 + $0xd4] sm:$0xf] %v2870_v27  ;;  %v5325_v45 = vor.u32 %v5801_v9, %v5324_v48  ;;  %v5404_v27 = vld [vmem:[#allocation3 + $0xb0] sm:$0xf]  ;;  %v5392_v9 = vld [vmem:[#allocation3 + $0x98] sm:$0xf] }
 0x2e0   : > { %v5405_v48 = vor.u32 %v5820_v3, %v5404_v27  ;;  %v5344_v3 = vld [vmem:[#allocation3 + $0x38] sm:$0xf]  ;;  %v5386_v27 = vld [vmem:[#allocation3 + $0x9c] sm:$0xf0] }
 0x2e1   : > { %v2614_v31 = vpop.permute.xlu1 %2613  ;;  %3121 = vmatpush.bf16.msrb.mxu3 %v5325_v45 }
 0x2e2   : > { %v2856_v0 = vpop.permute.xlu0 %2855  ;;  %v2618_v17 = vrot.slane %v2614_v31, 4 }
 0x2e3   : > { %2141 = vmatpush.bf16.msra.mxu2 %v5035_v61  ;;  %v2862_v32 = vrot.slane %v2856_v0, 4 }
 0x2e4   : > { %v2622_v35 = vsel %vm326_vm0, %v2617_v52, %v2618_v17  ;;  %v2624_v7 = vsel %vm328_vm8, %v2614_v31, %v2618_v17  ;;  %v5380_v31 = vld [vmem:[#allocation3 + $0x80] sm:$0xf]  ;;  %v5282_v17 = vld [vmem:[%s8095_s2 + $0x8] sm:$0xf0] }
 0x2e5   : > { %v2865_v37 = vsel %vm326_vm0, %v2861_v33, %v2862_v32  ;;  %v2623_v1 = vsel %vm328_vm8, %v2612_v51, %v2622_v35  ;;  %2632 = vst [vmem:[#allocation3 + $0x14] sm:$0xf] %v2624_v7  ;;  %v2867_v46 = vsel %vm581_vm3, %v2856_v0, %v2862_v32  ;;  %v5312_v51 = vld [vmem:[#allocation3] sm:$0xf]  ;;  %v5817_v33 = vld [vmem:[#allocation3 + $0xa0] sm:$0xf0] }
 0x2e6   : > { %v2866_v30 = vsel %vm581_vm3, %v6962_v41, %v2865_v37  ;;  %2631 = vst [vmem:[#allocation3 + $0xc] sm:$0xff] %v2623_v1  ;;  %v5773_v41 = vld [vmem:[#allocation4 + $0x130] sm:$0xf0]  ;;  %v5393_v52 = vor.u32 %v5817_v33, %v5392_v9  ;;  %v5789_v0 = vld [vmem:[%s8095_s2 + $0x4] sm:$0xf]  ;;  %v5381_v1 = vor.u32 %v5814_v19, %v5380_v31 }
 0x2e7   : > { %2142 = vmatpush.bf16.msra.mxu2 %v5023_v38  ;;  %2875 = vst [vmem:[#allocation3 + $0xc0] sm:$0xff] %v2866_v30  ;;  %v5368_v7 = vld [vmem:[#allocation3 + $0x68] sm:$0xf]  ;;  %v5811_v37 = vld [vmem:[#allocation3 + $0x70] sm:$0xf0]  ;;  %v7008_v30 = vor.u32 %v5789_v0, %v5282_v17 }
 0x2e8   : > { %2876 = vst [vmem:[#allocation3 + $0xc8] sm:$0xf] %v2867_v46  ;;  %v5134_v46 = vld [vmem:[#allocation4 + $0xe0] sm:$0xf]  ;;  %v5332_v9 = vld [vmem:[#allocation3 + $0x20] sm:$0xf] }
 0x2e9   : > { %v2858_v58 = vpop.permute.xlu1 %2857  ;;  %v5135_v26 = vor.u32 %v5764_v25, %v5134_v46  ;;  %v5791_v33 = vld [vmem:[%s8095_s2 + $0x14] sm:$0xf]  ;;  %v5320_v19 = vld [vmem:[#allocation3 + $0x8] sm:$0xf]  ;;  %v5296_v46 = vld [vmem:[%s8095_s2 + $0x20] sm:$0xf] }
 0x2ea   : > { %2143 = vmatmul.bf16.vlgmr.msra.gmra.mxu2 %v6819_v39  ;;  %v2863_v62 = vrot.slane %v2858_v58, 4  ;;  %v5790_v39 = vld [vmem:[%s8095_s2 + $0x4] sm:$0xf0] }
 0x2eb   : > { %2211 = vmatpush.bf16.msrb.mxu2 %v5207_v28  ;;  %2205 = vmatmul.bf16.gmra.mxu0 %v6850_v22  ;;  %v6999_v42 = vor.u32 %v5790_v39, %v5280_v40  ;;  %v5767_v28 = vld [vmem:[#allocation4 + $0x100] sm:$0xf0]  ;;  %v5805_v40 = vld [vmem:[#allocation3 + $0x40] sm:$0xf0] }
 0x2ec   : > { %v2868_v12 = vsel %vm326_vm0, %v2863_v62, %v2864_v54  ;;  %v5770_v54 = vld [vmem:[#allocation4 + $0x118] sm:$0xf0]  ;;  %v5147_v56 = vor.u32 %v5767_v28, %v5146_v47  ;;  %v5398_v62 = vld [vmem:[#allocation3 + $0xb4] sm:$0xf0]  ;;  %v5812_v47 = vld [vmem:[#allocation3 + $0x7c] sm:$0xf] }
 0x2ed   : > { %5236 = vmatmul.msk.bf16.vlgmr.msrb.gmra.mxu1 %vm2071_vm10, %v6867_v21  ;;  %v2869_v44 = vsel %vm581_vm3, %v2858_v58, %v2868_v12  ;;  %v5798_v49 = vld [vmem:[#allocation3 + $0x8] sm:$0xf0]  ;;  %v5171_v21 = vor.u32 %v5773_v41, %v5170_v5  ;;  %v5159_v45 = vor.u32 %v5770_v54, %v5158_v55  ;;  %v5122_v58 = vld [vmem:[#allocation4 + $0xc8] sm:$0xf]  ;;  %v5808_v41 = vld [vmem:[#allocation3 + $0x58] sm:$0xf0] }
 0x2ee   : > { %2877 = vst [vmem:[#allocation3 + $0xcc] sm:$0xff] %v2869_v44  ;;  %v5313_v61 = vor.u32 %v5798_v49, %v5312_v51  ;;  %v5408_v38 = vld [vmem:[#allocation3 + $0xc0] sm:$0xf]  ;;  %v5792_v51 = vld [vmem:[%s8095_s2 + $0x14] sm:$0xf0] }
 0x2ef   : > { %2212 = vmatpush.bf16.msrb.mxu2 %v5195_v57  ;;  %v5369_v57 = vor.u32 %v5811_v37, %v5368_v7  ;;  %v5818_v12 = vld [vmem:[#allocation3 + $0xac] sm:$0xf]  ;;  %v5821_v39 = vld [vmem:[#allocation3 + $0xc4] sm:$0xf]  ;;  %v5815_v54 = vld [vmem:[#allocation3 + $0x94] sm:$0xf] }
 0x2f0   : > { %3122 = vmatpush.bf16.msrb.mxu3 %v5313_v61  ;;  %v5401_v5 = vor.u32 %v5818_v12, %v5398_v62  ;;  %v5802_v55 = vld [vmem:[#allocation3 + $0x28] sm:$0xf0]  ;;  %v5799_v0 = vld [vmem:[#allocation3 + $0x10] sm:$0xf0]  ;;  %v5809_v28 = vld [vmem:[#allocation3 + $0x64] sm:$0xf] }
 0x2f1   : > { %v5333_v31 = vor.u32 %v5802_v55, %v5332_v9  ;;  %v5416_v7 = vld [vmem:[#allocation3 + $0xc8] sm:$0xf]  ;;  %v5298_v12 = vld [vmem:[%s8095_s2 + $0x28] sm:$0xf0]  ;;  %v996_v9 = vpop.f32.mrf.mxu3  ;;  %v967_v55 = vpop.f32.mrf.mxu1 }
 0x2f3   : > { %2213 = vmatpush.bf16.msrb.mxu2 %v5183_v24  ;;  %3123 = vmatmul.bf16.vlgmr.msrb.gmra.mxu3 %v6999_v42  ;;  %v5356_v24 = vld [vmem:[#allocation3 + $0x50] sm:$0xf] }
 0x2f4   : > { %3231 = vmatpush.bf16.msra.mxu3 %v5405_v48  ;;  %v5357_v49 = vor.u32 %v5808_v41, %v5356_v24  ;;  %v5345_v48 = vor.u32 %v5805_v40, %v5344_v3  ;;  %v5803_v24 = vld [vmem:[#allocation3 + $0x34] sm:$0xf]  ;;  %v5338_v41 = vld [vmem:[#allocation3 + $0x3c] sm:$0xf0]  ;;  %v5800_v3 = vld [vmem:[#allocation3 + $0x1c] sm:$0xf] }
 0x2f5   : > { %v5822_v32 = vld [vmem:[#allocation3 + $0xc8] sm:$0xf0]  ;;  %v5410_v44 = vld [vmem:[#allocation3 + $0xcc] sm:$0xf0] }
 0x2f6   : > { %v5409_v35 = vor.u32 %v5822_v32, %v5408_v38  ;;  %v5413_v61 = vor.u32 %v5821_v39, %v5410_v44  ;;  %v5374_v38 = vld [vmem:[#allocation3 + $0x84] sm:$0xf0]  ;;  %v5362_v32 = vld [vmem:[#allocation3 + $0x6c] sm:$0xf0] }
 0x2f7   : > { %2214 = vmatpush.bf16.msrb.mxu2 %v5171_v21  ;;  %v5365_v37 = vor.u32 %v5809_v28, %v5362_v32 }
 0x2f8   : > { %3232 = vmatpush.bf16.msra.mxu3 %v5393_v52  ;;  %3151 = vmatpush.bf16.msra.mxu0 %v5409_v35  ;;  %v5290_v52 = vld [vmem:[%s8095_s2 + $0x18] sm:$0xf0]  ;;  %v5321_v35 = vor.u32 %v5799_v0, %v5320_v19 }
 0x2f9   : > { %3209 = vmatpush.bf16.msra.mxu1 %v5413_v61  ;;  %v7030_v17 = vor.u32 %v5791_v33, %v5290_v52  ;;  %v5306_v33 = vld [vmem:[%s8095_s2 + $0x38] sm:$0xf0]  ;;  %v7069_v52 = vadd.f32 %v996_v9, %v967_v55  ;;  %v7078_v0 = vpop.f32.mrf.mxu1 }
 0x2fa   : > { %2148 = vmatmul.bf16.gmra.mxu2 %v6850_v22  ;;  %v5288_v22 = vld [vmem:[%s8095_s2 + $0x10] sm:$0xf]  ;;  %8123 = vst [vmem:[#allocation16_spill] sm:$0xff] %v7078_v0 }
 0x2fb   : > { %2215 = vmatpush.bf16.msrb.mxu2 %v5159_v45  ;;  %5418 = vmatmul.msk.bf16.vlgmr.msra.gmra.mxu0 %vm819_vm5, %v7008_v30  ;;  %v7021_v21 = vor.u32 %v5792_v51, %v5288_v22  ;;  %v5389_v45 = vor.u32 %v5815_v54, %v5386_v27  ;;  %v5341_v22 = vor.u32 %v5803_v24, %v5338_v41  ;;  %v5793_v51 = vld [vmem:[%s8095_s2 + $0x24] sm:$0xf]  ;;  %v5304_v27 = vld [vmem:[%s8095_s2 + $0x30] sm:$0xf] }
 0x2fc   : > { %3233 = vmatpush.bf16.msra.mxu3 %v5381_v1  ;;  %v5823_v1 = vld [vmem:[#allocation3 + $0xd0] sm:$0xf0]  ;;  %v5301_v39 = vor.u32 %v5793_v51, %v5298_v12  ;;  %8121 = vst [vmem:[#allocation14_spill] sm:$0xff] %v7069_v52  ;;  %v8130_v52 = vmov 2  }
 0x2fd   : > { %5237 = vmatmul.msk.bf16.gmra.mxu1 %vm2071_vm10, %v6903_v50  ;;  %v5123_v50 = vor.u32 %v5761_v53, %v5122_v58  ;;  %v5417_v25 = vor.u32 %v5823_v1, %v5416_v7  ;;  %v7043_v58 = vpop.f32.mrf.mxu0 }
 0x2fe   : > { %8120 = vst [vmem:[#allocation13_spill] sm:$0xff] %v7043_v58 }
 0x2ff   : > { %2216 = vmatpush.bf16.msrb.mxu2 %v5147_v56  ;;  %v5377_v56 = vor.u32 %v5812_v47, %v5374_v38  ;;  %3267 = vmatpush.bf16.msrb.mxu0 %v5417_v25 }
 0x300   : > { %3234 = vmatpush.bf16.msra.mxu3 %v5369_v57  ;;  %v5806_v57 = vld [vmem:[#allocation3 + $0x4c] sm:$0xf] }
 0x303   : > { %2217 = vmatpush.bf16.msrb.mxu2 %v5135_v26  ;;  %3128 = vmatmul.bf16.gmra.mxu3 %v7021_v21  ;;  %v5350_v26 = vld [vmem:[#allocation3 + $0x54] sm:$0xf0] }
 0x304   : > { %3235 = vmatpush.bf16.msra.mxu3 %v5357_v49  ;;  %v5353_v62 = vor.u32 %v5806_v57, %v5350_v26  ;;  %v5314_v49 = vld [vmem:[#allocation3 + $0xc] sm:$0xf0] }
 0x307   : > { %2218 = vmatpush.bf16.msrb.mxu2 %v5123_v50  ;;  %v5326_v50 = vld [vmem:[#allocation3 + $0x24] sm:$0xf0] }
 0x308   : > { %3236 = vmatpush.bf16.msra.mxu3 %v5345_v48  ;;  %v5329_v44 = vor.u32 %v5800_v3, %v5326_v50  ;;  %v5796_v48 = vld [vmem:[%s8095_s2 + $0x34] sm:$0xf0] }
 0x30a   : > { %2219 = vmatmul.bf16.vlgmr.msrb.gmra.mxu2 %v6934_v18  ;;  %v5794_v18 = vld [vmem:[%s8095_s2 + $0x24] sm:$0xf0] }
 0x30b   : > { %3173 = vmatpush.bf16.msra.mxu2 %v5401_v5  ;;  %5419 = vmatmul.msk.bf16.gmra.mxu0 %vm819_vm5, %v7030_v17  ;;  %v5297_v53 = vor.u32 %v5794_v18, %v5296_v46  ;;  %v5797_v5 = vld [vmem:[#allocation3 + $0x4] sm:$0xf] }
 0x30c   : > { %3237 = vmatpush.bf16.msra.mxu3 %v5333_v31  ;;  %v5317_v61 = vor.u32 %v5797_v5, %v5314_v49  ;;  %v7074_v31 = vpop.f32.mrf.mxu3 }
 0x30d   : > { %5422 = vmatmul.msk.bf16.vlgmr.msra.gmra.mxu1 %vm819_vm5, %v7008_v30  ;;  %8122 = vst [vmem:[#allocation15_spill] sm:$0xff] %v7074_v31 }
 0x30f   : > { %3174 = vmatpush.bf16.msra.mxu2 %v5389_v45  ;;  %v5795_v45 = vld [vmem:[%s8095_s2 + $0x34] sm:$0xf] }
 0x310   : > { %3238 = vmatpush.bf16.msra.mxu3 %v5321_v35  ;;  %v5309_v38 = vor.u32 %v5795_v45, %v5306_v33 }
 0x313   : > { %3175 = vmatpush.bf16.msra.mxu2 %v5377_v56  ;;  %3133 = vmatmul.bf16.gmra.mxu3 %v5297_v53  ;;  %v972_v56 = vpop.f32.mrf.mxu1 }
 0x314   : > { %v1001_v32 = vpop.f32.mrf.mxu3 }
 0x315   : > { %v7081_v35 = vadd.f32 %v1001_v32, %v972_v56 }
 0x317   : > { %3176 = vmatpush.bf16.msra.mxu2 %v5365_v37  ;;  %v2087_v40 = vpop.f32.mrf.mxu0  ;;  %8124 = vst [vmem:[#allocation17_spill] sm:$0xff] %v7081_v35  ;;  %v7090_v37 = vpop.f32.mrf.mxu2 }
 0x318   : > { %8125 = vst [vmem:[#allocation18_spill] sm:$0xff] %v7090_v37 }
 0x31a   : > { %2224 = vmatmul.bf16.gmra.mxu2 %v6968_v16  ;;  %v5305_v16 = vor.u32 %v5796_v48, %v5304_v27 }
 0x31b   : > { %3177 = vmatpush.bf16.msra.mxu2 %v5353_v62  ;;  %5420 = vmatmul.msk.bf16.gmra.mxu0 %vm819_vm5, %v5301_v39  ;;  %v7096_v46 = vpop.f32.mrf.mxu1 }
 0x31c   : > { %v7092_v1 = vpop.f32.mrf.mxu3  ;;  %8127 = vst [vmem:[#allocation20_spill] sm:$0xff] %v7096_v46 }
 0x31d   : > { %5423 = vmatmul.msk.bf16.gmra.mxu1 %vm819_vm5, %v7030_v17  ;;  %8126 = vst [vmem:[#allocation19_spill] sm:$0xff] %v7092_v1 }
 0x31f   : > { %3178 = vmatpush.bf16.msra.mxu2 %v5341_v22  ;;  %v7061_v54 = vpop.f32.mrf.mxu0 }
 0x323   : > { %3179 = vmatpush.bf16.msra.mxu2 %v5329_v44  ;;  %3138 = vmatmul.bf16.gmra.mxu3 %v5305_v16 }
 0x327   : > { %3180 = vmatpush.bf16.msra.mxu2 %v5317_v61 }
 0x328   : > { %v2092_v47 = vpop.f32.mrf.mxu0 }
 0x32a   : > { %3181 = vmatmul.bf16.vlgmr.msra.gmra.mxu2 %v6999_v42 }
 0x32b   : > { %5421 = vmatmul.msk.bf16.gmra.mxu0 %vm819_vm5, %v5309_v38 }
 0x32d   : > { %5424 = vmatmul.msk.bf16.gmra.mxu1 %vm819_vm5, %v5301_v39 }
 0x330   : > { %v7076_v19 = vpop.f32.mrf.mxu0 }
 0x333   : > { %3239 = vmatmul.bf16.vlgmr.msra.gmra.mxu3 %v6999_v42 }
 0x338   : > { %v2125_v28 = vpop.f32.mrf.mxu0 }
 0x33a   : > { %3186 = vmatmul.bf16.gmra.mxu2 %v7021_v21 }
 0x33b   : > { %5426 = vmatmul.msk.bf16.vlgmr.msrb.gmra.mxu0 %vm819_vm5, %v7008_v30  ;;  %v2182_v30 = vpop.f32.mrf.mxu3 }
 0x33d   : > { %5425 = vmatmul.msk.bf16.gmra.mxu1 %vm819_vm5, %v5309_v38 }
 0x340   : > { %v7087_v7 = vpop.f32.mrf.mxu0 }
 0x343   : > { %3244 = vmatmul.bf16.gmra.mxu3 %v7021_v21  ;;  %v7104_v41 = vpop.f32.mrf.mxu3 }
 0x348   : > { %v2130_v42 = vpop.f32.mrf.mxu0 }
 0x34a   : > { %3191 = vmatmul.bf16.gmra.mxu2 %v5297_v53  ;;  %v2163_v24 = vpop.f32.mrf.mxu1 }
 0x34b   : > { %5427 = vmatmul.msk.bf16.gmra.mxu0 %vm819_vm5, %v7030_v17  ;;  %v2187_v50 = vpop.f32.mrf.mxu3 }
 0x34d   : > { %v2106_v25 = vpop.f32.mrf.mxu2 }
 0x34e   : > { %v2107_v18 = vadd.f32 %v2106_v25, %v2087_v40 }
 0x350   : > { %v7098_v57 = vpop.f32.mrf.mxu0  ;;  %v7100_v26 = vadd.f32 %v2125_v28, %v2107_v18 }
 0x352   : > { %v7109_v3 = vpop.f32.mrf.mxu1 }
 0x353   : > { %3249 = vmatmul.bf16.gmra.mxu3 %v5297_v53  ;;  %v7114_v49 = vpop.f32.mrf.mxu3 }
 0x355   : > { %v7102_v21 = vpop.f32.mrf.mxu2 }
 0x358   : > { %v2201_v62 = vpop.f32.mrf.mxu0 }
 0x35a   : > { %3196 = vmatmul.bf16.gmra.mxu2 %v5305_v16  ;;  %v2168_v44 = vpop.f32.mrf.mxu1 }
 0x35b   : > { %5428 = vmatmul.msk.bf16.gmra.mxu0 %vm819_vm5, %v5301_v39 }
 0x35d   : > { %v2111_v17 = vpop.f32.mrf.mxu2 }
 0x35e   : > { %v2112_v22 = vadd.f32 %v2111_v17, %v2092_v47 }
 0x360   : > { %v2203_v51 = vpop.f32.mrf.mxu0  ;;  %v7107_v12 = vadd.f32 %v2130_v42, %v2112_v22 }
 0x362   : > { %v7120_v9 = vpop.f32.mrf.mxu1 }
 0x363   : > { %3254 = vmatmul.bf16.gmra.mxu3 %v5305_v16 }
 0x365   : > { %v7111_v40 = vpop.f32.mrf.mxu2 }
 0x368   : > { %v2206_v53 = vpop.f32.mrf.mxu0 }
 0x36a   : > { %v2239_v28 = vpop.f32.mrf.mxu1 }
 0x36b   : > { %5429 = vmatmul.msk.bf16.gmra.mxu0 %vm819_vm5, %v5309_v38 }
 0x36d   : > { %v2144_v5 = vpop.f32.mrf.mxu2 }
 0x36e   : > { %v2164_v61 = vadd.f32 %v2163_v24, %v2144_v5 }
 0x370   : > { %v2208_v39 = vpop.f32.mrf.mxu0  ;;  %v7116_v27 = vadd.f32 %v2182_v30, %v2164_v61 }
 0x372   : > { %v2241_v18 = vpop.f32.mrf.mxu1 }
 0x375   : > { %v7118_v48 = vpop.f32.mrf.mxu2 }
 0x376   : > { %v3124_v55 = vpop.f32.mrf.mxu3 }
 0x378   : > { %v3153_v45 = vpop.f32.mrf.mxu0 }
 0x37a   : > { %v2244_v61 = vpop.f32.mrf.mxu1 }
 0x37d   : > { %v2149_v16 = vpop.f32.mrf.mxu2 }
 0x37e   : > { %v2169_v33 = vadd.f32 %v2168_v44, %v2149_v16  ;;  %v3126_v47 = vpop.f32.mrf.mxu3 }
 0x380   : > { %v7122_v32 = vadd.f32 %v2187_v50, %v2169_v33  ;;  %v3155_v38 = vpop.f32.mrf.mxu0 }
 0x382   : > { %v2246_v58 = vpop.f32.mrf.mxu1 }
 0x385   : > { %v7124_v56 = vpop.f32.mrf.mxu2 }
 0x386   : > { %v3129_v42 = vpop.f32.mrf.mxu3 }
 0x388   : > { %v3158_v25 = vpop.f32.mrf.mxu0 }
 0x38a   : > { %v3211_v4 = vpop.f32.mrf.mxu1 }
 0x38d   : > { %v2220_v30 = vpop.f32.mrf.mxu2 }
 0x38e   : > { %v2221_v24 = vadd.f32 %v2220_v30, %v2201_v62  ;;  %v3131_v17 = vpop.f32.mrf.mxu3 }
 0x390   : > { %v7126_v22 = vadd.f32 %v2239_v28, %v2221_v24  ;;  %v3160_v5 = vpop.f32.mrf.mxu0  ;;  %v3154_v24 = vadd.f32 %v3153_v45, %v3124_v55 }
 0x395   : > { %v2222_v1 = vpop.f32.mrf.mxu2 }
 0x396   : > { %v2223_v46 = vadd.f32 %v2222_v1, %v2203_v51  ;;  %v3134_v44 = vpop.f32.mrf.mxu3 }
 0x398   : > { %v7128_v16 = vadd.f32 %v2241_v18, %v2223_v46  ;;  %v3163_v50 = vpop.f32.mrf.mxu0  ;;  %v3289_v18 = vmul.f32 %v3154_v24, %v6350_v13  ;;  %v3159_v24 = vadd.f32 %v3158_v25, %v3129_v42 }
 0x399   : > { %v7130_v33 = vadd.f32 %v3163_v50, %v3134_v44 }
 0x39b   : > { %8128 = vst [vmem:[#allocation21_spill] sm:$0xff] %v7130_v33 }
 0x39d   : > { %v2225_v37 = vpop.f32.mrf.mxu2 }
 0x39e   : > { %v2226_v35 = vadd.f32 %v2225_v37, %v2206_v53  ;;  %v3136_v29 = vpop.f32.mrf.mxu3  ;;  %v3301_v37 = vadd.f32 %v3289_v18, %v6352_v15 }
 0x3a0   : > { %v7132_v31 = vadd.f32 %v2244_v61, %v2226_v35  ;;  %v3165_v62 = vpop.f32.mrf.mxu0  ;;  %v3156_v35 = vadd.f32 %v3155_v38, %v3126_v47 }
 0x3a1   : > { %v7134_v30 = vadd.f32 %v3165_v62, %v3136_v29  ;;  %v3213_v62 = vpop.f32.mrf.mxu1 }
 0x3a2   : > { %v3292_v45 = vmul.f32 %v3156_v35, %v6363_v14  ;;  %v3295_v35 = vmul.f32 %v3159_v24, %v6338_v6 }
 0x3a4   : > { %v3304_v47 = vadd.f32 %v3292_v45, %v6369_v43  ;;  %v3161_v45 = vadd.f32 %v3160_v5, %v3131_v17 }
 0x3a5   : > { %v2227_v28 = vpop.f32.mrf.mxu2 }
 0x3a6   : > { %v2228_v0 = vadd.f32 %v2227_v28, %v2208_v39  ;;  %v3139_v1 = vpop.f32.mrf.mxu3  ;;  %v3313_v39 = vmax.f32 %v3301_v37, 0.0 }
 0x3a8   : > { %v7136_v51 = vadd.f32 %v2246_v58, %v2228_v0  ;;  %v3168_v46 = vpop.f32.mrf.mxu0 }
 0x3a9   : > { %v7139_v44 = vadd.f32 %v3168_v46, %v3139_v1  ;;  %v3325_v46 = vmul.f32 %v3313_v39, %v6365_v20 }
 0x3ab   : > { %8129 = vst [vmem:[#allocation22_spill] sm:$0xff] %v7139_v44 }
 0x3ad   : > { %v3182_v50 = vpop.f32.mrf.mxu2 }
 0x3ae   : > { %v3212_v53 = vadd.f32 %v3211_v4, %v3182_v50  ;;  %v3141_v61 = vpop.f32.mrf.mxu3 }
 0x3b0   : > { %v3290_v29 = vmul.f32 %v3212_v53, %v6350_v13  ;;  %v3170_v55 = vpop.f32.mrf.mxu0 }
 0x3b1   : > { %v7145_v0 = vadd.f32 %v3170_v55, %v3141_v61  ;;  %v3216_v61 = vpop.f32.mrf.mxu1 }
 0x3b2   : > { %v3302_v58 = vadd.f32 %v3290_v29, %v6352_v15  ;;  %v3316_v29 = vmax.f32 %v3304_v47, 0.0 }
 0x3b4   : > { %v3314_v28 = vmax.f32 %v3302_v58, 0.0 }
 0x3b5   : > { %v3184_v1 = vpop.f32.mrf.mxu2 }
 0x3b6   : > { %v3326_v4 = vmul.f32 %v3314_v28, %v6373_v63  ;;  %v3214_v38 = vadd.f32 %v3213_v62, %v3184_v1  ;;  %v3240_v18 = vpop.f32.mrf.mxu3  ;;  %v3307_v62 = vadd.f32 %v3295_v35, %v6342_v8  ;;  %v3328_v28 = vmul.f32 %v3316_v29, %v6365_v20 }
 0x3b8   : > { %v7150_v50 = vpack.c.bf16 %v3326_v4, %v3325_v46  ;;  %v3293_v37 = vmul.f32 %v3214_v38, %v6363_v14  ;;  %v3269_v53 = vpop.f32.mrf.mxu0 }
 0x3b9   : > { %v3270_v25 = vadd.f32 %v3269_v53, %v3240_v18  ;;  %v3218_v29 = vpop.f32.mrf.mxu1 }
 0x3ba   : > { %3345 = vst [vmem:[#allocation2 + $0x4] sm:$0xff] %v7150_v50  ;;  %v3305_v42 = vadd.f32 %v3293_v37, %v6369_v43  ;;  %v3319_v37 = vmax.f32 %v3307_v62, 0.0 }
 0x3bb   : > { %v3291_v39 = vmul.f32 %v3270_v25, %v6350_v13  ;;  %v3298_v13 = vmul.f32 %v3161_v45, %v6346_v10 }
 0x3bc   : > { %v3317_v55 = vmax.f32 %v3305_v42, 0.0  ;;  %v3331_v45 = vmul.f32 %v3319_v37, %v6365_v20 }
 0x3bd   : > { %v3187_v58 = vpop.f32.mrf.mxu2  ;;  %v3303_v24 = vadd.f32 %v3291_v39, %v6352_v15  ;;  %v3310_v39 = vadd.f32 %v3298_v13, %v6348_v11 }
 0x3be   : > { %v3329_v1 = vmul.f32 %v3317_v55, %v6373_v63  ;;  %v3217_v46 = vadd.f32 %v3216_v61, %v3187_v58  ;;  %v3242_v47 = vpop.f32.mrf.mxu3 }
 0x3bf   : > { %v3315_v38 = vmax.f32 %v3303_v24, 0.0 }
 0x3c0   : > { %v7161_v4 = vpack.c.bf16 %v3329_v1, %v3328_v28  ;;  %v3296_v18 = vmul.f32 %v3217_v46, %v6338_v6  ;;  %v3271_v17 = vpop.f32.mrf.mxu0 }
 0x3c1   : > { %v7165_v53 = vld [vmem:[#allocation2] sm:$0xff]  ;;  %v3327_v35 = vmul.f32 %v3315_v38, %v6361_v34  ;;  %v3272_v61 = vadd.f32 %v3271_v17, %v3242_v47 }
 0x3c2   : > { %v3625_v5 = vld [vmem:[#allocation2 + $0x4] sm:$0xff]  ;;  %3347 = vst [vmem:[#allocation2 + $0x18] sm:$0xff] %v7161_v4  ;;  %v3308_v15 = vadd.f32 %v3296_v18, %v6342_v8  ;;  %3573 = vrot.lane.b32.xlu1 %v7165_v53, %s5987_s12  ;;  %3505 = vrot.lane.b32.xlu2 %v7165_v53, %s5988_s13  ;;  %v3322_v18 = vmax.f32 %v3310_v39, 0.0 }
 0x3c3   : > { %3437 = vrot.lane.b32.xlu0 %v7165_v53, %s5989_s14  ;;  %3633 = vst [vmem:[#allocation4 + $0xc0] sm:$0xff] %v3625_v5  ;;  %v3338_v42 = vpack.c.bf16 %v3327_v35, %v3327_v35  ;;  %v3294_v55 = vmul.f32 %v3272_v61, %v6363_v14 }
 0x3c4   : > { %v3320_v25 = vmax.f32 %v3308_v15, 0.0 }
 0x3c5   : > { %v3189_v62 = vpop.f32.mrf.mxu2  ;;  %3346 = vst [vmem:[#allocation2 + $0xc] sm:$0xf] %v3338_v42  ;;  %v3306_v28 = vadd.f32 %v3294_v55, %v6369_v43 }
 0x3c6   : > { %v3332_v58 = vmul.f32 %v3320_v25, %v6373_v63  ;;  %v3219_v1 = vadd.f32 %v3218_v29, %v3189_v62  ;;  %v3245_v24 = vpop.f32.mrf.mxu3  ;;  %v3334_v29 = vmul.f32 %v3322_v18, %v6365_v20 }
 0x3c7   : > { %v3318_v47 = vmax.f32 %v3306_v28, 0.0 }
 0x3c8   : > { %v7181_v46 = vpack.c.bf16 %v3332_v58, %v3331_v45  ;;  %v3299_v38 = vmul.f32 %v3219_v1, %v6346_v10  ;;  %v3274_v17 = vpop.f32.mrf.mxu0 }
 0x3c9   : > { %v3627_v14 = vld [vmem:[#allocation2 + $0x18] sm:$0xff]  ;;  %v3330_v13 = vmul.f32 %v3318_v47, %v6361_v34  ;;  %v3275_v43 = vadd.f32 %v3274_v17, %v3245_v24 }
 0x3ca   : > { %3349 = vst [vmem:[#allocation2 + $0x2c] sm:$0xff] %v7181_v46  ;;  %v3311_v37 = vadd.f32 %v3299_v38, %v6348_v11  ;;  %3793 = vrot.lane.b32.xlu1 %v7150_v50, %s5984_s9  ;;  %3725 = vrot.lane.b32.xlu2 %v7150_v50, %s5985_s10  ;;  %v7199_v45 = vld [vmem:[#allocation2 + $0x14] sm:$0xff] }
 0x3cb   : > { %3657 = vrot.lane.b32.xlu0 %v7150_v50, %s5986_s11  ;;  %3635 = vst [vmem:[#allocation4 + $0xcc] sm:$0xff] %v3627_v14  ;;  %v3340_v5 = vpack.c.bf16 %v3330_v13, %v3330_v13  ;;  %v3297_v15 = vmul.f32 %v3275_v43, %v6338_v6 }
 0x3cc   : > { %v3323_v35 = vmax.f32 %v3311_v37, 0.0  ;;  %v3626_v61 = vld [vmem:[#allocation2 + $0xc] sm:$0xf] }
 0x3cd   : > { %3348 = vst [vmem:[#allocation2 + $0x20] sm:$0xf] %v3340_v5  ;;  %v3309_v25 = vadd.f32 %v3297_v15, %v6342_v8  ;;  %v3558_v5 = vld [vmem:[#allocation2 + $0x8] sm:$0xff] }
 0x3ce   : > { %v3335_v42 = vmul.f32 %v3323_v35, %v6373_v63  ;;  %v3247_v55 = vpop.f32.mrf.mxu3  ;;  %3634 = vst [vmem:[#allocation4 + $0xc8] sm:$0xf] %v3626_v61  ;;  %v7238_v35 = vld [vmem:[#allocation2 + $0xc] sm:$0xff] }
 0x3cf   : > { %v3321_v62 = vmax.f32 %v3309_v25, 0.0 }
 0x3d0   : > { %v7197_v39 = vpack.c.bf16 %v3335_v42, %v3334_v29  ;;  %v3276_v58 = vpop.f32.mrf.mxu0 }
 0x3d1   : > { %v3629_v28 = vld [vmem:[#allocation2 + $0x2c] sm:$0xff]  ;;  %v3333_v6 = vmul.f32 %v3321_v62, %v6361_v34  ;;  %v3277_v8 = vadd.f32 %v3276_v58, %v3247_v55 }
 0x3d2   : > { %3351 = vst [vmem:[#allocation2 + $0x40] sm:$0xff] %v7197_v39  ;;  %3509 = vrot.lane.b32.xlu1 %v7199_v45, %s5988_s13  ;;  %3441 = vrot.lane.b32.xlu2 %v7199_v45, %s5989_s14 }
 0x3d3   : > { %3577 = vrot.lane.b32.xlu0 %v7199_v45, %s5987_s12  ;;  %3637 = vst [vmem:[#allocation4 + $0xd8] sm:$0xff] %v3629_v28  ;;  %v3342_v1 = vpack.c.bf16 %v3333_v6, %v3333_v6  ;;  %v3300_v24 = vmul.f32 %v3277_v8, %v6346_v10 }
 0x3d4   : > { %v3628_v47 = vld [vmem:[#allocation2 + $0x20] sm:$0xf] }
 0x3d5   : > { %3350 = vst [vmem:[#allocation2 + $0x34] sm:$0xf] %v3342_v1  ;;  %v3312_v38 = vadd.f32 %v3300_v24, %v6348_v11  ;;  %v3425_v11 = vld [vmem:[#allocation2 + $0x28] sm:$0xff]  ;;  %v3492_v15 = vld [vmem:[#allocation2 + $0x1c] sm:$0xff] }
 0x3d6   : > { %3636 = vst [vmem:[#allocation4 + $0xd4] sm:$0xf] %v3628_v47  ;;  %v7249_v61 = vld [vmem:[#allocation2 + $0x20] sm:$0xff] }
 0x3d7   : > { %v3324_v18 = vmax.f32 %v3312_v38, 0.0 }
 0x3d9   : > { %v3631_v17 = vld [vmem:[#allocation2 + $0x40] sm:$0xff]  ;;  %v3336_v14 = vmul.f32 %v3324_v18, %v6361_v34 }
 0x3da   : > { %3729 = vrot.lane.b32.xlu1 %v7161_v4, %s5985_s10  ;;  %3801 = vrot.lane.b32.xlu2 %v7181_v46, %s5984_s9  ;;  %3639 = vst [vmem:[#allocation4 + $0xe4] sm:$0xff] %v3631_v17  ;;  %v3563_v43 = vld [vmem:[#allocation2 + $0x3c] sm:$0xff] }
 0x3db   : > { %3797 = vrot.lane.b32.xlu0 %v7161_v4, %s5984_s9  ;;  %v3344_v10 = vpack.c.bf16 %v3336_v14, %v3336_v14 }
 0x3dc   : > { %v3630_v13 = vld [vmem:[#allocation2 + $0x34] sm:$0xf] }
 0x3dd   : > { %3352 = vst [vmem:[#allocation2 + $0x48] sm:$0xf] %v3344_v10  ;;  %v3426_v42 = vld [vmem:[#allocation2 + $0x30] sm:$0xff] }
 0x3de   : > { %3638 = vst [vmem:[#allocation4 + $0xe0] sm:$0xf] %v3630_v13  ;;  %v3782_v25 = vld [vmem:[#allocation2 + $0x34] sm:$0xff] }
 0x3e2   : > { %3445 = vrot.lane.b32.xlu1 %v3425_v11, %s5989_s14  ;;  %3377 = vrot.lane.b32.xlu2 %v3425_v11, %s5990_s15 }
 0x3e3   : > { %3581 = vrot.lane.b32.xlu0 %v3425_v11, %s5987_s12 }
 0x3e4   : > { %v3632_v37 = vld [vmem:[#allocation2 + $0x48] sm:$0xf] }
 0x3e5   : > { %3640 = vst [vmem:[#allocation4 + $0xec] sm:$0xf] %v3632_v37  ;;  %v3784_v58 = vld [vmem:[#allocation2 + $0x48] sm:$0xff] }
 0x3e6   : > { %v3564_v28 = vld [vmem:[#allocation2 + $0x44] sm:$0xff] }
 0x3ea   : > { %3665 = vrot.lane.b32.xlu1 %v7181_v46, %s5986_s11  ;;  %3585 = vrot.lane.b32.xlu2 %v3563_v43, %s5987_s12 }
 0x3eb   : > { %3513 = vrot.lane.b32.xlu0 %v3425_v11, %s5988_s13 }
 0x3f2   : > { %3805 = vrot.lane.b32.xlu1 %v7197_v39, %s5984_s9  ;;  %3517 = vrot.lane.b32.xlu2 %v3563_v43, %s5988_s13 }
 0x3f3   : > { %3733 = vrot.lane.b32.xlu0 %v7181_v46, %s5985_s10 }
 0x3fa   : > { %3381 = vrot.lane.b32.xlu1 %v3563_v43, %s5990_s15  ;;  %3737 = vrot.lane.b32.xlu2 %v7197_v39, %s5985_s10 }
 0x3fb   : > { %3449 = vrot.lane.b32.xlu0 %v3563_v43, %s5989_s14 }
 0x402   : > { %3575 = vrot.lane.b32.xlu2 %v3558_v5, %s5987_s12  ;;  %3439 = vrot.lane.b32.xlu1 %v3558_v5, %s5989_s14 }
 0x403   : > { %3669 = vrot.lane.b32.xlu0 %v7197_v39, %s5986_s11 }
 0x40a   : > { %3795 = vrot.lane.b32.xlu2 %v7238_v35, %s5984_s9  ;;  %3659 = vrot.lane.b32.xlu1 %v7238_v35, %s5986_s11 }
 0x40b   : > { %3507 = vrot.lane.b32.xlu0 %v3558_v5, %s5988_s13 }
 0x412   : > { %3511 = vrot.lane.b32.xlu2 %v3492_v15, %s5988_s13  ;;  %3579 = vrot.lane.b32.xlu1 %v3492_v15, %s5987_s12 }
 0x413   : > { %3727 = vrot.lane.b32.xlu0 %v7238_v35, %s5985_s10 }
 0x41a   : > { %3731 = vrot.lane.b32.xlu2 %v7249_v61, %s5985_s10  ;;  %3799 = vrot.lane.b32.xlu1 %v7249_v61, %s5984_s9 }
 0x41b   : > { %3443 = vrot.lane.b32.xlu0 %v3492_v15, %s5989_s14 }
 0x41c   : > { %v7256_v29 = vpop.permute.xlu2 %3505 }
 0x422   : > { %3447 = vrot.lane.b32.xlu2 %v3426_v42, %s5989_s14  ;;  %3583 = vrot.lane.b32.xlu1 %v3426_v42, %s5987_s12 }
 0x423   : > { %3803 = vrot.lane.b32.xlu0 %v3782_v25, %s5984_s9 }
 0x424   : > { %v7261_v55 = vpop.permute.xlu2 %3725 }
 0x42a   : > { %3667 = vrot.lane.b32.xlu2 %v3782_v25, %s5986_s11  ;;  %3515 = vrot.lane.b32.xlu1 %v3426_v42, %s5988_s13 }
 0x42b   : > { %3379 = vrot.lane.b32.xlu0 %v3426_v42, %s5990_s15 }
 0x42c   : > { %v7266_v62 = vpop.permute.xlu2 %3441 }
 0x432   : > { %3807 = vrot.lane.b32.xlu2 %v3784_v58, %s5984_s9  ;;  %3735 = vrot.lane.b32.xlu1 %v3782_v25, %s5985_s10  ;;  %s5996_s9 = smov 2  }
 0x433   : > { %3587 = vrot.lane.b32.xlu0 %v3564_v28, %s5987_s12 }
 0x434   : > { %v3574_v6 = vpop.permute.xlu1 %3573  ;;  %v7271_v8 = vpop.permute.xlu2 %3801 }
 0x435   : > { %v7273_v1 = vpop.permute.xlu0 %3437 }
 0x43a   : > { %3661 = vrot.lane.b32.xlu2 %v7161_v4, %s5986_s11  ;;  %3369 = vrot.lane.b32.xlu1 %v7165_v53, %s5990_s15  ;;  %v8101_v53 = vmov 2  }
 0x43b   : > { %3519 = vrot.lane.b32.xlu0 %v3564_v28, %s5988_s13  ;;  %5920 = vset.pattern.permute.xlu2 %v8101_v53 }
 0x43c   : > { %v3794_v24 = vpop.permute.xlu1 %3793  ;;  %v7280_v47 = vpop.permute.xlu2 %3377  ;;  %5919 = vset.pattern.permute.xlu1 %v8101_v53  ;;  %5921 = vset.pattern.permute.xlu0 %v8101_v53 }
 0x43d   : > { %v7282_v38 = vpop.permute.xlu0 %3657 }
 0x442   : > { %3383 = vrot.lane.b32.xlu2 %v3564_v28, %s5990_s15  ;;  %3451 = vrot.lane.b32.xlu1 %v3564_v28, %s5989_s14 }
 0x443   : > { %3739 = vrot.lane.b32.xlu0 %v3784_v58, %s5985_s10 }
 0x444   : > { %v3510_v18 = vpop.permute.xlu1 %3509  ;;  %v7287_v17 = vpop.permute.xlu2 %3585 }
 0x445   : > { %v7289_v14 = vpop.permute.xlu0 %3577 }
 0x44a   : > { %3371 = vrot.lane.b32.xlu2 %v3558_v5, %s5990_s15  ;;  %3671 = vrot.lane.b32.xlu1 %v3784_v58, %s5986_s11 }
 0x44b   : > { %3663 = vrot.lane.b32.xlu0 %v7249_v61, %s5986_s11 }
 0x44c   : > { %v7296_v10 = vpop.permute.xlu1 %3729  ;;  %v7298_v13 = vpop.permute.xlu2 %3517 }
 0x44d   : > { %v7302_v11 = vpop.permute.xlu0 %3797 }
 0x452   : > { %3869 = vrot.lane.b32.xlu2 %v7181_v46, %s5983_s8  ;;  %3375 = vrot.lane.b32.xlu1 %v3492_v15, %s5990_s15  ;;  %v3589_v15 = vrot.slane %v3574_v6, 4 }
 0x453   : > { %3373 = vrot.lane.b32.xlu0 %v7199_v45, %s5990_s15 }
 0x454   : > { %v7309_v37 = vpop.permute.xlu1 %3445  ;;  %v7311_v43 = vpop.permute.xlu2 %3737 }
 0x455   : > { %v7313_v5 = vpop.permute.xlu0 %3581 }
 0x45a   : > { %3875 = vrot.lane.b32.xlu2 %v3784_v58, %s5983_s8  ;;  %3873 = vrot.lane.b32.xlu1 %v7197_v39, %s5983_s8  ;;  %v3809_v58 = vrot.slane %v3794_v24, 4 }
 0x45b   : > { %3871 = vrot.lane.b32.xlu0 %v3782_v25, %s5983_s8 }
 0x45c   : > { %v7319_v42 = vpop.permute.xlu1 %3665  ;;  %v3576_v46 = vpop.permute.xlu2 %3575 }
 0x45d   : > { %v3590_v28 = vrot.slane %v3576_v46, 4  ;;  %v7321_v53 = vpop.permute.xlu0 %3513 }
 0x45f   : > { %v3597_v45 = vsel %vm326_vm0, %v3589_v15, %v3590_v28  ;;  %v3599_v44 = vsel %vm433_vm4, %v3576_v46, %v3590_v28  ;;  %v3523_v28 = vrot.slane %v3510_v18, 4 }
 0x460   : > { %v3598_v23 = vsel %vm433_vm4, %v3574_v6, %v3597_v45  ;;  %3618 = vst [vmem:[#allocation4 + $0x98] sm:$0xf] %v3599_v44 }
 0x461   : > { %3617 = vst [vmem:[#allocation4 + $0x90] sm:$0xff] %v3598_v23 }
 0x462   : > { %3865 = vrot.lane.b32.xlu2 %v7161_v4, %s5983_s8  ;;  %3863 = vrot.lane.b32.xlu1 %v7238_v35, %s5983_s8  ;;  %v5967_v4 = vld [vmem:[%s8097_s4 + $0x8] sm:$0xff] }
 0x463   : > { %3861 = vrot.lane.b32.xlu0 %v7150_v50, %s5983_s8  ;;  %v5968_v50 = vld [vmem:[%s8097_s4] sm:$0xff] }
 0x464   : > { %v7332_v39 = vpop.permute.xlu1 %3805  ;;  %v3796_v25 = vpop.permute.xlu2 %3795 }
 0x465   : > { %v3810_v15 = vrot.slane %v3796_v25, 4  ;;  %v7334_v2 = vpop.permute.xlu0 %3733 }
 0x467   : > { %v3817_v6 = vsel %vm326_vm0, %v3809_v58, %v3810_v15  ;;  %v3819_v23 = vsel %vm546_vm1, %v3796_v25, %v3810_v15 }
 0x468   : > { %v3818_v44 = vsel %vm546_vm1, %v3794_v24, %v3817_v6  ;;  %3838 = vst [vmem:[#allocation4 + $0x158] sm:$0xf] %v3819_v23  ;;  %v5994_v6 = vmov 3  }
 0x469   : > { %3837 = vst [vmem:[#allocation4 + $0x150] sm:$0xff] %v3818_v44 }
 0x46a   : > { %2254 = vperm.xlu2 %5920, %v5967_v4   ;;  %2250 = vperm.xlu1 %5919, %v5968_v50  }
 0x46b   : > { %3867 = vrot.lane.b32.xlu0 %v7249_v61, %s5983_s8  ;;  %v5969_v61 = vld [vmem:[%s8097_s4 + $0x10] sm:$0xff] }
 0x46c   : > { %v7347_v35 = vpop.permute.xlu1 %3381  ;;  %v3512_v46 = vpop.permute.xlu2 %3511 }
 0x46d   : > { %v3524_v24 = vrot.slane %v3512_v46, 4  ;;  %v7349_v45 = vpop.permute.xlu0 %3449 }
 0x46f   : > { %v3532_v25 = vsel %vm326_vm0, %v3523_v28, %v3524_v24  ;;  %v3534_v58 = vsel %vm398_vm7, %v3512_v46, %v3524_v24  ;;  %v3453_v28 = vrot.slane %v7273_v1, 4  ;;  %v3743_v46 = vrot.slane %v7296_v10, 4 }
 0x470   : > { %v3533_v15 = vsel %vm398_vm7, %v3510_v18, %v3532_v25  ;;  %3552 = vst [vmem:[#allocation4 + $0x74] sm:$0xf] %v3534_v58 }
 0x471   : > { %3551 = vst [vmem:[#allocation4 + $0x6c] sm:$0xff] %v3533_v15 }
 0x472   : > { %5923 = vset.pattern.permute.xlu2 %v5994_v6  ;;  %5922 = vset.pattern.permute.xlu1 %v5994_v6 }
 0x473   : > { %2258 = vperm.xlu0 %5921, %v5969_v61   ;;  %2282 = vperm.xlu2 %5923, %v5967_v4  }
 0x474   : > { %2278 = vperm.xlu1 %5922, %v5968_v50   ;;  %v3732_v23 = vpop.permute.xlu2 %3731  ;;  %v3440_v44 = vpop.permute.xlu1 %3439 }
 0x475   : > { %v3744_v24 = vrot.slane %v3732_v23, 4  ;;  %v3454_v18 = vrot.slane %v3440_v44, 4  ;;  %v7359_v25 = vpop.permute.xlu0 %3669 }
 0x477   : > { %v3752_v58 = vsel %vm326_vm0, %v3743_v46, %v3744_v24  ;;  %v3754_v15 = vsel %vm511_vm2, %v3732_v23, %v3744_v24  ;;  %v3461_v36 = vsel %vm326_vm0, %v3453_v28, %v3454_v18  ;;  %v3463_v33 = vsel %vm363_vm9, %v3440_v44, %v3454_v18  ;;  %v5970_v28 = vld [vmem:[%s8097_s4 + $0x18] sm:$0xff] }
 0x478   : > { %v3753_v4 = vsel %vm511_vm2, %v7296_v10, %v3752_v58  ;;  %3772 = vst [vmem:[#allocation4 + $0x134] sm:$0xf] %v3754_v15  ;;  %v3462_v50 = vsel %vm363_vm9, %v7273_v1, %v3461_v36  ;;  %v3673_v10 = vrot.slane %v7282_v38, 4  ;;  %v3457_v36 = vrot.slane %v7309_v37, 4 }
 0x479   : > { %3771 = vst [vmem:[#allocation4 + $0x12c] sm:$0xff] %v3753_v4 }
 0x47a   : > { %3481 = vst [vmem:[#allocation4 + $0x30] sm:$0xff] %v3462_v50 }
 0x47b   : > { %3482 = vst [vmem:[#allocation4 + $0x38] sm:$0xf] %v3463_v33  ;;  %5925 = vset.pattern.permute.xlu0 %v5994_v6  ;;  %2286 = vperm.xlu2 %5923, %v5969_v61   ;;  %v3521_v33 = vrot.slane %v7256_v29, 4 }
 0x47c   : > { %5924 = vset.pattern.permute.xlu1 %v8130_v52  ;;  %v3448_v46 = vpop.permute.xlu2 %3447  ;;  %v3660_v23 = vpop.permute.xlu1 %3659  ;;  %2290 = vperm.xlu0 %5925, %v5970_v28  }
 0x47d   : > { %v3458_v1 = vrot.slane %v3448_v46, 4  ;;  %v3674_v44 = vrot.slane %v3660_v23, 4  ;;  %v3508_v24 = vpop.permute.xlu0 %3507  ;;  %2262 = vperm.xlu1 %5924, %v5970_v28  }
 0x47e   : > { %v3522_v6 = vrot.slane %v3508_v24, 4 }
 0x47f   : > { %v3467_v52 = vsel %vm326_vm0, %v3457_v36, %v3458_v1  ;;  %v3469_v61 = vsel %vm363_vm9, %v3448_v46, %v3458_v1  ;;  %v3681_v18 = vsel %vm326_vm0, %v3673_v10, %v3674_v44  ;;  %v3683_v4 = vsel %vm476_vm6, %v3660_v23, %v3674_v44 }
 0x480   : > { %v3468_v58 = vsel %vm363_vm9, %v7309_v37, %v3467_v52  ;;  %3486 = vst [vmem:[#allocation4 + $0x50] sm:$0xf] %v3469_v61  ;;  %v3682_v15 = vsel %vm476_vm6, %v7282_v38, %v3681_v18  ;;  %v3529_v50 = vsel %vm326_vm0, %v3521_v33, %v3522_v6  ;;  %v3531_v46 = vsel %vm398_vm7, %v3508_v24, %v3522_v6 }
 0x481   : > { %3485 = vst [vmem:[#allocation4 + $0x48] sm:$0xff] %v3468_v58  ;;  %v3530_v28 = vsel %vm398_vm7, %v7256_v29, %v3529_v50  ;;  %v3591_v37 = vrot.slane %v7289_v14, 4  ;;  %v3677_v1 = vrot.slane %v7319_v42, 4  ;;  %v3741_v33 = vrot.slane %v7261_v55, 4 }
 0x482   : > { %3701 = vst [vmem:[#allocation4 + $0xf0] sm:$0xff] %v3682_v15 }
 0x483   : > { %3702 = vst [vmem:[#allocation4 + $0xf8] sm:$0xf] %v3683_v4 }
 0x484   : > { %3549 = vst [vmem:[#allocation4 + $0x60] sm:$0xff] %v3530_v28  ;;  %v3668_v10 = vpop.permute.xlu2 %3667  ;;  %v3580_v36 = vpop.permute.xlu1 %3579 }
 0x485   : > { %3550 = vst [vmem:[#allocation4 + $0x68] sm:$0xf] %v3531_v46  ;;  %v3678_v38 = vrot.slane %v3668_v10, 4  ;;  %v3592_v23 = vrot.slane %v3580_v36, 4  ;;  %v3728_v44 = vpop.permute.xlu0 %3727 }
 0x486   : > { %v3742_v52 = vrot.slane %v3728_v44, 4 }
 0x487   : > { %v3687_v29 = vsel %vm326_vm0, %v3677_v1, %v3678_v38  ;;  %v3689_v61 = vsel %vm476_vm6, %v3668_v10, %v3678_v38  ;;  %v3600_v24 = vsel %vm326_vm0, %v3591_v37, %v3592_v23  ;;  %v3602_v58 = vsel %vm433_vm4, %v3580_v36, %v3592_v23 }
 0x488   : > { %v3688_v6 = vsel %vm476_vm6, %v7319_v42, %v3687_v29  ;;  %3706 = vst [vmem:[#allocation4 + $0x110] sm:$0xf] %v3689_v61  ;;  %v3601_v18 = vsel %vm433_vm4, %v7289_v14, %v3600_v24  ;;  %v3749_v15 = vsel %vm326_vm0, %v3741_v33, %v3742_v52  ;;  %v3751_v50 = vsel %vm511_vm2, %v3728_v44, %v3742_v52 }
 0x489   : > { %3705 = vst [vmem:[#allocation4 + $0x108] sm:$0xff] %v3688_v6  ;;  %v3750_v4 = vsel %vm511_vm2, %v7261_v55, %v3749_v15  ;;  %v3811_v42 = vrot.slane %v7302_v11, 4  ;;  %v3815_v10 = vrot.slane %v7332_v39, 4  ;;  %v3455_v1 = vrot.slane %v7266_v62, 4 }
 0x48a   : > { %3619 = vst [vmem:[#allocation4 + $0x9c] sm:$0xff] %v3601_v18 }
 0x48b   : > { %3620 = vst [vmem:[#allocation4 + $0xa4] sm:$0xf] %v3602_v58  ;;  %v3593_v58 = vrot.slane %v7313_v5, 4 }
 0x48c   : > { %3769 = vst [vmem:[#allocation4 + $0x120] sm:$0xff] %v3750_v4  ;;  %v3808_v28 = vpop.permute.xlu2 %3807  ;;  %v3800_v46 = vpop.permute.xlu1 %3799  ;;  %v3813_v4 = vrot.slane %v7271_v8, 4 }
 0x48d   : > { %3770 = vst [vmem:[#allocation4 + $0x128] sm:$0xf] %v3751_v50  ;;  %v3816_v14 = vrot.slane %v3808_v28, 4  ;;  %v3812_v36 = vrot.slane %v3800_v46, 4  ;;  %v3444_v37 = vpop.permute.xlu0 %3443 }
 0x48e   : > { %v3456_v38 = vrot.slane %v3444_v37, 4 }
 0x48f   : > { %v3826_v55 = vsel %vm326_vm0, %v3815_v10, %v3816_v14  ;;  %v3828_v23 = vsel %vm546_vm1, %v3808_v28, %v3816_v14  ;;  %v3820_v44 = vsel %vm326_vm0, %v3811_v42, %v3812_v36  ;;  %v3822_v29 = vsel %vm546_vm1, %v3800_v46, %v3812_v36 }
 0x490   : > { %v3827_v33 = vsel %vm546_vm1, %v7332_v39, %v3826_v55  ;;  %3844 = vst [vmem:[#allocation4 + $0x17c] sm:$0xf] %v3828_v23  ;;  %v3821_v52 = vsel %vm546_vm1, %v7302_v11, %v3820_v44  ;;  %v3464_v61 = vsel %vm326_vm0, %v3455_v1, %v3456_v38  ;;  %v3466_v6 = vsel %vm363_vm9, %v3444_v37, %v3456_v38 }
 0x491   : > { %3843 = vst [vmem:[#allocation4 + $0x174] sm:$0xff] %v3827_v33  ;;  %v3465_v24 = vsel %vm363_vm9, %v7266_v62, %v3464_v61  ;;  %v3525_v1 = vrot.slane %v7321_v53, 4  ;;  %v3391_v38 = vrot.slane %v7347_v35, 4  ;;  %v3389_v44 = vrot.slane %v7280_v47, 4 }
 0x492   : > { %3839 = vst [vmem:[#allocation4 + $0x15c] sm:$0xff] %v3821_v52 }
 0x493   : > { %3840 = vst [vmem:[#allocation4 + $0x164] sm:$0xf] %v3822_v29 }
 0x494   : > { %3483 = vst [vmem:[#allocation4 + $0x3c] sm:$0xff] %v3465_v24  ;;  %v7418_v18 = vpop.permute.xlu2 %3661  ;;  %v3584_v39 = vpop.permute.xlu1 %3583 }
 0x495   : > { %3484 = vst [vmem:[#allocation4 + $0x44] sm:$0xf] %v3466_v6  ;;  %v3594_v11 = vrot.slane %v3584_v39, 4  ;;  %v3804_v15 = vpop.permute.xlu0 %3803 }
 0x496   : > { %v3814_v50 = vrot.slane %v3804_v15, 4 }
 0x497   : > { %v3603_v28 = vsel %vm326_vm0, %v3593_v58, %v3594_v11  ;;  %v3605_v62 = vsel %vm433_vm4, %v3584_v39, %v3594_v11 }
 0x498   : > { %v3604_v46 = vsel %vm433_vm4, %v7313_v5, %v3603_v28  ;;  %3622 = vst [vmem:[#allocation4 + $0xb0] sm:$0xf] %v3605_v62  ;;  %v3823_v42 = vsel %vm326_vm0, %v3813_v4, %v3814_v50  ;;  %v3825_v10 = vsel %vm546_vm1, %v3804_v15, %v3814_v50  ;;  %v5876_v58 = vld [vmem:[#allocation4 + $0x170] sm:$0xf0]  ;;  %v5638_v11 = vld [vmem:[#allocation4 + $0x174] sm:$0xf0] }
 0x499   : > { %3621 = vst [vmem:[#allocation4 + $0xa8] sm:$0xff] %v3604_v46  ;;  %v3824_v14 = vsel %vm546_vm1, %v7271_v8, %v3823_v42  ;;  %v5873_v46 = vld [vmem:[#allocation4 + $0x158] sm:$0xf0]  ;;  %v3745_v42 = vrot.slane %v7334_v2, 4 }
 0x49a   : > { %3841 = vst [vmem:[#allocation4 + $0x168] sm:$0xff] %v3824_v14 }
 0x49b   : > { %3842 = vst [vmem:[#allocation4 + $0x170] sm:$0xf] %v3825_v10 }
 0x49c   : > { %v3384_v36 = vpop.permute.xlu2 %3383  ;;  %v3516_v37 = vpop.permute.xlu1 %3515 }
 0x49d   : > { %v3392_v55 = vrot.slane %v3384_v36, 4  ;;  %v3526_v23 = vrot.slane %v3516_v37, 4  ;;  %v3380_v5 = vpop.permute.xlu0 %3379 }
 0x49e   : > { %v3390_v33 = vrot.slane %v3380_v5, 4 }
 0x49f   : > { %v3402_v52 = vsel %vm326_vm0, %v3391_v38, %v3392_v55  ;;  %v3404_v29 = vsel %vm328_vm8, %v3384_v36, %v3392_v55  ;;  %v3535_v8 = vsel %vm326_vm0, %v3525_v1, %v3526_v23  ;;  %v3537_v6 = vsel %vm398_vm7, %v3516_v37, %v3526_v23  ;;  %v5624_v36 = vld [vmem:[#allocation4 + $0x150] sm:$0xf]  ;;  %v5872_v38 = vld [vmem:[#allocation4 + $0x154] sm:$0xf] }
 0x4a0   : > { %v3403_v61 = vsel %vm328_vm8, %v7347_v35, %v3402_v52  ;;  %3420 = vst [vmem:[#allocation4 + $0x2c] sm:$0xf] %v3404_v29  ;;  %v3536_v24 = vsel %vm398_vm7, %v7321_v53, %v3535_v8  ;;  %v3399_v39 = vsel %vm326_vm0, %v3389_v44, %v3390_v33  ;;  %v3401_v28 = vsel %vm328_vm8, %v3380_v5, %v3390_v33  ;;  %v5626_v53 = vld [vmem:[#allocation4 + $0x15c] sm:$0xf0] }
 0x4a1   : > { %3419 = vst [vmem:[#allocation4 + $0x24] sm:$0xff] %v3403_v61  ;;  %v3400_v15 = vsel %vm328_vm8, %v7280_v47, %v3399_v39  ;;  %v5636_v4 = vld [vmem:[#allocation4 + $0x168] sm:$0xf]  ;;  %v5875_v50 = vld [vmem:[#allocation4 + $0x16c] sm:$0xf]  ;;  %v3595_v55 = vrot.slane %v7287_v17, 4  ;;  %v5625_v5 = vor.u32 %v5873_v46, %v5624_v36  ;;  %v5629_v44 = vor.u32 %v5872_v38, %v5626_v53 }
 0x4a2   : > { %3553 = vst [vmem:[#allocation4 + $0x78] sm:$0xff] %v3536_v24  ;;  %v5637_v35 = vor.u32 %v5876_v58, %v5636_v4  ;;  %v5641_v62 = vor.u32 %v5875_v50, %v5638_v11  ;;  %v5540_v46 = vld [vmem:[#allocation4 + $0xa8] sm:$0xf] }
 0x4a3   : > { %3554 = vst [vmem:[#allocation4 + $0x80] sm:$0xf] %v3537_v6 }
 0x4a4   : > { %3417 = vst [vmem:[#allocation4 + $0x18] sm:$0xff] %v3400_v15  ;;  %4336 = vmatpush.bf16.msrb.mxu1 %v5637_v35  ;;  %4393 = vmatpush.bf16.msrb.mxu3 %v5641_v62  ;;  %v3736_v10 = vpop.permute.xlu1 %3735  ;;  %v3372_v14 = vpop.permute.xlu2 %3371  ;;  %v3527_v15 = vrot.slane %v7298_v13, 4 }
 0x4a5   : > { %3418 = vst [vmem:[#allocation4 + $0x20] sm:$0xf] %v3401_v28  ;;  %v3746_v47 = vrot.slane %v3736_v10, 4  ;;  %v3588_v37 = vpop.permute.xlu0 %3587  ;;  %v3386_v1 = vrot.slane %v3372_v14, 4 }
 0x4a6   : > { %v3596_v23 = vrot.slane %v3588_v37, 4 }
 0x4a7   : > { %v3755_v33 = vsel %vm326_vm0, %v3745_v42, %v3746_v47  ;;  %v3757_v52 = vsel %vm511_vm2, %v3736_v10, %v3746_v47  ;;  %v3395_v6 = vsel %vm328_vm8, %v3372_v14, %v3386_v1  ;;  %v5849_v10 = vld [vmem:[#allocation4 + $0x98] sm:$0xf0]  ;;  %v3459_v47 = vrot.slane %v7349_v45, 4 }
 0x4a8   : > { %v3756_v29 = vsel %vm511_vm2, %v7334_v2, %v3755_v33  ;;  %3774 = vst [vmem:[#allocation4 + $0x140] sm:$0xf] %v3757_v52  ;;  %v3606_v8 = vsel %vm326_vm0, %v3595_v55, %v3596_v23  ;;  %v3608_v61 = vsel %vm433_vm4, %v3588_v37, %v3596_v23  ;;  %4337 = vmatpush.bf16.msrb.mxu1 %v5625_v5  ;;  %v5528_v55 = vld [vmem:[#allocation4 + $0x90] sm:$0xf] }
 0x4a9   : > { %4394 = vmatpush.bf16.msrb.mxu3 %v5629_v44  ;;  %3773 = vst [vmem:[#allocation4 + $0x138] sm:$0xff] %v3756_v29  ;;  %v3607_v24 = vsel %vm433_vm4, %v7287_v17, %v3606_v8  ;;  %v5529_v5 = vor.u32 %v5849_v10, %v5528_v55 }
 0x4aa   : > { %3623 = vst [vmem:[#allocation4 + $0xb4] sm:$0xff] %v3607_v24 }
 0x4ab   : > { %3624 = vst [vmem:[#allocation4 + $0xbc] sm:$0xf] %v3608_v61 }
 0x4ac   : > { %3414 = vst [vmem:[#allocation4 + $0x8] sm:$0xf] %v3395_v6  ;;  %v7456_v39 = vpop.permute.xlu2 %3869  ;;  %v3370_v58 = vpop.permute.xlu1 %3369  ;;  %v5516_v6 = vld [vmem:[#allocation4 + $0x78] sm:$0xf] }
 0x4ad   : > { %v3520_v2 = vpop.permute.xlu0 %3519  ;;  %v3385_v11 = vrot.slane %v3370_v58, 4 }
 0x4ae   : > { %v3528_v4 = vrot.slane %v3520_v2, 4 }
 0x4af   : > { %v3393_v50 = vsel %vm326_vm0, %v3385_v11, %v3386_v1  ;;  %v5504_v11 = vld [vmem:[#allocation4 + $0x60] sm:$0xf] }
 0x4b0   : > { %v3538_v28 = vsel %vm326_vm0, %v3527_v15, %v3528_v4  ;;  %v3540_v35 = vsel %vm398_vm7, %v3520_v2, %v3528_v4  ;;  %v3394_v17 = vsel %vm328_vm8, %v3370_v58, %v3393_v50 }
 0x4b1   : > { %v3539_v62 = vsel %vm398_vm7, %v7298_v13, %v3538_v28  ;;  %3556 = vst [vmem:[#allocation4 + $0x8c] sm:$0xf] %v3540_v35  ;;  %v5852_v53 = vld [vmem:[#allocation4 + $0xb0] sm:$0xf0]  ;;  %v3747_v13 = vrot.slane %v7311_v43, 4 }
 0x4b2   : > { %3555 = vst [vmem:[#allocation4 + $0x84] sm:$0xff] %v3539_v62  ;;  %v5541_v42 = vor.u32 %v5852_v53, %v5540_v46  ;;  %v5843_v35 = vld [vmem:[#allocation4 + $0x68] sm:$0xf0] }
 0x4b3   : > { %3413 = vst [vmem:[#allocation4] sm:$0xff] %v3394_v17  ;;  %v5505_v62 = vor.u32 %v5843_v35, %v5504_v11  ;;  %v5602_v11 = vld [vmem:[#allocation4 + $0x12c] sm:$0xf0] }
 0x4b4   : > { %4317 = vmatpush.bf16.msrb.mxu2 %v5541_v42  ;;  %v7465_v14 = vpop.permute.xlu2 %3875  ;;  %v3452_v36 = vpop.permute.xlu1 %3451 }
 0x4b5   : > { %v3740_v37 = vpop.permute.xlu0 %3739  ;;  %v3884_v1 = vrot.slane %v7465_v14, 4  ;;  %v3460_v38 = vrot.slane %v3452_v36, 4 }
 0x4b6   : > { %v3748_v23 = vrot.slane %v3740_v37, 4 }
 0x4b7   : > { %v3896_v44 = vsel %vm581_vm3, %v7465_v14, %v3884_v1  ;;  %v3470_v33 = vsel %vm326_vm0, %v3459_v47, %v3460_v38  ;;  %v3472_v24 = vsel %vm363_vm9, %v3452_v36, %v3460_v38  ;;  %v5612_v47 = vld [vmem:[#allocation4 + $0x138] sm:$0xf] }
 0x4b8   : > { %v3758_v52 = vsel %vm326_vm0, %v3747_v13, %v3748_v23  ;;  %v3760_v29 = vsel %vm511_vm2, %v3740_v37, %v3748_v23  ;;  %3912 = vst [vmem:[#allocation4 + $0x1ac] sm:$0xf] %v3896_v44  ;;  %v3471_v8 = vsel %vm363_vm9, %v7349_v45, %v3470_v33  ;;  %4318 = vmatpush.bf16.msrb.mxu2 %v5529_v5  ;;  %v3679_v45 = vrot.slane %v7359_v25, 4  ;;  %v5869_v37 = vld [vmem:[#allocation4 + $0x13c] sm:$0xf] }
 0x4b9   : > { %v3759_v61 = vsel %vm511_vm2, %v7311_v43, %v3758_v52  ;;  %3776 = vst [vmem:[#allocation4 + $0x14c] sm:$0xf] %v3760_v29  ;;  %v5846_v58 = vld [vmem:[#allocation4 + $0x80] sm:$0xf0]  ;;  %v3675_v43 = vrot.slane %v7418_v18, 4 }
 0x4ba   : > { %3775 = vst [vmem:[#allocation4 + $0x144] sm:$0xff] %v3759_v61  ;;  %v5517_v2 = vor.u32 %v5846_v58, %v5516_v6  ;;  %v5492_v23 = vld [vmem:[#allocation4 + $0x48] sm:$0xf]  ;;  %v5600_v29 = vld [vmem:[#allocation4 + $0x120] sm:$0xf] }
 0x4bb   : > { %3487 = vst [vmem:[#allocation4 + $0x54] sm:$0xff] %v3471_v8  ;;  %v5866_v8 = vld [vmem:[#allocation4 + $0x124] sm:$0xf]  ;;  %v5432_v14 = vld [vmem:[%s8096_s3] sm:$0xf] }
 0x4bc   : > { %3488 = vst [vmem:[#allocation4 + $0x5c] sm:$0xf] %v3472_v24  ;;  %4319 = vmatpush.bf16.msrb.mxu2 %v5517_v2  ;;  %v7482_v15 = vpop.permute.xlu2 %3865  ;;  %v3672_v4 = vpop.permute.xlu1 %3671  ;;  %v5837_v24 = vld [vmem:[#allocation4 + $0x38] sm:$0xf0]  ;;  %v5867_v2 = vld [vmem:[#allocation4 + $0x128] sm:$0xf0]  ;;  %v5605_v35 = vor.u32 %v5866_v8, %v5602_v11 }
 0x4bd   : > { %v3664_v50 = vpop.permute.xlu0 %3663  ;;  %v3680_v28 = vrot.slane %v3672_v4, 4 }
 0x4be   : > { %v3676_v17 = vrot.slane %v3664_v50, 4 }
 0x4bf   : > { %v3690_v46 = vsel %vm326_vm0, %v3679_v45, %v3680_v28  ;;  %v3692_v53 = vsel %vm476_vm6, %v3672_v4, %v3680_v28  ;;  %v2166_v4 = vadd.f32 %v7109_v3, %v7118_v48  ;;  %v5601_v28 = vor.u32 %v5867_v2, %v5600_v29 }
 0x4c0   : > { %v3684_v42 = vsel %vm326_vm0, %v3675_v43, %v3676_v17  ;;  %v3686_v10 = vsel %vm476_vm6, %v3664_v50, %v3676_v17  ;;  %v3691_v36 = vsel %vm476_vm6, %v7359_v25, %v3690_v46  ;;  %3708 = vst [vmem:[#allocation4 + $0x11c] sm:$0xf] %v3692_v53  ;;  %4320 = vmatpush.bf16.msrb.mxu2 %v5505_v62  ;;  %v5480_v50 = vld [vmem:[#allocation4 + $0x30] sm:$0xf]  ;;  %v5588_v53 = vld [vmem:[#allocation4 + $0x108] sm:$0xf] }
 0x4c1   : > { %v3685_v38 = vsel %vm476_vm6, %v7418_v18, %v3684_v42  ;;  %3704 = vst [vmem:[#allocation4 + $0x104] sm:$0xf] %v3686_v10  ;;  %v5870_v55 = vld [vmem:[#allocation4 + $0x140] sm:$0xf0]  ;;  %v5614_v13 = vld [vmem:[#allocation4 + $0x144] sm:$0xf0]  ;;  %v2109_v18 = vadd.f32 %v7102_v21, %v7061_v54  ;;  %v5481_v17 = vor.u32 %v5837_v24, %v5480_v50  ;;  %v2185_v48 = vadd.f32 %v7104_v41, %v2166_v4 }
 0x4c2   : > { %3703 = vst [vmem:[#allocation4 + $0xfc] sm:$0xff] %v3685_v38  ;;  %v5840_v5 = vld [vmem:[#allocation4 + $0x50] sm:$0xf0]  ;;  %v5613_v44 = vor.u32 %v5870_v55, %v5612_v47  ;;  %v5617_v33 = vor.u32 %v5869_v37, %v5614_v13  ;;  %v5468_v54 = vld [vmem:[#allocation4 + $0x18] sm:$0xf]  ;;  %v3881_v29 = vrot.slane %v7456_v39, 4 }
 0x4c3   : > { %3707 = vst [vmem:[#allocation4 + $0x114] sm:$0xff] %v3691_v36  ;;  %v5493_v52 = vor.u32 %v5840_v5, %v5492_v23  ;;  %v5834_v21 = vld [vmem:[#allocation4 + $0x20] sm:$0xf0]  ;;  %v5863_v42 = vld [vmem:[#allocation4 + $0x10c] sm:$0xf]  ;;  %v2128_v3 = vadd.f32 %v7087_v7, %v2109_v18 }
 0x4c4   : > { %4338 = vmatpush.bf16.msrb.mxu1 %v5613_v44  ;;  %4395 = vmatpush.bf16.msrb.mxu3 %v5617_v33  ;;  %v7494_v25 = vpop.permute.xlu2 %2254  ;;  %v3376_v61 = vpop.permute.xlu1 %3375  ;;  %v5469_v47 = vor.u32 %v5834_v21, %v5468_v54  ;;  %v5860_v24 = vld [vmem:[#allocation4 + $0xf4] sm:$0xf]  ;;  %v5858_v4 = vld [vmem:[#allocation4 + $0xe0] sm:$0xf0] }
 0x4c5   : > { %4321 = vmatpush.bf16.msrb.mxu2 %v5493_v52  ;;  %v3374_v6 = vpop.permute.xlu0 %3373  ;;  %v3388_v58 = vrot.slane %v3376_v61, 4  ;;  %v2268_v55 = vmul.f32 %v7494_v25, %v2128_v3  ;;  %v2269_v13 = vmul.f32 %v7494_v25, %v2185_v48  ;;  %v2270_v41 = vmul.f32 %v7494_v25, %v7128_v16  ;;  %v5857_v3 = vld [vmem:[#allocation4 + $0xdc] sm:$0xf] }
 0x4c6   : > { %v3387_v45 = vrot.slane %v3374_v6, 4 }
 0x4c7   : > { %v3398_v43 = vsel %vm328_vm8, %v3376_v61, %v3388_v58  ;;  %v5576_v61 = vld [vmem:[#allocation4 + $0xf0] sm:$0xf] }
 0x4c8   : > { %v3396_v62 = vsel %vm326_vm0, %v3387_v45, %v3388_v58  ;;  %3416 = vst [vmem:[#allocation4 + $0x14] sm:$0xf] %v3398_v43  ;;  %4339 = vmatpush.bf16.msrb.mxu1 %v5601_v28  ;;  %4396 = vmatpush.bf16.msrb.mxu3 %v5605_v35  ;;  %v5566_v35 = vld [vmem:[#allocation4 + $0xe4] sm:$0xf0] }
 0x4c9   : > { %v3397_v46 = vsel %vm328_vm8, %v3374_v6, %v3396_v62  ;;  %4322 = vmatpush.bf16.msrb.mxu2 %v5481_v17  ;;  %v5861_v5 = vld [vmem:[#allocation4 + $0xf8] sm:$0xf0]  ;;  %v5578_v44 = vld [vmem:[#allocation4 + $0xfc] sm:$0xf0] }
 0x4ca   : > { %3415 = vst [vmem:[#allocation4 + $0xc] sm:$0xff] %v3397_v46  ;;  %v5864_v10 = vld [vmem:[#allocation4 + $0x110] sm:$0xf0]  ;;  %v5590_v36 = vld [vmem:[#allocation4 + $0x114] sm:$0xf0]  ;;  %v5577_v2 = vor.u32 %v5861_v5, %v5576_v61  ;;  %v5581_v11 = vor.u32 %v5860_v24, %v5578_v44 }
 0x4cb   : > { %v5589_v37 = vor.u32 %v5864_v10, %v5588_v53  ;;  %v5593_v38 = vor.u32 %v5863_v42, %v5590_v36  ;;  %v5456_v62 = vld [vmem:[#allocation4] sm:$0xf]  ;;  %v5564_v53 = vld [vmem:[#allocation4 + $0xd8] sm:$0xf]  ;;  %v5569_v36 = vor.u32 %v5857_v3, %v5566_v35  ;;  %v5824_v44 = vld [vmem:[%s8096_s3 + $0x4] sm:$0xf] }
 0x4cc   : > { %v3874_v23 = vpop.permute.xlu1 %3873  ;;  %v5565_v42 = vor.u32 %v5858_v4, %v5564_v53  ;;  %v5854_v61 = vld [vmem:[#allocation4 + $0xc4] sm:$0xf]  ;;  %v5851_v24 = vld [vmem:[#allocation4 + $0xac] sm:$0xf]  ;;  %v5530_v35 = vld [vmem:[#allocation4 + $0x9c] sm:$0xf0] }
 0x4cd   : > { %4323 = vmatpush.bf16.msrb.mxu2 %v5469_v47  ;;  %4340 = vmatpush.bf16.msrb.mxu1 %v5589_v37  ;;  %v3872_v33 = vpop.permute.xlu0 %3871  ;;  %v3883_v52 = vrot.slane %v3874_v23, 4  ;;  %v7507_v7 = vpop.permute.xlu2 %2282  ;;  %v5855_v37 = vld [vmem:[#allocation4 + $0xc8] sm:$0xf0]  ;;  %v5518_v3 = vld [vmem:[#allocation4 + $0x84] sm:$0xf0] }
 0x4ce   : > { %4397 = vmatpush.bf16.msrb.mxu3 %v5593_v38  ;;  %v3882_v8 = vrot.slane %v3872_v33, 4  ;;  %v2296_v18 = vadd.f32 %v7507_v7, %v2268_v55  ;;  %v2297_v6 = vadd.f32 %v7507_v7, %v2269_v13  ;;  %v2298_v45 = vadd.f32 %v7507_v7, %v2270_v41  ;;  %v5554_v38 = vld [vmem:[#allocation4 + $0xcc] sm:$0xf0]  ;;  %v5542_v55 = vld [vmem:[#allocation4 + $0xb4] sm:$0xf0] }
 0x4cf   : > { %v3894_v58 = vsel %vm326_vm0, %v3883_v52, %v3884_v1  ;;  %v5825_v1 = vld [vmem:[%s8096_s3 + $0x8] sm:$0xf0]  ;;  %v5552_v41 = vld [vmem:[#allocation4 + $0xc0] sm:$0xf]  ;;  %v5883_v4 = vld [vmem:[#allocation4 + $0x1a8] sm:$0xf0] }
 0x4d0   : > { %v3891_v16 = vsel %vm326_vm0, %v3881_v29, %v3882_v8  ;;  %v3893_v50 = vsel %vm581_vm3, %v3872_v33, %v3882_v8  ;;  %v3895_v28 = vsel %vm581_vm3, %v3874_v23, %v3894_v58  ;;  %v7522_v43 = vmul.f32 %v2296_v18, %v6365_v20  ;;  %v5434_v33 = vld [vmem:[%s8096_s3 + $0xc] sm:$0xf0] }
 0x4d1   : > { %v3892_v17 = vsel %vm581_vm3, %v7456_v39, %v3891_v16  ;;  %3910 = vst [vmem:[#allocation4 + $0x1a0] sm:$0xf] %v3893_v50  ;;  %4341 = vmatpush.bf16.msrb.mxu1 %v5577_v2  ;;  %v5831_v54 = vld [vmem:[#allocation4 + $0x8] sm:$0xf0]  ;;  %v7533_v21 = vmul.f32 %v2297_v6, %v6373_v63  ;;  %v7536_v48 = vmul.f32 %v2298_v45, %v6361_v34 }
 0x4d2   : > { %8131 = vst [vmem:[#allocation23_spill] sm:$0xff] %v7522_v43  ;;  %4398 = vmatpush.bf16.msrb.mxu3 %v5581_v11  ;;  %v5457_v46 = vor.u32 %v5831_v54, %v5456_v62  ;;  %v7540_v10 = vor.u32 %v5825_v1, %v5432_v14  ;;  %v5553_v8 = vor.u32 %v5855_v37, %v5552_v41  ;;  %v5848_v54 = vld [vmem:[#allocation4 + $0x94] sm:$0xf] }
 0x4d3   : > { %8132 = vst [vmem:[#allocation24_spill] sm:$0xff] %v7533_v21  ;;  %v2377_v39 = vadd.f32 %v7533_v21, %v7522_v43  ;;  %v5557_v6 = vor.u32 %v5854_v61, %v5554_v38  ;;  %v5545_v58 = vor.u32 %v5851_v24, %v5542_v55  ;;  %v7552_v2 = vor.u32 %v5824_v44, %v5434_v33  ;;  %v5842_v44 = vld [vmem:[#allocation4 + $0x64] sm:$0xf]  ;;  %v5506_v33 = vld [vmem:[#allocation4 + $0x6c] sm:$0xf0] }
 0x4d4   : > { %3909 = vst [vmem:[#allocation4 + $0x198] sm:$0xff] %v3892_v17  ;;  %4324 = vmatpush.bf16.msrb.mxu2 %v5457_v46  ;;  %v3864_v47 = vpop.permute.xlu1 %3863  ;;  %v5533_v46 = vor.u32 %v5848_v54, %v5530_v35  ;;  %v5509_v41 = vor.u32 %v5842_v44, %v5506_v33  ;;  %v5494_v24 = vld [vmem:[#allocation4 + $0x54] sm:$0xf0]  ;;  %v5850_v33 = vld [vmem:[#allocation4 + $0xa0] sm:$0xf0] }
 0x4d5   : > { %3911 = vst [vmem:[#allocation4 + $0x1a4] sm:$0xff] %v3895_v28  ;;  %4342 = vmatpush.bf16.msrb.mxu1 %v5565_v42  ;;  %v3862_v13 = vpop.permute.xlu0 %3861  ;;  %v3878_v23 = vrot.slane %v3864_v47, 4  ;;  %v2378_v5 = vadd.f32 %v2377_v39, %v7536_v48  ;;  %v3879_v39 = vrot.slane %v7482_v15, 4 }
 0x4d6   : > { %8133 = vst [vmem:[#allocation25_spill] sm:$0xff] %v7536_v48  ;;  %4399 = vmatpush.bf16.msrb.mxu3 %v5569_v36  ;;  %v3877_v52 = vrot.slane %v3862_v13, 4 }
 0x4d7   : > { %v3887_v29 = vsel %vm581_vm3, %v3864_v47, %v3878_v23  ;;  %2379 = vadd.xlane.f32.xlu2 %v2378_v5  ;;  %4325 = vmatmul.bf16.vlgmr.msrb.gmra.mxu2 %v7540_v10  ;;  %v5845_v47 = vld [vmem:[#allocation4 + $0x7c] sm:$0xf] }
 0x4d8   : > { %v3885_v18 = vsel %vm326_vm0, %v3877_v52, %v3878_v23  ;;  %3906 = vst [vmem:[#allocation4 + $0x188] sm:$0xf] %v3887_v29  ;;  %v5668_v11 = vld [vmem:[#allocation4 + $0x1a0] sm:$0xf]  ;;  %v5521_v55 = vor.u32 %v5845_v47, %v5518_v3  ;;  %v5828_v23 = vld [vmem:[%s8096_s3 + $0x20] sm:$0xf0] }
 0x4d9   : > { %v3886_v45 = vsel %vm581_vm3, %v3862_v13, %v3885_v18  ;;  %4343 = vmatpush.bf16.msrb.mxu1 %v5553_v8  ;;  %v5669_v16 = vor.u32 %v5883_v4, %v5668_v11  ;;  %v5444_v13 = vld [vmem:[%s8096_s3 + $0x18] sm:$0xf]  ;;  %v5446_v18 = vld [vmem:[%s8096_s3 + $0x24] sm:$0xf0]  ;;  %v7592_v11 = vpop.permute.xlu2 %2286  ;;  %v5839_v4 = vld [vmem:[#allocation4 + $0x4c] sm:$0xf] }
 0x4da   : > { %3905 = vst [vmem:[#allocation4 + $0x180] sm:$0xff] %v3886_v45  ;;  %4400 = vmatpush.bf16.msrb.mxu3 %v5557_v6  ;;  %v7570_v52 = vor.u32 %v5828_v23, %v5444_v13  ;;  %v5482_v45 = vld [vmem:[#allocation4 + $0x3c] sm:$0xf0]  ;;  %v5548_v47 = vld [vmem:[#allocation4 + $0xb0] sm:$0xf] }
 0x4db   : > { %v5660_v50 = vld [vmem:[#allocation4 + $0x198] sm:$0xf]  ;;  %v5881_v28 = vld [vmem:[#allocation4 + $0x19c] sm:$0xf]  ;;  %v5440_v23 = vld [vmem:[%s8096_s3 + $0x8] sm:$0xf] }
 0x4dc   : > { %v5882_v14 = vld [vmem:[#allocation4 + $0x1a0] sm:$0xf0]  ;;  %v5662_v1 = vld [vmem:[#allocation4 + $0x1a4] sm:$0xf0]  ;;  %4344 = vmatmul.bf16.vlgmr.msrb.gmra.mxu1 %v7552_v2  ;;  %v7556_v53 = vpop.permute.xlu1 %2250 }
 0x4dd   : > { %4374 = vmatpush.bf16.msra.mxu1 %v5545_v58  ;;  %v5661_v17 = vor.u32 %v5882_v14, %v5660_v50  ;;  %v5665_v62 = vor.u32 %v5881_v28, %v5662_v1  ;;  %v3868_v42 = vpop.permute.xlu0 %3867  ;;  %4401 = vmatmul.bf16.vlgmr.msrb.gmra.mxu3 %v7552_v2  ;;  %v2265_v29 = vmul.f32 %v7556_v53, %v7100_v26 }
 0x4de   : > { %4475 = vmatpush.bf16.msra.mxu3 %v5669_v16  ;;  %v3880_v36 = vrot.slane %v3868_v42, 4  ;;  %v2266_v8 = vmul.f32 %v7556_v53, %v7116_v27  ;;  %v2267_v6 = vmul.f32 %v7556_v53, %v7126_v22  ;;  %v5853_v16 = vld [vmem:[#allocation4 + $0xb8] sm:$0xf0] }
 0x4df   : > { %4361 = vmatpush.bf16.msra.mxu2 %v5661_v17  ;;  %4418 = vmatpush.bf16.msra.mxu0 %v5665_v62  ;;  %v5656_v14 = vld [vmem:[#allocation4 + $0x188] sm:$0xf]  ;;  %v2171_v62 = vadd.f32 %v7120_v9, %v7124_v56  ;;  %v5836_v9 = vld [vmem:[#allocation4 + $0x34] sm:$0xf]  ;;  %v5549_v56 = vor.u32 %v5853_v16, %v5548_v47 }
 0x4e0   : > { %v3888_v37 = vsel %vm326_vm0, %v3879_v39, %v3880_v36  ;;  %v3890_v38 = vsel %vm581_vm3, %v3868_v42, %v3880_v36  ;;  %v5485_v44 = vor.u32 %v5836_v9, %v5482_v45  ;;  %v5844_v9 = vld [vmem:[#allocation4 + $0x70] sm:$0xf0] }
 0x4e1   : > { %4375 = vmatpush.bf16.msra.mxu1 %v5533_v46  ;;  %v3889_v5 = vsel %vm581_vm3, %v7482_v15, %v3888_v37  ;;  %3908 = vst [vmem:[#allocation4 + $0x194] sm:$0xf] %v3890_v38  ;;  %v5827_v15 = vld [vmem:[%s8096_s3 + $0x1c] sm:$0xf]  ;;  %v5648_v17 = vld [vmem:[#allocation4 + $0x180] sm:$0xf] }
 0x4e2   : > { %3907 = vst [vmem:[#allocation4 + $0x18c] sm:$0xff] %v3889_v5  ;;  %v7600_v35 = vor.u32 %v5827_v15, %v5446_v18  ;;  %v5878_v42 = vld [vmem:[#allocation4 + $0x184] sm:$0xf]  ;;  %v5826_v5 = vld [vmem:[%s8096_s3 + $0x10] sm:$0xf0] }
 0x4e3   : > { %v5833_v15 = vld [vmem:[#allocation4 + $0x1c] sm:$0xf]  ;;  %v5470_v18 = vld [vmem:[#allocation4 + $0x24] sm:$0xf0] }
 0x4e5   : > { %4376 = vmatpush.bf16.msra.mxu1 %v5521_v55  ;;  %v7576_v61 = vpop.permute.xlu0 %2258 }
 0x4e6   : > { %v2271_v26 = vmul.f32 %v7576_v61, %v7107_v12  ;;  %v2272_v27 = vmul.f32 %v7576_v61, %v7122_v32  ;;  %v7590_v58 = vpop.permute.xlu1 %2278  ;;  %v2114_v12 = vadd.f32 %v7111_v40, %v7076_v19  ;;  %v5497_v32 = vor.u32 %v5839_v4, %v5494_v24 }
 0x4e7   : > { %4330 = vmatmul.bf16.gmra.mxu2 %v7570_v52  ;;  %v2293_v50 = vadd.f32 %v7590_v58, %v2265_v29  ;;  %v2294_v22 = vadd.f32 %v7590_v58, %v2266_v8  ;;  %v2295_v28 = vadd.f32 %v7590_v58, %v2267_v6  ;;  %v2190_v8 = vadd.f32 %v7114_v49, %v2171_v62  ;;  %v5536_v6 = vld [vmem:[#allocation4 + $0x98] sm:$0xf] }
 0x4e8   : > { %v5880_v1 = vld [vmem:[#allocation4 + $0x190] sm:$0xf0]  ;;  %v2299_v37 = vadd.f32 %v7592_v11, %v2271_v26  ;;  %v2300_v38 = vadd.f32 %v7592_v11, %v2272_v27  ;;  %v2133_v29 = vadd.f32 %v7098_v57, %v2114_v12  ;;  %v7629_v26 = vor.u32 %v5826_v5, %v5440_v23  ;;  %v5458_v12 = vld [vmem:[#allocation4 + $0xc] sm:$0xf0] }
 0x4e9   : > { %4377 = vmatpush.bf16.msra.mxu1 %v5509_v41  ;;  %v5657_v54 = vor.u32 %v5880_v1, %v5656_v14  ;;  %v5879_v46 = vld [vmem:[#allocation4 + $0x188] sm:$0xf0]  ;;  %v5650_v3 = vld [vmem:[#allocation4 + $0x18c] sm:$0xf0]  ;;  %v7605_v39 = vmul.f32 %v2293_v50, %v6365_v20  ;;  %v7608_v36 = vmul.f32 %v2294_v22, %v6373_v63  ;;  %v7613_v55 = vmul.f32 %v2295_v28, %v6361_v34 }
 0x4ea   : > { %v5649_v19 = vor.u32 %v5879_v46, %v5648_v17  ;;  %v5653_v40 = vor.u32 %v5878_v42, %v5650_v3  ;;  %v2273_v41 = vmul.f32 %v7576_v61, %v7132_v31  ;;  %v7632_v27 = vmul.f32 %v2299_v37, %v6365_v20  ;;  %v5847_v22 = vld [vmem:[#allocation4 + $0x88] sm:$0xf0]  ;;  %v5644_v14 = vld [vmem:[#allocation4 + $0x170] sm:$0xf]  ;;  %v5877_v3 = vld [vmem:[#allocation4 + $0x178] sm:$0xf0] }
 0x4eb   : > { %4476 = vmatpush.bf16.msra.mxu3 %v5657_v54  ;;  %v2373_v13 = vadd.f32 %v7608_v36, %v7605_v39  ;;  %v7635_v4 = vmul.f32 %v2300_v38, %v6373_v63  ;;  %v5537_v49 = vor.u32 %v5850_v33, %v5536_v6  ;;  %v5473_v50 = vor.u32 %v5833_v15, %v5470_v18  ;;  %v5830_v54 = vld [vmem:[#allocation4 + $0x4] sm:$0xf]  ;;  %v5452_v18 = vld [vmem:[%s8096_s3 + $0x20] sm:$0xf] }
 0x4ec   : > { %4349 = vmatmul.bf16.gmra.mxu1 %v7600_v35  ;;  %4362 = vmatpush.bf16.msra.mxu2 %v5649_v19  ;;  %8134 = vst [vmem:[#allocation26_spill] sm:$0xff] %v7632_v27  ;;  %v2301_v28 = vadd.f32 %v7592_v11, %v2273_v41  ;;  %v5461_v42 = vor.u32 %v5830_v54, %v5458_v12  ;;  %v5829_v6 = vld [vmem:[%s8096_s3 + $0x28] sm:$0xf0]  ;;  %v5608_v12 = vld [vmem:[#allocation4 + $0x128] sm:$0xf] }
 0x4ed   : > { %4378 = vmatpush.bf16.msra.mxu1 %v5497_v32  ;;  %4419 = vmatpush.bf16.msra.mxu0 %v5653_v40  ;;  %v2374_v24 = vadd.f32 %v2373_v13, %v7613_v55  ;;  %8135 = vst [vmem:[#allocation27_spill] sm:$0xff] %v7635_v4  ;;  %v5524_v32 = vld [vmem:[#allocation4 + $0x80] sm:$0xf]  ;;  %v2381_v1 = vadd.f32 %v7635_v4, %v7632_v27  ;;  %v5512_v40 = vld [vmem:[#allocation4 + $0x68] sm:$0xf] }
 0x4ee   : > { %4406 = vmatmul.bf16.gmra.mxu3 %v7600_v35  ;;  %v7640_v57 = vpop.permute.xlu0 %2290  ;;  %v5525_v46 = vor.u32 %v5847_v22, %v5524_v32  ;;  %v7652_v19 = vmul.f32 %v2301_v28, %v6361_v34  ;;  %v5645_v37 = vor.u32 %v5877_v3, %v5644_v14  ;;  %v5513_v5 = vor.u32 %v5844_v9, %v5512_v40  ;;  %v5488_v28 = vld [vmem:[#allocation4 + $0x38] sm:$0xf]  ;;  %v5596_v3 = vld [vmem:[#allocation4 + $0x110] sm:$0xf]  ;;  %v5832_v40 = vld [vmem:[#allocation4 + $0x10] sm:$0xf0] }
 0x4ef   : > { %2375 = vadd.xlane.f32.xlu1 %v2374_v24  ;;  %v7638_v31 = vpop.permute.xlu1 %2262  ;;  %v5453_v32 = vor.u32 %v5829_v6, %v5452_v18  ;;  %v5584_v9 = vld [vmem:[#allocation4 + $0xf8] sm:$0xf] }
 0x4f0   : > { %4431 = vmatpush.bf16.msrb.mxu2 %v5549_v56  ;;  %v2274_v45 = vmul.f32 %v7638_v31, %v2133_v29  ;;  %v2275_v16 = vmul.f32 %v7638_v31, %v2190_v8  ;;  %5672 = vmatmul.msk.bf16.vlgmr.msra.gmra.mxu0 %vm2071_vm10, %v7629_v26  ;;  %8136 = vst [vmem:[#allocation28_spill] sm:$0xff] %v7652_v19  ;;  %v5874_v56 = vld [vmem:[#allocation4 + $0x160] sm:$0xf0]  ;;  %v5500_v29 = vld [vmem:[#allocation4 + $0x50] sm:$0xf] }
 0x4f1   : > { %4379 = vmatpush.bf16.msra.mxu1 %v5485_v44  ;;  %v2276_v47 = vmul.f32 %v7638_v31, %v7136_v51  ;;  %v2382_v38 = vadd.f32 %v2381_v1, %v7652_v19  ;;  %v5632_v51 = vld [vmem:[#allocation4 + $0x158] sm:$0xf]  ;;  %v5841_v44 = vld [vmem:[#allocation4 + $0x58] sm:$0xf0]  ;;  %v5871_v8 = vld [vmem:[#allocation4 + $0x148] sm:$0xf0] }
 0x4f2   : > { %v2302_v17 = vadd.f32 %v7640_v57, %v2274_v45  ;;  %v2303_v62 = vadd.f32 %v7640_v57, %v2275_v16  ;;  %v5633_v41 = vor.u32 %v5874_v56, %v5632_v51  ;;  %v5501_v15 = vor.u32 %v5841_v44, %v5500_v29  ;;  %v5838_v16 = vld [vmem:[#allocation4 + $0x40] sm:$0xf0]  ;;  %v5868_v1 = vld [vmem:[#allocation4 + $0x130] sm:$0xf0]  ;;  %v5572_v51 = vld [vmem:[#allocation4 + $0xe0] sm:$0xf]  ;;  %v3221_v44 = vpop.f32.mrf.mxu1 }
 0x4f3   : > { %v2304_v33 = vadd.f32 %v7640_v57, %v2276_v47  ;;  %v5489_v14 = vor.u32 %v5838_v16, %v5488_v28  ;;  %v5609_v54 = vor.u32 %v5868_v1, %v5608_v12  ;;  %v3279_v1 = vpop.f32.mrf.mxu0 }
 0x4f4   : > { %4432 = vmatpush.bf16.msrb.mxu2 %v5537_v49  ;;  %v7658_v13 = vmul.f32 %v2302_v17, %v6365_v20  ;;  %v7661_v23 = vmul.f32 %v2303_v62, %v6373_v63  ;;  %v5620_v49 = vld [vmem:[#allocation4 + $0x140] sm:$0xf]  ;;  %v5835_v62 = vld [vmem:[#allocation4 + $0x28] sm:$0xf0] }
 0x4f5   : > { %4380 = vmatpush.bf16.msra.mxu1 %v5473_v50  ;;  %v7676_v45 = vmul.f32 %v2304_v33, %v6361_v34  ;;  %v5621_v50 = vor.u32 %v5871_v8, %v5620_v49  ;;  %v5476_v17 = vld [vmem:[#allocation4 + $0x20] sm:$0xf]  ;;  %v3192_v33 = vpop.f32.mrf.mxu2  ;;  %v5856_v8 = vld [vmem:[#allocation4 + $0xd0] sm:$0xf0] }
 0x4f6   : > { %8137 = vst [vmem:[#allocation29_spill] sm:$0xff] %v7661_v23  ;;  %v2385_v24 = vadd.f32 %v7661_v23, %v7658_v13  ;;  %v7684_v29 = vadd.f32 %v3221_v44, %v3192_v33  ;;  %v7716_v44 = vld [vmem:[%s8098_s5] sm:$0xff] }
 0x4f7   : > { %5670 = vmatmul.msk.bf16.vlgmr.msra.gmra.mxu2 %vm2071_vm10, %v7629_v26  ;;  %2383 = vadd.xlane.f32.xlu1 %v2382_v38  ;;  %8138 = vst [vmem:[#allocation30_spill] sm:$0xff] %v7676_v45  ;;  %v5862_v38 = vld [vmem:[#allocation4 + $0x100] sm:$0xf0] }
 0x4f8   : > { %4433 = vmatpush.bf16.msrb.mxu2 %v5525_v46  ;;  %v2386_v22 = vadd.f32 %v2385_v24, %v7676_v45  ;;  %v5865_v46 = vld [vmem:[#allocation4 + $0x118] sm:$0xf0]  ;;  %v5585_v56 = vor.u32 %v5862_v38, %v5584_v9  ;;  %v5560_v24 = vld [vmem:[#allocation4 + $0xc8] sm:$0xf] }
 0x4f9   : > { %4381 = vmatpush.bf16.msra.mxu1 %v5461_v42  ;;  %v5477_v42 = vor.u32 %v5835_v62, %v5476_v17  ;;  %v5597_v47 = vor.u32 %v5865_v46, %v5596_v3 }
 0x4fa   : > { %v3223_v18 = vpop.f32.mrf.mxu1 }
 0x4fc   : > { %4434 = vmatpush.bf16.msrb.mxu2 %v5513_v5  ;;  %4382 = vmatmul.bf16.vlgmr.msra.gmra.mxu1 %v7540_v10  ;;  %v5859_v5 = vld [vmem:[#allocation4 + $0xe8] sm:$0xf0] }
 0x4fd   : > { %4450 = vmatpush.bf16.msrb.mxu1 %v5645_v37  ;;  %v5464_v37 = vld [vmem:[#allocation4 + $0x8] sm:$0xf]  ;;  %v3194_v6 = vpop.f32.mrf.mxu2 }
 0x4fe   : > { %5674 = vmatmul.msk.bf16.vlgmr.msra.gmra.mxu3 %vm2071_vm10, %v7629_v26  ;;  %v5465_v26 = vor.u32 %v5832_v40, %v5464_v37  ;;  %v7687_v49 = vadd.f32 %v3223_v18, %v3194_v6 }
 0x4ff   : > { %2387 = vadd.xlane.f32.xlu1 %v2386_v22 }
 0x500   : > { %4435 = vmatpush.bf16.msrb.mxu2 %v5501_v15  ;;  %5673 = vmatmul.msk.bf16.gmra.mxu0 %vm2071_vm10, %v5453_v32  ;;  %v5561_v15 = vor.u32 %v5856_v8, %v5560_v24  ;;  %v7721_v24 = vld [vmem:[%s8098_s5 + $0x8] sm:$0xff] }
 0x501   : > { %4451 = vmatpush.bf16.msrb.mxu1 %v5633_v41  ;;  %v5573_v41 = vor.u32 %v5859_v5, %v5572_v51 }
 0x502   : > { %v3226_v16 = vpop.f32.mrf.mxu1 }
 0x504   : > { %4436 = vmatpush.bf16.msrb.mxu2 %v5489_v14  ;;  %v3250_v14 = vpop.f32.mrf.mxu3 }
 0x505   : > { %4452 = vmatpush.bf16.msrb.mxu1 %v5621_v50  ;;  %v3197_v50 = vpop.f32.mrf.mxu2  ;;  %v7697_v17 = vadd.f32 %v3279_v1, %v3250_v14  ;;  %v7739_v1 = vld [vmem:[%s8098_s5 + $0x18] sm:$0xff] }
 0x506   : > { %v7691_v22 = vadd.f32 %v3226_v16, %v3197_v50 }
 0x507   : > { %5671 = vmatmul.msk.bf16.gmra.mxu2 %vm2071_vm10, %v5453_v32 }
 0x508   : > { %4437 = vmatpush.bf16.msrb.mxu2 %v5477_v42 }
 0x509   : > { %4453 = vmatpush.bf16.msrb.mxu1 %v5609_v54 }
 0x50a   : > { %v3228_v28 = vpop.f32.mrf.mxu1 }
 0x50c   : > { %4438 = vmatpush.bf16.msrb.mxu2 %v5465_v26  ;;  %4387 = vmatmul.bf16.gmra.mxu1 %v7570_v52  ;;  %v3252_v62 = vpop.f32.mrf.mxu3 }
 0x50d   : > { %4454 = vmatpush.bf16.msrb.mxu1 %v5597_v47  ;;  %v3199_v12 = vpop.f32.mrf.mxu2 }
 0x50e   : > { %5675 = vmatmul.msk.bf16.gmra.mxu3 %vm2071_vm10, %v5453_v32  ;;  %v7695_v32 = vadd.f32 %v3228_v28, %v3199_v12 }
 0x511   : > { %4455 = vmatpush.bf16.msrb.mxu1 %v5585_v56 }
 0x515   : > { %4456 = vmatpush.bf16.msrb.mxu1 %v5573_v41 }
 0x517   : > { %4439 = vmatmul.bf16.vlgmr.msrb.gmra.mxu2 %v7540_v10  ;;  %v3281_v10 = vpop.f32.mrf.mxu0 }
 0x518   : > { %v7699_v54 = vadd.f32 %v3281_v10, %v3252_v62 }
 0x519   : > { %4457 = vmatpush.bf16.msrb.mxu1 %v5561_v15  ;;  %v7726_v15 = vld [vmem:[%s8098_s5 + $0x10] sm:$0xff] }
 0x51c   : > { %4458 = vmatmul.bf16.vlgmr.msrb.gmra.mxu1 %v7552_v2  ;;  %v3255_v2 = vpop.f32.mrf.mxu3 }
 0x51f   : > { %v3284_v46 = vpop.f32.mrf.mxu0 }
 0x520   : > { %v7701_v42 = vadd.f32 %v3284_v46, %v3255_v2 }
 0x524   : > { %v3257_v3 = vpop.f32.mrf.mxu3 }
 0x527   : > { %4444 = vmatmul.bf16.gmra.mxu2 %v7570_v52  ;;  %v3286_v52 = vpop.f32.mrf.mxu0 }
 0x528   : > { %v7703_v40 = vadd.f32 %v3286_v52, %v3257_v3 }
 0x52c   : > { %4463 = vmatmul.bf16.gmra.mxu1 %v7600_v35 }
 0x54a   : > { %v2380_v9 = vpop.xlane.xlu2 %2379 }
 0x54b   : > { %v2390_v41 = vmul.f32 0.00390625, %v2380_v9  ;;  %v5995_v9 = vmov 4  }
 0x54c   : > { %5927 = vset.pattern.permute.xlu1 %v5995_v9  ;;  %5926 = vset.pattern.permute.xlu0 %v5995_v9 }
 0x54d   : > { %v2394_v16 = vmul.f32 %v2390_v41, %v7721_v24  ;;  %5928 = vset.pattern.permute.xlu2 %v5995_v9 }
 0x54f   : > { %v2399_v10 = vsel %vm2397_vm11, %v2394_v16, 0.0 }
 0x559   : > { %v4345_v35 = vpop.f32.mrf.mxu1 }
 0x55a   : > { %v4326_v47 = vpop.f32.mrf.mxu2 }
 0x560   : > { %v4402_v6 = vpop.f32.mrf.mxu3 }
 0x561   : > { %v7705_v37 = vpop.f32.mrf.mxu1 }
 0x562   : > { %v7707_v38 = vpop.f32.mrf.mxu2  ;;  %v2376_v26 = vpop.xlane.xlu1 %2375 }
 0x563   : > { %v2389_v5 = vmul.f32 0.00390625, %v2376_v26 }
 0x565   : > { %v2393_v18 = vmul.f32 %v2389_v5, %v7716_v44 }
 0x567   : > { %v2398_v12 = vsel %vm2397_vm11, %v2393_v18, 0.0 }
 0x568   : > { %v2400_v3 = vadd.f32 %v2399_v10, %v2398_v12 }
 0x569   : > { %v7709_v56 = vpop.f32.mrf.mxu1 }
 0x56a   : > { %v7711_v51 = vpop.f32.mrf.mxu2  ;;  %v2384_v33 = vpop.xlane.xlu1 %2383 }
 0x56b   : > { %v2391_v8 = vmul.f32 0.00390625, %v2384_v33  ;;  %v4404_v33 = vpop.f32.mrf.mxu3 }
 0x56d   : > { %v2395_v50 = vmul.f32 %v2391_v8, %v7726_v15  ;;  %v4421_v9 = vpop.f32.mrf.mxu0 }
 0x56f   : > { %v2401_v2 = vsel %vm2397_vm11, %v2395_v50, 0.0 }
 0x570   : > { %v2402_v26 = vadd.f32 %v2401_v2, %v2400_v3  ;;  %v7748_v2 = vld [vmem:[%s8099_s6] sm:$0x1] }
 0x571   : > { %v7731_v28 = vpop.f32.mrf.mxu1 }
 0x572   : > { %v7734_v14 = vpop.f32.mrf.mxu2  ;;  %v2388_v62 = vpop.xlane.xlu1 %2387 }
 0x573   : > { %v2392_v46 = vmul.f32 0.00390625, %v2388_v62  ;;  %v4407_v12 = vpop.f32.mrf.mxu3 }
 0x575   : > { %v2396_v52 = vmul.f32 %v2392_v46, %v7739_v1  ;;  %v4423_v23 = vpop.f32.mrf.mxu0 }
 0x577   : > { %v2403_v5 = vsel %vm2397_vm11, %v2396_v52, 0.0 }
 0x578   : > { %v2404_v41 = vadd.f32 %v2403_v5, %v2402_v26 }
 0x579   : > { %v4383_v8 = vpop.f32.mrf.mxu1 }
 0x57a   : > { %v4364_v18 = vpop.f32.mrf.mxu2  ;;  %v2405_v48 = vrot.slane %v2404_v41, 4 }
 0x57c   : > { %v2406_v21 = vadd.f32 %v2405_v48, %v2404_v41  ;;  %v4409_v48 = vpop.f32.mrf.mxu3  ;;  %v4346_v41 = vadd.f32 %v4345_v35, %v4326_v47  ;;  %v4348_v35 = vadd.f32 %v7705_v37, %v7707_v38 }
 0x57e   : > { %v2407_v16 = vrot.slane %v2406_v21, 2  ;;  %v4365_v27 = vadd.f32 %v4364_v18, %v4346_v41 }
 0x580   : > { %v2408_v43 = vadd.f32 %v2407_v16, %v2406_v21  ;;  %v4403_v21 = vadd.f32 %v4402_v6, %v4383_v8 }
 0x581   : > { %v4385_v50 = vpop.f32.mrf.mxu1 }
 0x582   : > { %v4366_v62 = vpop.f32.mrf.mxu2  ;;  %v2409_v10 = vrot.slane %v2408_v43, 1  ;;  %v4422_v45 = vadd.f32 %v4421_v9, %v4403_v21 }
 0x583   : > { %v4367_v6 = vadd.f32 %v4366_v62, %v4348_v35 }
 0x584   : > { %v2410_v46 = vadd.f32 %v2409_v10, %v2408_v43  ;;  %v7755_v43 = vld [vmem:[%s8097_s4 + $0x8] sm:$0xff]  ;;  %v4405_v10 = vadd.f32 %v4404_v33, %v4385_v50  ;;  %v7767_v33 = vld [vmem:[%s8097_s4 + $0x18] sm:$0xff] }
 0x586   : > { %v2411_v3 = vadd.f32 %v2410_v46, %v7748_v2  ;;  %v4478_v46 = vpop.f32.mrf.mxu3  ;;  %v4424_v8 = vadd.f32 %v4423_v23, %v4405_v10  ;;  %v4426_v23 = vpop.f32.mrf.mxu0  ;;  %v4351_v10 = vadd.f32 %v7709_v56, %v7711_v51  ;;  %v8110_v51 = vmov 5  }
 0x588   : > { %v2412_v26 = vmax.f32 %v2411_v3, 0.0  ;;  %v4488_v3 = vmul.f32 %v4365_v27, %v7556_v53  ;;  %v4491_v27 = vmul.f32 %v4367_v6, %v7494_v25 }
 0x589   : > { %v4388_v52 = vpop.f32.mrf.mxu1 }
 0x58a   : > { %v4369_v5 = vpop.f32.mrf.mxu2  ;;  %v2413_v19 = vperm.slane %v2412_v26, 0  ;;  %v4500_v26 = vadd.f32 %v4488_v3, %v7590_v58  ;;  %v4408_v37 = vadd.f32 %v4407_v12, %v4388_v52  ;;  %v4503_v35 = vadd.f32 %v4491_v27, %v7507_v7 }
 0x58b   : > { %v4370_v52 = vadd.f32 %v4369_v5, %v4351_v10 }
 0x58c   : > { %2415 = vrot.lane.b32.xlu1 %v2413_v19, %s5996_s9  ;;  %v4489_v19 = vmul.f32 %v4422_v45, %v7556_v53  ;;  %v4492_v45 = vmul.f32 %v4424_v8, %v7494_v25  ;;  %v7773_v38 = vmul.f32 %v4500_v26, %v6365_v20 }
 0x58e   : > { %v4501_v9 = vadd.f32 %v4489_v19, %v7590_v58  ;;  %v4504_v12 = vadd.f32 %v4492_v45, %v7507_v7 }
 0x590   : > { %v7776_v50 = vmul.f32 %v4501_v9, %v6373_v63  ;;  %v7795_v5 = vmul.f32 %v4504_v12, %v6373_v63  ;;  %v4494_v9 = vmul.f32 %v4370_v52, %v7576_v61 }
 0x591   : > { %v4390_v16 = vpop.f32.mrf.mxu1 }
 0x592   : > { %v4371_v4 = vpop.f32.mrf.mxu2  ;;  %v4410_v27 = vadd.f32 %v4409_v48, %v4390_v16 }
 0x594   : > { %2322 = vperm.xlu1 %5927, %v7755_v43  }
 0x599   : > { %v4459_v47 = vpop.f32.mrf.mxu1 }
 0x59a   : > { %v4440_v18 = vpop.f32.mrf.mxu2 }
 0x59b   : > { %v4460_v21 = vadd.f32 %v4459_v47, %v4440_v18  ;;  %v4427_v47 = vadd.f32 %v4426_v23, %v4408_v37  ;;  %v4428_v37 = vpop.f32.mrf.mxu0  ;;  %v4353_v23 = vadd.f32 %v7731_v28, %v7734_v14 }
 0x59c   : > { %2330 = vperm.xlu1 %5927, %v7767_v33   ;;  %v4429_v16 = vadd.f32 %v4428_v37, %v4410_v27 }
 0x59d   : > { %v4479_v41 = vadd.f32 %v4478_v46, %v4460_v21  ;;  %v4480_v46 = vpop.f32.mrf.mxu3  ;;  %v4495_v21 = vmul.f32 %v4427_v47, %v7576_v61  ;;  %v4372_v48 = vadd.f32 %v4371_v4, %v4353_v23 }
 0x59f   : > { %v4490_v62 = vmul.f32 %v4479_v41, %v7556_v53  ;;  %v4548_v53 = vadd.f32 %v7776_v50, %v7773_v38  ;;  %v7802_v41 = vld [vmem:[%s8097_s4 + $0x10] sm:$0xff] }
 0x5a1   : > { %v4502_v3 = vadd.f32 %v4490_v62, %v7590_v58  ;;  %v4461_v19 = vpop.f32.mrf.mxu1  ;;  %v7792_v58 = vmul.f32 %v4503_v35, %v6365_v20 }
 0x5a2   : > { %v4442_v6 = vpop.f32.mrf.mxu2 }
 0x5a3   : > { %v4462_v8 = vadd.f32 %v4461_v19, %v4442_v6  ;;  %v7785_v18 = vmul.f32 %v4502_v3, %v6361_v34  ;;  %v4507_v3 = vadd.f32 %v4495_v21, %v7592_v11  ;;  %v4552_v12 = vadd.f32 %v7795_v5, %v7792_v58 }
 0x5a4   : > { %5931 = vset.pattern.permute.xlu1 %v8110_v51  ;;  %v4497_v6 = vmul.f32 %v4372_v48, %v7638_v31 }
 0x5a5   : > { %v4481_v26 = vadd.f32 %v4480_v46, %v4462_v8  ;;  %v4549_v56 = vadd.f32 %v4548_v53, %v7785_v18  ;;  %2354 = vperm.xlu1 %5931, %v7802_v41   ;;  %v4506_v46 = vadd.f32 %v4494_v9, %v7592_v11  ;;  %v4483_v35 = vpop.f32.mrf.mxu3  ;;  %v7821_v14 = vmul.f32 %v4507_v3, %v6373_v63 }
 0x5a6   : > { %v4498_v8 = vmul.f32 %v4429_v16, %v7638_v31  ;;  %v4509_v21 = vadd.f32 %v4497_v6, %v7640_v57 }
 0x5a7   : > { %v4493_v45 = vmul.f32 %v4481_v26, %v7494_v25  ;;  %4550 = vadd.xlane.f32.xlu0 %v4549_v56 }
 0x5a8   : > { %v4510_v27 = vadd.f32 %v4498_v8, %v7640_v57 }
 0x5a9   : > { %v4505_v62 = vadd.f32 %v4493_v45, %v7507_v7  ;;  %v4464_v10 = vpop.f32.mrf.mxu1  ;;  %v7818_v7 = vmul.f32 %v4506_v46, %v6365_v20 }
 0x5aa   : > { %v4445_v19 = vpop.f32.mrf.mxu2 }
 0x5ab   : > { %v4465_v25 = vadd.f32 %v4464_v10, %v4445_v19  ;;  %v7814_v52 = vmul.f32 %v4505_v62, %v6361_v34  ;;  %v4556_v9 = vadd.f32 %v7821_v14, %v7818_v7  ;;  %v7836_v10 = vmul.f32 %v4509_v21, %v6365_v20  ;;  %v7846_v19 = vld [vmem:[%s8097_s4] sm:$0xff] }
 0x5ad   : > { %v4484_v47 = vadd.f32 %v4483_v35, %v4465_v25  ;;  %v4553_v28 = vadd.f32 %v4552_v12, %v7814_v52  ;;  %v4485_v23 = vpop.f32.mrf.mxu3 }
 0x5af   : > { %v4496_v4 = vmul.f32 %v4484_v47, %v7576_v61  ;;  %4554 = vadd.xlane.f32.xlu2 %v4553_v28 }
 0x5b1   : > { %v4508_v53 = vadd.f32 %v4496_v4, %v7592_v11  ;;  %v4466_v56 = vpop.f32.mrf.mxu1  ;;  %v7839_v11 = vmul.f32 %v4510_v27, %v6373_v63 }
 0x5b2   : > { %v4447_v26 = vpop.f32.mrf.mxu2 }
 0x5b3   : > { %v4467_v45 = vadd.f32 %v4466_v56, %v4447_v26  ;;  %v7832_v37 = vmul.f32 %v4508_v53, %v6361_v34  ;;  %v4560_v20 = vadd.f32 %v7839_v11, %v7836_v10 }
 0x5b5   : > { %8139 = vst [vmem:[#allocation31_spill] sm:$0xff] %v7832_v37  ;;  %v4486_v62 = vadd.f32 %v4485_v23, %v4467_v45  ;;  %v4557_v61 = vadd.f32 %v4556_v9, %v7832_v37 }
 0x5b7   : > { %v4499_v46 = vmul.f32 %v4486_v62, %v7638_v31  ;;  %4558 = vadd.xlane.f32.xlu2 %v4557_v61 }
 0x5b9   : > { %v4511_v3 = vadd.f32 %v4499_v46, %v7640_v57 }
 0x5bb   : > { %2318 = vperm.xlu0 %5926, %v7846_v19   ;;  %v7850_v35 = vmul.f32 %v4511_v3, %v6361_v34  ;;  %v8143_v3 = vld [vmem:[#allocation5_spill] sm:$0xff] }
 0x5bd   : > { %v4561_v63 = vadd.f32 %v4560_v20, %v7850_v35 }
 0x5bf   : > { %4562 = vadd.xlane.f32.xlu2 %v4561_v63  ;;  %v8144_v63 = vld [vmem:[#allocation10_spill] sm:$0xff] }
 0x5c3   : > { %5930 = vset.pattern.permute.xlu0 %v8110_v51 }
 0x5c4   : > { %2350 = vperm.xlu0 %5930, %v7755_v43  }
 0x5fe   : > { %v7857_v31 = vpop.permute.xlu1 %2415 }
 0x5ff   : > { %v2419_v57 = vmul.f32 %v7857_v31, %v7721_v24  ;;  %v2421_v12 = vmul.f32 %v7857_v31, %v7739_v1 }
 0x601   : > { %2432 = vrot.lane.b32.xlu0 %v2421_v12, %s5998_s28  ;;  %2428 = vrot.lane.b32.xlu1 %v2419_v57, %s5998_s28  ;;  %v8145_v57 = vld [vmem:[#allocation6_spill] sm:$0xff] }
 0x602   : > { %v941_v12 = vadd.f32 %v8145_v57, %v8144_v63 }
 0x606   : > { %v2323_v34 = vpop.permute.xlu1 %2322 }
 0x607   : > { %v4527_v48 = vmul.f32 %v7134_v30, %v2323_v34  ;;  %v4528_v16 = vmul.f32 %v7687_v49, %v2323_v34  ;;  %v4529_v25 = vmul.f32 %v7699_v54, %v2323_v34 }
 0x60e   : > { %v7868_v47 = vpop.permute.xlu1 %2330 }
 0x60f   : > { %v7872_v28 = vmul.f32 %v7145_v0, %v7868_v47  ;;  %v7876_v6 = vmul.f32 %v7695_v32, %v7868_v47  ;;  %v7880_v8 = vmul.f32 %v7703_v40, %v7868_v47  ;;  %v8140_v32 = vld [vmem:[#allocation14_spill] sm:$0xff]  ;;  %v8141_v40 = vld [vmem:[#allocation21_spill] sm:$0xff] }
 0x61a   : > { %v4551_v30 = vpop.xlane.xlu0 %4550 }
 0x61b   : > { %v4564_v26 = vmul.f32 0.00390625, %v4551_v30  ;;  %v8146_v30 = vld [vmem:[#allocation16_spill] sm:$0xff] }
 0x61d   : > { %v4568_v23 = vmul.f32 %v4564_v26, %v7716_v44 }
 0x61f   : > { %v4572_v26 = vsel %vm2397_vm11, %v4568_v23, 0.0 }
 0x622   : > { %v4555_v4 = vpop.xlane.xlu2 %4554 }
 0x623   : > { %v4565_v53 = vmul.f32 0.00390625, %v4555_v4 }
 0x625   : > { %v4569_v56 = vmul.f32 %v4565_v53, %v7721_v24  ;;  %v8147_v53 = vld [vmem:[#allocation15_spill] sm:$0xff] }
 0x62a   : > { %v4559_v49 = vpop.xlane.xlu2 %4558 }
 0x62b   : > { %v4566_v54 = vmul.f32 0.00390625, %v4559_v49  ;;  %v999_v49 = vadd.f32 %v8147_v53, %v8146_v30 }
 0x62d   : > { %v2319_v9 = vpop.permute.xlu0 %2318  ;;  %v4570_v62 = vmul.f32 %v4566_v54, %v7726_v15 }
 0x62e   : > { %v7884_v0 = vmul.f32 %v2319_v9, %v6416_v59  ;;  %v7887_v21 = vmul.f32 %v2319_v9, %v6427_v60  ;;  %v7890_v27 = vmul.f32 %v2319_v9, %v8140_v32  ;;  %v7893_v45 = vmul.f32 %v8141_v40, %v2319_v9  ;;  %v8142_v60 = vld [vmem:[#allocation9_spill] sm:$0xff] }
 0x62f   : > { %v7898_v61 = vmul.f32 %v7684_v29, %v2319_v9  ;;  %v7901_v46 = vmul.f32 %v7697_v17, %v2319_v9  ;;  %v4573_v59 = vsel %vm2397_vm11, %v4569_v56, 0.0  ;;  %v883_v20 = vadd.f32 %v8143_v3, %v8142_v60 }
 0x630   : > { %v4575_v29 = vsel %vm2397_vm11, %v4570_v62, 0.0  ;;  %v4574_v32 = vadd.f32 %v4573_v59, %v4572_v26  ;;  %v2337_v56 = vmul.f32 %v2323_v34, %v941_v12  ;;  %v2338_v40 = vmul.f32 %v2323_v34, %v999_v49 }
 0x631   : > { %v2336_v9 = vmul.f32 %v2323_v34, %v883_v20 }
 0x632   : > { %v4563_v4 = vpop.xlane.xlu2 %4562  ;;  %v4576_v51 = vadd.f32 %v4575_v29, %v4574_v32 }
 0x633   : > { %v4567_v54 = vmul.f32 0.00390625, %v4563_v4 }
 0x635   : > { %v4571_v17 = vmul.f32 %v4567_v54, %v7739_v1 }
 0x636   : > { %v2351_v60 = vpop.permute.xlu0 %2350 }
 0x637   : > { %v4577_v3 = vsel %vm2397_vm11, %v4571_v17, 0.0  ;;  %v7914_v63 = vadd.f32 %v2351_v60, %v2336_v9  ;;  %v7916_v57 = vadd.f32 %v2351_v60, %v2337_v56  ;;  %v7918_v30 = vadd.f32 %v2351_v60, %v2338_v40 }
 0x638   : > { %v4578_v23 = vadd.f32 %v4577_v3, %v4576_v51  ;;  %v7920_v53 = vadd.f32 %v4527_v48, %v2351_v60  ;;  %v7922_v62 = vadd.f32 %v4528_v16, %v2351_v60  ;;  %v7924_v59 = vadd.f32 %v4529_v25, %v2351_v60  ;;  %v8149_v60 = vld [vmem:[#allocation11_spill] sm:$0xff]  ;;  %v8150_v3 = vld [vmem:[#allocation12_spill] sm:$0xff] }
 0x639   : > { %v8148_v51 = vmov 5   ;;  %v2418_v48 = vmul.f32 %v7857_v31, %v7716_v44  ;;  %v2420_v16 = vmul.f32 %v7857_v31, %v7726_v15 }
 0x63a   : > { %v4579_v20 = vrot.slane %v4578_v23, 4 }
 0x63c   : > { %v4580_v12 = vadd.f32 %v4579_v20, %v4578_v23  ;;  %v8151_v20 = vld [vmem:[#allocation17_spill] sm:$0xff] }
 0x63e   : > { %v4581_v34 = vrot.slane %v4580_v12, 2 }
 0x640   : > { %v4582_v4 = vadd.f32 %v4581_v34, %v4580_v12 }
 0x642   : > { %v4583_v49 = vrot.slane %v4582_v4, 1 }
 0x644   : > { %v4584_v26 = vadd.f32 %v4583_v49, %v4582_v4 }
 0x646   : > { %v4585_v29 = vadd.f32 %v4584_v26, %v7748_v2 }
 0x648   : > { %v4586_v54 = vmax.f32 %v4585_v29, 0.0 }
 0x64a   : > { %v4587_v32 = vperm.slane %v4586_v54, 0 }
 0x64c   : > { %4589 = vrot.lane.b32.xlu2 %v4587_v32, %s5996_s9 }
 0x654   : > { %2326 = vperm.xlu2 %5928, %v7802_v41  }
 0x65c   : > { %5929 = vset.pattern.permute.xlu2 %v8148_v51 }
 0x65d   : > { %2346 = vperm.xlu2 %5929, %v7846_v19  }
 0x665   : > { %2426 = vrot.lane.b32.xlu2 %v2418_v48, %s5998_s28 }
 0x66d   : > { %2430 = vrot.lane.b32.xlu2 %v2420_v16, %s5998_s28 }
 0x6a6   : > { %v4590_v2 = vpop.permute.xlu2 %4589 }
 0x6a7   : > { %v4592_v25 = vmul.f32 %v4590_v2, %v7716_v44  ;;  %v4593_v17 = vmul.f32 %v4590_v2, %v7721_v24  ;;  %v4594_v9 = vmul.f32 %v4590_v2, %v7726_v15  ;;  %v4595_v56 = vmul.f32 %v4590_v2, %v7739_v1  ;;  %v8152_v44 = vld [vmem:[#allocation22_spill] sm:$0xff]  ;;  %v2355_v24 = vpop.permute.xlu1 %2354 }
 0x6a9   : > { %4604 = vrot.lane.b32.xlu0 %v4594_v9, %s5998_s28  ;;  %4600 = vrot.lane.b32.xlu1 %v4592_v25, %s5998_s28 }
 0x6aa   : > { %4602 = vrot.lane.b32.xlu2 %v4593_v17, %s5998_s28 }
 0x6ae   : > { %v2327_v40 = vpop.permute.xlu2 %2326 }
 0x6af   : > { %v2339_v31 = vmul.f32 %v2327_v40, %v8149_v60  ;;  %v2340_v23 = vmul.f32 %v2327_v40, %v8150_v3  ;;  %v2341_v12 = vmul.f32 %v2327_v40, %v8151_v20  ;;  %v4530_v34 = vmul.f32 %v8152_v44, %v2327_v40 }
 0x6b0   : > { %v4531_v15 = vmul.f32 %v7691_v22, %v2327_v40  ;;  %v4532_v4 = vmul.f32 %v7701_v42, %v2327_v40  ;;  %v5999_v44 = vmov 6  }
 0x6b1   : > { %4606 = vrot.lane.b32.xlu1 %v4595_v56, %s5998_s28  ;;  %v7951_v49 = vadd.f32 %v2355_v24, %v2339_v31  ;;  %v7953_v26 = vadd.f32 %v2355_v24, %v2340_v23  ;;  %v7955_v1 = vadd.f32 %v2355_v24, %v2341_v12  ;;  %v7957_v29 = vadd.f32 %v4530_v34, %v2355_v24 }
 0x6b2   : > { %2358 = vperm.xlu2 %5929, %v7767_v33   ;;  %v7960_v54 = vadd.f32 %v4531_v15, %v2355_v24  ;;  %v7962_v32 = vadd.f32 %v4532_v4, %v2355_v24  ;;  %5934 = vset.pattern.permute.xlu1 %v5999_v44 }
 0x6b3   : > { %8153 = vst [vmem:[#allocation14_spill] sm:$0xff] %v7957_v29  ;;  %5933 = vset.pattern.permute.xlu0 %v5999_v44 }
 0x6b4   : > { %8154 = vst [vmem:[#allocation21_spill] sm:$0xff] %v7960_v54 }
 0x6b5   : > { %8155 = vst [vmem:[#allocation9_spill] sm:$0xff] %v7962_v32 }
 0x6b7   : > { %v2347_v51 = vpop.permute.xlu2 %2346 }
 0x6b8   : > { %v7965_v22 = vadd.f32 %v2347_v51, %v7884_v0  ;;  %v7968_v42 = vadd.f32 %v2347_v51, %v7887_v21  ;;  %v7971_v48 = vadd.f32 %v2347_v51, %v7890_v27  ;;  %v7974_v16 = vadd.f32 %v7893_v45, %v2347_v51  ;;  %v2433_v0 = vpop.permute.xlu0 %2432  ;;  %v2429_v21 = vpop.permute.xlu1 %2428 }
 0x6b9   : > { %v7977_v2 = vadd.f32 %v7898_v61, %v2347_v51  ;;  %v7980_v25 = vadd.f32 %v7901_v46, %v2347_v51  ;;  %v2447_v40 = vsel %vm2397_vm11, %v2433_v0, 0.0  ;;  %v2441_v45 = vsel %vm2397_vm11, %v2429_v21, 0.0 }
 0x6ba   : > { %5932 = vset.pattern.permute.xlu2 %v5999_v44 }
 0x6bf   : > { %v2427_v17 = vpop.permute.xlu2 %2426 }
 0x6c0   : > { %v2438_v9 = vsel %vm2397_vm11, %v2427_v17, 0.0 }
 0x6c7   : > { %v2431_v56 = vpop.permute.xlu2 %2430 }
 0x6c8   : > { %v2444_v27 = vsel %vm2397_vm11, %v2431_v56, 0.0 }
 0x6d3   : > { %2439 = vadd.xlane.f32.xlu0 %v2438_v9 }
 0x6db   : > { %2445 = vadd.xlane.f32.xlu2 %v2444_v27  ;;  %2448 = vadd.xlane.f32.xlu0 %v2447_v40 }
 0x6dc   : > { %2442 = vadd.xlane.f32.xlu1 %v2441_v45 }
 0x704   : > { %v4603_v61 = vpop.permute.xlu2 %4602 }
 0x705   : > { %v4615_v46 = vsel %vm2397_vm11, %v4603_v61, 0.0 }
 0x706   : > { %4616 = vadd.xlane.f32.xlu2 %v4615_v46 }
 0x70c   : > { %v7990_v34 = vpop.permute.xlu2 %2358 }
 0x71b   : > { %v4605_v60 = vpop.permute.xlu0 %4604  ;;  %v4601_v31 = vpop.permute.xlu1 %4600 }
 0x71c   : > { %v4618_v3 = vsel %vm2397_vm11, %v4605_v60, 0.0  ;;  %v4612_v23 = vsel %vm2397_vm11, %v4601_v31, 0.0 }
 0x71d   : > { %4619 = vadd.xlane.f32.xlu0 %v4618_v3  ;;  %4613 = vadd.xlane.f32.xlu1 %v4612_v23 }
 0x723   : > { %v4607_v20 = vpop.permute.xlu1 %4606 }
 0x724   : > { %v4621_v12 = vsel %vm2397_vm11, %v4607_v20, 0.0 }
 0x725   : > { %4622 = vadd.xlane.f32.xlu1 %v4621_v12 }
 0x746   : > { %v2440_v24 = vpop.xlane.xlu0 %2439 }
 0x747   : > { %v2450_v15 = vadd.f32 %v7846_v19, %v2440_v24 }
 0x749   : > { %v5238_v4 = vmul.f32 -1.442695, %v2450_v15 }
 0x74b   : > { %5935 = vpow2.f32 %v5238_v4 }
 0x74e   : > { %v2446_v51 = vpop.xlane.xlu2 %2445  ;;  %v2449_v17 = vpop.xlane.xlu0 %2448 }
 0x74f   : > { %v2452_v9 = vadd.f32 %v7802_v41, %v2446_v51  ;;  %v2453_v0 = vadd.f32 %v7767_v33, %v2449_v17  ;;  %v2443_v56 = vpop.xlane.xlu1 %2442 }
 0x750   : > { %v2451_v21 = vadd.f32 %v7755_v43, %v2443_v56 }
 0x751   : > { %v5936_v40 = vpop.eup %5935  ;;  %v5240_v27 = vmul.f32 -1.442695, %v2452_v9  ;;  %v5241_v45 = vmul.f32 -1.442695, %v2453_v0 }
 0x752   : > { %v2466_v61 = vadd.f32 1.0, %v5936_v40  ;;  %v5239_v46 = vmul.f32 -1.442695, %v2451_v21 }
 0x753   : > { %5937 = vpow2.f32 %v5240_v27 }
 0x754   : > { %5939 = vrcp.f32 %v2466_v61  ;;  %v2481_v4 = vand.u32 2147483648, %v2466_v61  ;;  %v2479_v17 = vand.u32 2147483647, %v2466_v61  ;;  %vm2475_vm13 = vweird.f32 %v2466_v61 }
 0x755   : > { %5941 = vpow2.f32 %v5241_v45 }
 0x756   : > { %5943 = vpow2.f32 %v5239_v46  ;;  %v2482_v56 = vor.u32 1.1754944e-38, %v2481_v4  ;;  %vm2480_vm15 = vcmp.eq.f32.partialorder %v2479_v17, 8.507059e+37 }
 0x759   : > { %v5938_v60 = vpop.eup %5937 }
 0x75a   : > { %v5940_v31 = vpop.eup %5939  ;;  %v2468_v3 = vadd.f32 1.0, %v5938_v60 }
 0x75b   : > { %v5942_v23 = vpop.eup %5941  ;;  %v2471_v20 = vmul.f32 %v5940_v31, %v2466_v61  ;;  %vm2476_vm12 = vweird.f32 %v5940_v31 }
 0x75c   : > { %v5944_v12 = vpop.eup %5943  ;;  %5945 = vrcp.f32 %v2468_v3  ;;  %v2469_v44 = vadd.f32 1.0, %v5942_v23  ;;  %vm2477_vm14 = vmor %vm2475_vm13, %vm2476_vm12  ;;  %vm2505_vm1 = vweird.f32 %v2468_v3 }
 0x75d   : > { %v2467_v24 = vadd.f32 1.0, %v5944_v12  ;;  %v2472_v15 = vsub.f32 1.0, %v2471_v20  ;;  %v2511_v20 = vand.u32 2147483648, %v2468_v3 }
 0x75e   : > { %5947 = vrcp.f32 %v2469_v44  ;;  %v2524_v61 = vand.u32 2147483647, %v2469_v44  ;;  %vm2520_vm6 = vweird.f32 %v2469_v44 }
 0x75f   : > { %5949 = vrcp.f32 %v2467_v24  ;;  %v2473_v51 = vmul.f32 %v5940_v31, %v2472_v15  ;;  %v2509_v15 = vand.u32 2147483647, %v2468_v3  ;;  %v2496_v17 = vand.u32 2147483648, %v2467_v24 }
 0x760   : > { %vm2490_vm8 = vweird.f32 %v2467_v24  ;;  %vm2525_vm9 = vcmp.eq.f32.partialorder %v2524_v61, 8.507059e+37 }
 0x761   : > { %v2474_v9 = vadd.f32 %v5940_v31, %v2473_v51  ;;  %v2526_v51 = vand.u32 2147483648, %v2469_v44  ;;  %vm2510_vm5 = vcmp.eq.f32.partialorder %v2509_v15, 8.507059e+37 }
 0x762   : > { %v5946_v0 = vpop.eup %5945 }
 0x763   : > { %v2478_v21 = vsel %vm2477_vm14, %v5940_v31, %v2474_v9  ;;  %v2501_v40 = vmul.f32 %v5946_v0, %v2468_v3  ;;  %vm2506_vm0 = vweird.f32 %v5946_v0  ;;  %v2512_v9 = vor.u32 1.1754944e-38, %v2511_v20 }
 0x764   : > { %v5948_v27 = vpop.eup %5947  ;;  %v2483_v45 = vsel %vm2480_vm15, %v2482_v56, %v2478_v21  ;;  %vm2507_vm3 = vmor %vm2505_vm1, %vm2506_vm0  ;;  %v2494_v21 = vand.u32 2147483647, %v2467_v24 }
 0x765   : > { %v5950_v46 = vpop.eup %5949  ;;  %2532 = vperm.xlu2 %5932, %v2483_v45   ;;  %v2502_v60 = vsub.f32 1.0, %v2501_v40  ;;  %v2516_v23 = vmul.f32 %v5948_v27, %v2469_v44  ;;  %vm2521_vm2 = vweird.f32 %v5948_v27 }
 0x766   : > { %v2486_v12 = vmul.f32 %v5950_v46, %v2467_v24  ;;  %vm2491_vm4 = vweird.f32 %v5950_v46  ;;  %vm2522_vm7 = vmor %vm2520_vm6, %vm2521_vm2  ;;  %vm2495_vm11 = vcmp.eq.f32.partialorder %v2494_v21, 8.507059e+37 }
 0x767   : > { %v2503_v32 = vmul.f32 %v5946_v0, %v2502_v60  ;;  %v2517_v54 = vsub.f32 1.0, %v2516_v23  ;;  %v2527_v23 = vor.u32 1.1754944e-38, %v2526_v51  ;;  %vm2492_vm10 = vmor %vm2490_vm8, %vm2491_vm4 }
 0x768   : > { %v2487_v29 = vsub.f32 1.0, %v2486_v12 }
 0x769   : > { %v2504_v4 = vadd.f32 %v5946_v0, %v2503_v32  ;;  %v2518_v31 = vmul.f32 %v5948_v27, %v2517_v54  ;;  %v2497_v54 = vor.u32 1.1754944e-38, %v2496_v17 }
 0x76a   : > { %v2488_v56 = vmul.f32 %v5950_v46, %v2487_v29 }
 0x76b   : > { %v2508_v40 = vsel %vm2507_vm3, %v5946_v0, %v2504_v4  ;;  %v2519_v45 = vadd.f32 %v5948_v27, %v2518_v31 }
 0x76c   : > { %v2513_v60 = vsel %vm2510_vm5, %v2512_v9, %v2508_v40  ;;  %v2489_v3 = vadd.f32 %v5950_v46, %v2488_v56 }
 0x76d   : > { %2542 = vperm.xlu1 %5934, %v2513_v60   ;;  %v2523_v12 = vsel %vm2522_vm7, %v5948_v27, %v2519_v45 }
 0x76e   : > { %v2528_v32 = vsel %vm2525_vm9, %v2527_v23, %v2523_v12  ;;  %v2493_v37 = vsel %vm2492_vm10, %v5950_v46, %v2489_v3 }
 0x76f   : > { %2547 = vperm.xlu2 %5932, %v2528_v32   ;;  %v2498_v29 = vsel %vm2495_vm11, %v2497_v54, %v2493_v37 }
 0x770   : > { %2537 = vperm.xlu0 %5933, %v2498_v29  }
 0x779   : > { %v4617_v0 = vpop.xlane.xlu2 %4616 }
 0x77a   : > { %v4625_v20 = vadd.f32 %v7755_v43, %v4617_v0 }
 0x77c   : > { %v5677_v44 = vmul.f32 -1.442695, %v4625_v20 }
 0x77e   : > { %5951 = vpow2.f32 %v5677_v44 }
 0x784   : > { %v5952_v15 = vpop.eup %5951 }
 0x785   : > { %v4641_v51 = vadd.f32 1.0, %v5952_v15 }
 0x787   : > { %5953 = vrcp.f32 %v4641_v51  ;;  %v4670_v9 = vand.u32 2147483648, %v4641_v51  ;;  %v4668_v56 = vand.u32 2147483647, %v4641_v51  ;;  %vm4664_vm13 = vweird.f32 %v4641_v51 }
 0x789   : > { %v4671_v45 = vor.u32 1.1754944e-38, %v4670_v9  ;;  %vm4669_vm15 = vcmp.eq.f32.partialorder %v4668_v56, 8.507059e+37 }
 0x78d   : > { %v5954_v24 = vpop.eup %5953 }
 0x78e   : > { %v4660_v4 = vmul.f32 %v5954_v24, %v4641_v51  ;;  %vm4665_vm12 = vweird.f32 %v5954_v24 }
 0x78f   : > { %vm4666_vm14 = vmor %vm4664_vm13, %vm4665_vm12 }
 0x790   : > { %v4620_v27 = vpop.xlane.xlu0 %4619  ;;  %v4614_v61 = vpop.xlane.xlu1 %4613  ;;  %v4661_v31 = vsub.f32 1.0, %v4660_v4 }
 0x791   : > { %v4626_v17 = vadd.f32 %v7802_v41, %v4620_v27  ;;  %v4624_v46 = vadd.f32 %v7846_v19, %v4614_v61 }
 0x792   : > { %v4662_v37 = vmul.f32 %v5954_v24, %v4661_v31 }
 0x793   : > { %v5678_v21 = vmul.f32 -1.442695, %v4626_v17  ;;  %v5676_v43 = vmul.f32 -1.442695, %v4624_v46 }
 0x794   : > { %v4663_v40 = vadd.f32 %v5954_v24, %v4662_v37 }
 0x795   : > { %5955 = vpow2.f32 %v5678_v21 }
 0x796   : > { %5957 = vpow2.f32 %v5676_v43  ;;  %v4667_v60 = vsel %vm4666_vm14, %v5954_v24, %v4663_v40 }
 0x797   : > { %v4672_v23 = vsel %vm4669_vm15, %v4671_v45, %v4667_v60 }
 0x798   : > { %4711 = vperm.xlu2 %5932, %v4672_v23   ;;  %v4623_v3 = vpop.xlane.xlu1 %4622 }
 0x799   : > { %v4627_v41 = vadd.f32 %v7767_v33, %v4623_v3 }
 0x79b   : > { %v5956_v19 = vpop.eup %5955  ;;  %v5679_v12 = vmul.f32 -1.442695, %v4627_v41 }
 0x79c   : > { %v5958_v54 = vpop.eup %5957  ;;  %v4642_v32 = vadd.f32 1.0, %v5956_v19 }
 0x79d   : > { %v4640_v29 = vadd.f32 1.0, %v5958_v54  ;;  %5959 = vpow2.f32 %v5679_v12 }
 0x79e   : > { %5961 = vrcp.f32 %v4642_v32  ;;  %v4685_v23 = vand.u32 2147483648, %v4642_v32  ;;  %vm4679_vm6 = vweird.f32 %v4642_v32  ;;  %v4683_v19 = vand.u32 2147483647, %v4642_v32 }
 0x79f   : > { %5963 = vrcp.f32 %v4640_v29  ;;  %v4655_v61 = vand.u32 2147483648, %v4640_v29  ;;  %v4653_v33 = vand.u32 2147483647, %v4640_v29  ;;  %vm4649_vm1 = vweird.f32 %v4640_v29 }
 0x7a0   : > { %vm4684_vm11 = vcmp.eq.f32.partialorder %v4683_v19, 8.507059e+37  ;;  %v8162_v19 = vld [vmem:[#allocation29_spill] sm:$0xff] }
 0x7a1   : > { %v4656_v37 = vor.u32 1.1754944e-38, %v4655_v61  ;;  %vm4654_vm3 = vcmp.eq.f32.partialorder %v4653_v33, 8.507059e+37 }
 0x7a3   : > { %v5960_v0 = vpop.eup %5959 }
 0x7a4   : > { %v5962_v20 = vpop.eup %5961  ;;  %v4643_v44 = vadd.f32 1.0, %v5960_v0  ;;  %v4686_v0 = vor.u32 1.1754944e-38, %v4685_v23 }
 0x7a5   : > { %v5964_v15 = vpop.eup %5963  ;;  %v4675_v51 = vmul.f32 %v5962_v20, %v4642_v32  ;;  %vm4680_vm4 = vweird.f32 %v5962_v20 }
 0x7a6   : > { %5965 = vrcp.f32 %v4643_v44  ;;  %v4645_v24 = vmul.f32 %v5964_v15, %v4640_v29  ;;  %vm4650_vm0 = vweird.f32 %v5964_v15  ;;  %v4700_v60 = vand.u32 2147483648, %v4643_v44  ;;  %vm4681_vm7 = vmor %vm4679_vm6, %vm4680_vm4 }
 0x7a7   : > { %v4676_v27 = vsub.f32 1.0, %v4675_v51  ;;  %vm4651_vm2 = vmor %vm4649_vm1, %vm4650_vm0  ;;  %v4698_v41 = vand.u32 2147483647, %v4643_v44  ;;  %vm4694_vm8 = vweird.f32 %v4643_v44 }
 0x7a8   : > { %v4646_v4 = vsub.f32 1.0, %v4645_v24  ;;  %v4701_v29 = vor.u32 1.1754944e-38, %v4700_v60 }
 0x7a9   : > { %v4677_v9 = vmul.f32 %v5962_v20, %v4676_v27  ;;  %vm4699_vm10 = vcmp.eq.f32.partialorder %v4698_v41, 8.507059e+37 }
 0x7aa   : > { %v4647_v31 = vmul.f32 %v5964_v15, %v4646_v4 }
 0x7ab   : > { %v4678_v45 = vadd.f32 %v5962_v20, %v4677_v9  ;;  %v8158_v9 = vld [vmem:[#allocation18_spill] sm:$0xff] }
 0x7ac   : > { %v5966_v17 = vpop.eup %5965  ;;  %v4648_v46 = vadd.f32 %v5964_v15, %v4647_v31 }
 0x7ad   : > { %v4690_v56 = vmul.f32 %v5966_v17, %v4643_v44  ;;  %vm4695_vm5 = vweird.f32 %v5966_v17  ;;  %v4682_v54 = vsel %vm4681_vm7, %v5962_v20, %v4678_v45 }
 0x7ae   : > { %v4652_v21 = vsel %vm4651_vm2, %v5964_v15, %v4648_v46  ;;  %vm4696_vm9 = vmor %vm4694_vm8, %vm4695_vm5  ;;  %v4687_v24 = vsel %vm4684_vm11, %v4686_v0, %v4682_v54  ;;  %v8157_v46 = vld [vmem:[#allocation7_spill] sm:$0xff]  ;;  %v8163_v54 = vld [vmem:[#allocation30_spill] sm:$0xff] }
 0x7af   : > { %v4657_v43 = vsel %vm4654_vm3, %v4656_v37, %v4652_v21  ;;  %v4691_v40 = vsub.f32 1.0, %v4690_v56  ;;  %v8161_v56 = vld [vmem:[#allocation19_spill] sm:$0xff] }
 0x7b0   : > { %4706 = vperm.xlu1 %5934, %v4657_v43  }
 0x7b1   : > { %v4692_v3 = vmul.f32 %v5966_v17, %v4691_v40 }
 0x7b3   : > { %v4693_v12 = vadd.f32 %v5966_v17, %v4692_v3 }
 0x7b5   : > { %v4697_v15 = vsel %vm4696_vm9, %v5966_v17, %v4693_v12 }
 0x7b6   : > { %v4702_v51 = vsel %vm4699_vm10, %v4701_v29, %v4697_v15 }
 0x7b7   : > { %4721 = vperm.xlu2 %5932, %v4702_v51  }
 0x7b8   : > { %4716 = vperm.xlu1 %5934, %v4687_v24  }
 0x7bf   : > { %v2533_v4 = vpop.permute.xlu2 %2532 }
 0x7c0   : > { %v2550_v27 = vmul.f32 %v2533_v4, %v7605_v39  ;;  %v2551_v32 = vmul.f32 %v2533_v4, %v7608_v36  ;;  %v2552_v61 = vmul.f32 %v2533_v4, %v7613_v55  ;;  %v8156_v36 = vld [vmem:[#allocation13_spill] sm:$0xff] }
 0x7c1   : > { %v888_v55 = vadd.f32 %v8157_v46, %v8156_v36  ;;  %v8167_v46 = vld [vmem:[#allocation23_spill] sm:$0xff] }
 0x7c2   : > { %v2562_v20 = vadd.f32 %v2550_v27, %v7965_v22  ;;  %v2563_v44 = vadd.f32 %v2551_v32, %v7968_v42  ;;  %v2564_v31 = vadd.f32 %v2552_v61, %v7971_v48  ;;  %v8159_v22 = vld [vmem:[#allocation8_spill] sm:$0xff]  ;;  %v8164_v32 = vld [vmem:[#allocation26_spill] sm:$0xff] }
 0x7c3   : > { %v946_v37 = vadd.f32 %v8159_v22, %v8158_v9  ;;  %v8160_v42 = vld [vmem:[#allocation20_spill] sm:$0xff]  ;;  %v2342_v21 = vmul.f32 %v7868_v47, %v888_v55 }
 0x7c4   : > { %v2574_v33 = vmax.f32 %v2562_v20, 0.0  ;;  %v2575_v39 = vmax.f32 %v2563_v44, 0.0  ;;  %v2576_v17 = vmax.f32 %v2564_v31, 0.0  ;;  %v1004_v48 = vadd.f32 %v8161_v56, %v8160_v42  ;;  %v8165_v20 = vld [vmem:[#allocation27_spill] sm:$0xff]  ;;  %v8168_v9 = vld [vmem:[#allocation24_spill] sm:$0xff] }
 0x7c5   : > { %v2343_v43 = vmul.f32 %v7868_v47, %v946_v37  ;;  %v2370_v60 = vadd.f32 %v7990_v34, %v2342_v21  ;;  %v8169_v37 = vld [vmem:[#allocation25_spill] sm:$0xff] }
 0x7c6   : > { %2586 = vst [vmem:[%s8010_s18] sm:$0xff] %v2574_v33  ;;  %v2344_v40 = vmul.f32 %v7868_v47, %v1004_v48 }
 0x7c7   : > { %2587 = vst [vmem:[%s8010_s18 + $0x8] sm:$0xff] %v2575_v39  ;;  %v2371_v23 = vadd.f32 %v7990_v34, %v2343_v43 }
 0x7c8   : > { %2588 = vst [vmem:[%s8010_s18 + $0x10] sm:$0xff] %v2576_v17  ;;  %v2372_v3 = vadd.f32 %v7990_v34, %v2344_v40 }
 0x7c9   : > { %v2548_v45 = vpop.permute.xlu2 %2547 }
 0x7ca   : > { %v2559_v41 = vmul.f32 %v2548_v45, %v7658_v13  ;;  %v2560_v12 = vmul.f32 %v2548_v45, %v8162_v19  ;;  %v2561_v29 = vmul.f32 %v2548_v45, %v8163_v54  ;;  %v8166_v13 = vld [vmem:[#allocation28_spill] sm:$0xff] }
 0x7cc   : > { %v2571_v0 = vadd.f32 %v2559_v41, %v2370_v60  ;;  %v2572_v15 = vadd.f32 %v2560_v12, %v2371_v23  ;;  %v2573_v51 = vadd.f32 %v2561_v29, %v2372_v3 }
 0x7ce   : > { %v2583_v24 = vmax.f32 %v2571_v0, 0.0  ;;  %v2584_v4 = vmax.f32 %v2572_v15, 0.0  ;;  %v2585_v47 = vmax.f32 %v2573_v51, 0.0 }
 0x7d0   : > { %2595 = vst [vmem:[%s8010_s18 + $0x48] sm:$0xff] %v2583_v24 }
 0x7d1   : > { %2596 = vst [vmem:[%s8010_s18 + $0x50] sm:$0xff] %v2584_v4 }
 0x7d2   : > { %2597 = vst [vmem:[%s8010_s18 + $0x58] sm:$0xff] %v2585_v47 }
 0x7df   : > { %v2543_v27 = vpop.permute.xlu1 %2542 }
 0x7e0   : > { %v2556_v61 = vmul.f32 %v2543_v27, %v8164_v32  ;;  %v2557_v44 = vmul.f32 %v2543_v27, %v8165_v20  ;;  %v2558_v31 = vmul.f32 %v2543_v27, %v8166_v13  ;;  %v8172_v13 = vld [vmem:[#allocation21_spill] sm:$0xff] }
 0x7e2   : > { %v2568_v33 = vadd.f32 %v2556_v61, %v7951_v49  ;;  %v2569_v39 = vadd.f32 %v2557_v44, %v7953_v26  ;;  %v2570_v17 = vadd.f32 %v2558_v31, %v7955_v1  ;;  %v2538_v36 = vpop.permute.xlu0 %2537  ;;  %v8171_v44 = vld [vmem:[#allocation14_spill] sm:$0xff]  ;;  %v8173_v31 = vld [vmem:[#allocation9_spill] sm:$0xff] }
 0x7e3   : > { %v2553_v55 = vmul.f32 %v2538_v36, %v8167_v46  ;;  %v2554_v22 = vmul.f32 %v2538_v36, %v8168_v9  ;;  %v2555_v42 = vmul.f32 %v2538_v36, %v8169_v37 }
 0x7e4   : > { %v2580_v56 = vmax.f32 %v2568_v33, 0.0  ;;  %v2581_v48 = vmax.f32 %v2569_v39, 0.0  ;;  %v2582_v21 = vmax.f32 %v2570_v17, 0.0 }
 0x7e5   : > { %v2565_v49 = vadd.f32 %v2553_v55, %v7914_v63  ;;  %v2566_v26 = vadd.f32 %v2554_v22, %v7916_v57  ;;  %v2567_v1 = vadd.f32 %v2555_v42, %v7918_v30 }
 0x7e6   : > { %2592 = vst [vmem:[%s8010_s18 + $0x30] sm:$0xff] %v2580_v56 }
 0x7e7   : > { %2593 = vst [vmem:[%s8010_s18 + $0x38] sm:$0xff] %v2581_v48  ;;  %v2577_v43 = vmax.f32 %v2565_v49, 0.0  ;;  %v2578_v40 = vmax.f32 %v2566_v26, 0.0  ;;  %v2579_v45 = vmax.f32 %v2567_v1, 0.0 }
 0x7e8   : > { %2594 = vst [vmem:[%s8010_s18 + $0x40] sm:$0xff] %v2582_v21 }
 0x7e9   : > { %2589 = vst [vmem:[%s8010_s18 + $0x18] sm:$0xff] %v2577_v43 }
 0x7ea   : > { %2590 = vst [vmem:[%s8010_s18 + $0x20] sm:$0xff] %v2578_v40 }
 0x7eb   : > { %2591 = vst [vmem:[%s8010_s18 + $0x28] sm:$0xff] %v2579_v45 }
 0x7f2   : > { %v4712_v60 = vpop.permute.xlu2 %4711 }
 0x7f3   : > { %v4727_v23 = vmul.f32 %v4712_v60, %v7792_v58  ;;  %v4728_v63 = vmul.f32 %v4712_v60, %v7795_v5  ;;  %v4729_v57 = vmul.f32 %v4712_v60, %v7814_v52  ;;  %v4545_v58 = vadd.f32 %v7872_v28, %v7990_v34 }
 0x7f4   : > { %v4546_v5 = vadd.f32 %v7876_v6, %v7990_v34 }
 0x7f5   : > { %v4739_v30 = vadd.f32 %v4727_v23, %v7920_v53  ;;  %v4740_v3 = vadd.f32 %v4728_v63, %v7922_v62  ;;  %v4741_v41 = vadd.f32 %v4729_v57, %v7924_v59  ;;  %v4547_v53 = vadd.f32 %v7880_v8, %v7990_v34 }
 0x7f7   : > { %v4751_v19 = vmax.f32 %v4739_v30, 0.0  ;;  %v4752_v12 = vmax.f32 %v4740_v3, 0.0  ;;  %v4753_v54 = vmax.f32 %v4741_v41, 0.0 }
 0x7f9   : > { %5683 = vst [vmem:[%s8010_s18 + $0x78] sm:$0xff] %v4751_v19 }
 0x7fa   : > { %5684 = vst [vmem:[%s8010_s18 + $0x80] sm:$0xff] %v4752_v12 }
 0x7fb   : > { %5685 = vst [vmem:[%s8010_s18 + $0x88] sm:$0xff] %v4753_v54 }
 0x811   : > { %v4722_v52 = vpop.permute.xlu2 %4721 }
 0x812   : > { %v4733_v62 = vmul.f32 %v4722_v52, %v7836_v10  ;;  %v4734_v59 = vmul.f32 %v4722_v52, %v7839_v11  ;;  %v4735_v29 = vmul.f32 %v4722_v52, %v7850_v35 }
 0x814   : > { %v4745_v0 = vadd.f32 %v4733_v62, %v4545_v58  ;;  %v4746_v15 = vadd.f32 %v4734_v59, %v4546_v5  ;;  %v4747_v51 = vadd.f32 %v4735_v29, %v4547_v53 }
 0x816   : > { %v4757_v24 = vmax.f32 %v4745_v0, 0.0  ;;  %v4758_v4 = vmax.f32 %v4746_v15, 0.0  ;;  %v4759_v28 = vmax.f32 %v4747_v51, 0.0 }
 0x818   : > { %5689 = vst [vmem:[%s8010_s18 + $0xa8] sm:$0xff] %v4757_v24 }
 0x819   : > { %5690 = vst [vmem:[%s8010_s18 + $0xb0] sm:$0xff] %v4758_v4 }
 0x81a   : > { %5691 = vst [vmem:[%s8010_s18 + $0xb8] sm:$0xff] %v4759_v28 }
 0x822   : > { %v4707_v6 = vpop.permute.xlu1 %4706 }
 0x823   : > { %v4724_v8 = vmul.f32 %v4707_v6, %v7773_v38  ;;  %v4725_v10 = vmul.f32 %v4707_v6, %v7776_v50  ;;  %v4726_v11 = vmul.f32 %v4707_v6, %v7785_v18  ;;  %v8170_v18 = vld [vmem:[#allocation31_spill] sm:$0xff] }
 0x825   : > { %v4736_v35 = vadd.f32 %v4724_v8, %v7974_v16  ;;  %v4737_v34 = vadd.f32 %v4725_v10, %v7977_v2  ;;  %v4738_v47 = vadd.f32 %v4726_v11, %v7980_v25 }
 0x827   : > { %v4748_v27 = vmax.f32 %v4736_v35, 0.0  ;;  %v4749_v32 = vmax.f32 %v4737_v34, 0.0  ;;  %v4750_v61 = vmax.f32 %v4738_v47, 0.0 }
 0x829   : > { %5680 = vst [vmem:[%s8010_s18 + $0x60] sm:$0xff] %v4748_v27 }
 0x82a   : > { %5681 = vst [vmem:[%s8010_s18 + $0x68] sm:$0xff] %v4749_v32  ;;  %v4717_v20 = vpop.permute.xlu1 %4716 }
 0x82b   : > { %5682 = vst [vmem:[%s8010_s18 + $0x70] sm:$0xff] %v4750_v61  ;;  %v4730_v38 = vmul.f32 %v4717_v20, %v7818_v7  ;;  %v4731_v50 = vmul.f32 %v4717_v20, %v7821_v14  ;;  %v4732_v16 = vmul.f32 %v4717_v20, %v8170_v18 }
 0x82d   : > { %v4742_v2 = vadd.f32 %v4730_v38, %v8171_v44  ;;  %v4743_v25 = vadd.f32 %v4731_v50, %v8172_v13  ;;  %v4744_v33 = vadd.f32 %v4732_v16, %v8173_v31 }
 0x82f   : > { %v4754_v39 = vmax.f32 %v4742_v2, 0.0  ;;  %v4755_v17 = vmax.f32 %v4743_v25, 0.0  ;;  %v4756_v36 = vmax.f32 %v4744_v33, 0.0 }
 0x831   : > { %5686 = vst [vmem:[%s8010_s18 + $0x90] sm:$0xff] %v4754_v39 }
 0x832   : > { %5687 = vst [vmem:[%s8010_s18 + $0x98] sm:$0xff] %v4755_v17 }
 0x833   : > { %5688 = vst [vmem:[%s8010_s18 + $0xa0] sm:$0xff] %v4756_v36 }
 0x834 PF: > { %s17_s24 = sadd.s32 1, %s5981_s24  }
 0x835   : > { %p14_p4 = scmp.ge.s32.totalorder %s17_s24, 4  }
 0x837   :  { %16 = sbr.rel (!%p14_p4) target bundleno = 1 (0x1), region = 80 }

</bundles_post_ra>
